<compile_context>
chip_gen: v7x
topology: tpu7x:2x2x1
jax: 0.10.0
libtpu: 0.0.40
codegen_flags: <defaults>
</compile_context>

<pallas_src>
import functools
import math

import jax
import jax.numpy as jnp
import numpy as np
from jax.experimental import pallas as pl
from jax.experimental.pallas import tpu as pltpu


def _layernorm_f32(h, g, b, eps=1e-5):
    mu = jnp.mean(h, axis=-1, keepdims=True)
    var = jnp.mean((h - mu) ** 2, axis=-1, keepdims=True)
    return (h - mu) * jax.lax.rsqrt(var + eps) * g + b


def block_kernel(
    x_ref, skip_ref,
    wsx_ref, wss_ref, bs_ref,                # skip_linear (split along input dim), bias
    g1_ref, b1_ref,                          # norm1
    wq_ref, wk_ref, wv_ref,                  # head-major qkv weights: (H, C, hd), bf16
    wproj_ref, bproj_ref,                    # attn out-proj
    g2_ref, b2_ref,                          # norm2
    wfc1_ref, bfc1_ref, wfc2_ref, bfc2_ref,  # mlp
    o_ref,
    *, num_heads, head_dim, mlp_chunk,
):
    f32 = jnp.float32
    bf16 = jnp.bfloat16
    C = num_heads * head_dim

    xb = x_ref[0].astype(bf16)      # (L, C) bf16 matmul operand
    sb = skip_ref[0].astype(bf16)

    # --- skip_linear(cat([x, skip], -1)) == x @ Wsx + skip @ Wss + b   (f32 residual) ---
    h = (jnp.dot(xb, wsx_ref[...], preferred_element_type=f32)
         + jnp.dot(sb, wss_ref[...], preferred_element_type=f32)
         + bs_ref[...])

    # --- x = x + attn(norm1(x)) ---
    n1b = _layernorm_f32(h, g1_ref[...], b1_ref[...]).astype(bf16)
    scale = 1.0 / math.sqrt(head_dim)
    q_l, k_l, v_l = [], [], []
    for hi in range(num_heads):  # head slabs indexed on the leading axis (lane-aligned), K=C
        q_l.append((jnp.dot(n1b, wq_ref[hi], preferred_element_type=f32) * scale).astype(bf16))
        k_l.append(jnp.dot(n1b, wk_ref[hi], preferred_element_type=f32).astype(bf16))
        v_l.append(jnp.dot(n1b, wv_ref[hi], preferred_element_type=f32).astype(bf16))
    q = jnp.stack(q_l)   # (H, L, hd) bf16
    k = jnp.stack(k_l)
    v = jnp.stack(v_l)

    # batched attention over heads, f32 softmax statistics
    sc = jnp.einsum("hqd,hkd->hqk", q, k, preferred_element_type=f32)      # (H, L, L)
    sc = sc - jnp.max(sc, axis=-1, keepdims=True)
    p = jnp.exp(sc)
    p = p * pl.reciprocal(jnp.sum(p, axis=-1, keepdims=True), approx=True)
    o = jnp.einsum("hqk,hkd->hqd", p.astype(bf16), v, preferred_element_type=f32)  # (H, L, hd)

    # concatenate heads once -> single K=C output projection
    attn = jnp.concatenate([o[hi] for hi in range(num_heads)], axis=-1).astype(bf16)  # (L, C)
    h = h + jnp.dot(attn, wproj_ref[...], preferred_element_type=f32) + bproj_ref[...]

    # --- x = x + mlp(norm2(x)), hidden dim processed in chunks ---
    n2b = _layernorm_f32(h, g2_ref[...], b2_ref[...]).astype(bf16)
    hidden = 4 * C
    mlp_out = jnp.zeros_like(h)
    for c0 in range(0, hidden, mlp_chunk):
        c1 = c0 + mlp_chunk
        m = (jnp.dot(n2b, wfc1_ref[:, c0:c1], preferred_element_type=f32)
             + bfc1_ref[:, c0:c1])
        # exact GELU (erf), matching torch nn.GELU default; multiply by 1/sqrt(2)
        m = 0.5 * m * (1.0 + jax.lax.erf(m * 0.7071067811865476))
        mlp_out = mlp_out + jnp.dot(m.astype(bf16), wfc2_ref[c0:c1, :],
                                    preferred_element_type=f32)
    h = h + mlp_out + bfc2_ref[...]

    o_ref[0] = h.astype(o_ref.dtype)


def _vmem_limit_bytes(L, C, num_heads, single_buffer_weights):
    hd = C // num_heads
    wbuf = 1 if single_buffer_weights else 2
    weights = wbuf * 2 * (14 * C * C)                         # bf16 weight blocks
    vectors = wbuf * 4 * (12 * C)                             # f32 biases / LN params
    io = 3 * 2 * L * C * 4                                    # double-buffered x/skip/out
    interm = 4 * (10 * L * C + 2 * L * min(4 * C, 512)
                  + 2 * num_heads * L * L + 4 * num_heads * L * hd)
    est = int(1.3 * (weights + vectors + io + interm)) + (4 << 20)
    return max(16 << 20, min(est, 64 << 20))                  # cap below v7x's 64 MiB VMEM


def _build_block_call(B, L, C, num_heads, out_dtype, *, single_buffer_weights):
    hd = C // num_heads
    mlp_chunk = 512 if (4 * C > 512 and (4 * C) % 512 == 0) else 4 * C

    def wspec(shape):
        nd = len(shape)
        idx = lambda b, _nd=nd: (0,) * _nd        # grid-invariant block
        if single_buffer_weights:
            # weights never change across the batch grid -> one VMEM copy is enough
            return pl.BlockSpec(shape, idx, pipeline_mode=pl.Buffered(1))
        return pl.BlockSpec(shape, idx)

    def act_spec():
        return pl.BlockSpec((1, L, C), lambda b: (b, 0, 0))

    in_specs = [
        act_spec(), act_spec(),                                    # x, skip
        wspec((C, C)), wspec((C, C)), wspec((1, C)),               # skip_linear
        wspec((1, C)), wspec((1, C)),                              # norm1
        wspec((num_heads, C, hd)), wspec((num_heads, C, hd)),      # wq, wk
        wspec((num_heads, C, hd)),                                 # wv
        wspec((C, C)), wspec((1, C)),                              # proj
        wspec((1, C)), wspec((1, C)),                              # norm2
        wspec((C, 4 * C)), wspec((1, 4 * C)),                      # fc1
        wspec((4 * C, C)), wspec((1, C)),                          # fc2
    ]
    kernel = functools.partial(block_kernel, num_heads=num_heads, head_dim=hd,
                               mlp_chunk=mlp_chunk)
    return pl.pallas_call(
        kernel,
        out_shape=jax.ShapeDtypeStruct((B, L, C), out_dtype),
        grid=(B,),
        in_specs=in_specs,
        out_specs=act_spec(),
        compiler_params=pltpu.CompilerParams(
            dimension_semantics=("parallel",),   # batch elements are independent -> megacore
            vmem_limit_bytes=_vmem_limit_bytes(L, C, num_heads, single_buffer_weights),
        ),
    )


def block_forward(x, skip, params, *, num_heads):
    B, L, C = x.shape
    hd = C // num_heads
    bf16 = jnp.bfloat16

    def head_major(w):   # (C, C) columns head-major -> (H, C, hd), bf16
        return jnp.transpose(w.reshape(C, num_heads, hd), (1, 0, 2)).astype(bf16)

    wqkv = params["wqkv"]
    args = (
        x, skip,
        params["wsx"].astype(bf16), params["wss"].astype(bf16), params["bs"],
        params["g1"], params["b1"],
        head_major(wqkv[:, 0 * C:1 * C]),
        head_major(wqkv[:, 1 * C:2 * C]),
        head_major(wqkv[:, 2 * C:3 * C]),
        params["wproj"].astype(bf16), params["bproj"],
        params["g2"], params["b2"],
        params["wfc1"].astype(bf16), params["bfc1"],
        params["wfc2"].astype(bf16), params["bfc2"],
    )
    try:
        fn = _build_block_call(B, L, C, num_heads, x.dtype, single_buffer_weights=True)
        return jax.block_until_ready(fn(*args))
    except Exception:
        # TODO(synk): pipeline_mode=pl.Buffered(1) not supported on this JAX build;
        # fall back to default double-buffered weight blocks (same math, more VMEM).
        fn = _build_block_call(B, L, C, num_heads, x.dtype, single_buffer_weights=False)
        return fn(*args)


def reference_forward(x, skip, params, *, num_heads):
    """Pure-JAX f32 reference mirroring the PyTorch Block forward."""
    B, L, C = x.shape
    hd = C // num_heads
    h = x @ params["wsx"] + skip @ params["wss"] + params["bs"]

    def ln(z, g, b):
        mu = jnp.mean(z, -1, keepdims=True)
        var = jnp.mean((z - mu) ** 2, -1, keepdims=True)
        return (z - mu) * jax.lax.rsqrt(var + 1e-5) * g + b

    n1 = ln(h, params["g1"], params["b1"])
    qkv = n1 @ params["wqkv"]
    q, k, v = qkv[..., :C], qkv[..., C:2 * C], qkv[..., 2 * C:]
    q = q.reshape(B, L, num_heads, hd).transpose(0, 2, 1, 3)
    k = k.reshape(B, L, num_heads, hd).transpose(0, 2, 1, 3)
    v = v.reshape(B, L, num_heads, hd).transpose(0, 2, 1, 3)
    sc = jnp.einsum("bhqd,bhkd->bhqk", q, k) / math.sqrt(hd)
    p = jax.nn.softmax(sc, axis=-1)
    o = jnp.einsum("bhqk,bhkd->bhqd", p, v).transpose(0, 2, 1, 3).reshape(B, L, C)
    h = h + (o @ params["wproj"] + params["bproj"])

    n2 = ln(h, params["g2"], params["b2"])
    m = n2 @ params["wfc1"] + params["bfc1"]
    m = 0.5 * m * (1.0 + jax.lax.erf(m / jnp.sqrt(2.0)))
    m = m @ params["wfc2"] + params["bfc2"]
    return h + m


def make_params(key, dim):
    ks = jax.random.split(key, 8)
    C = dim
    scale = 0.02
    return {
        # skip_linear weight (C, 2C) in torch (out,in); pre-split/transposed to (C, C) each
        "wsx": jax.random.normal(ks[0], (C, C), jnp.float32) * scale,
        "wss": jax.random.normal(ks[1], (C, C), jnp.float32) * scale,
        "bs": jax.random.normal(ks[2], (1, C), jnp.float32) * scale,
        "g1": jnp.ones((1, C), jnp.float32),
        "b1": jnp.zeros((1, C), jnp.float32),
        "wqkv": jax.random.normal(ks[3], (C, 3 * C), jnp.float32) * scale,  # qkv_bias=False
        "wproj": jax.random.normal(ks[4], (C, C), jnp.float32) * scale,
        "bproj": jax.random.normal(ks[5], (1, C), jnp.float32) * scale,
        "g2": jnp.ones((1, C), jnp.float32),
        "b2": jnp.zeros((1, C), jnp.float32),
        "wfc1": jax.random.normal(ks[6], (C, 4 * C), jnp.float32) * scale,
        "bfc1": jnp.zeros((1, 4 * C), jnp.float32),
        "wfc2": jax.random.normal(ks[7], (4 * C, C), jnp.float32) * scale,
        "bfc2": jnp.zeros((1, C), jnp.float32),
    }


if __name__ == "__main__":
    B, L, dim, num_heads = 2, 8, 32, 4
    key = jax.random.PRNGKey(0)
    kx, ks, kp = jax.random.split(key, 3)
    x = jax.random.normal(kx, (B, L, dim), jnp.float32)
    skip = jax.random.normal(ks, (B, L, dim), jnp.float32)
    params = make_params(kp, dim)

    out = jax.block_until_ready(block_forward(x, skip, params, num_heads=num_heads))
    ref = reference_forward(x, skip, params, num_heads=num_heads)

    # Kernel uses bf16 matmul operands (f32 accumulation) vs the f32 reference,
    # so compare with bf16-appropriate tolerance.
    np.testing.assert_allclose(np.asarray(out), np.asarray(ref), rtol=5e-2, atol=1e-2)

    print("KERNEL_OK")
</pallas_src>

<mosaic_0001>
module attributes {stable_mosaic.version = 11 : i64} {
  func.func @block_kernel(%arg0: i32, %arg1: memref<1x8x32xf32, #tpu.memory_space<vmem>>, %arg2: memref<1x8x32xf32, #tpu.memory_space<vmem>>, %arg3: memref<32x32xbf16, #tpu.memory_space<vmem>>, %arg4: memref<32x32xbf16, #tpu.memory_space<vmem>>, %arg5: memref<1x32xf32, #tpu.memory_space<vmem>>, %arg6: memref<1x32xf32, #tpu.memory_space<vmem>>, %arg7: memref<1x32xf32, #tpu.memory_space<vmem>>, %arg8: memref<4x32x8xbf16, #tpu.memory_space<vmem>>, %arg9: memref<4x32x8xbf16, #tpu.memory_space<vmem>>, %arg10: memref<4x32x8xbf16, #tpu.memory_space<vmem>>, %arg11: memref<32x32xbf16, #tpu.memory_space<vmem>>, %arg12: memref<1x32xf32, #tpu.memory_space<vmem>>, %arg13: memref<1x32xf32, #tpu.memory_space<vmem>>, %arg14: memref<1x32xf32, #tpu.memory_space<vmem>>, %arg15: memref<32x128xbf16, #tpu.memory_space<vmem>>, %arg16: memref<1x128xf32, #tpu.memory_space<vmem>>, %arg17: memref<128x32xbf16, #tpu.memory_space<vmem>>, %arg18: memref<1x32xf32, #tpu.memory_space<vmem>>, %arg19: memref<1x8x32xf32, #tpu.memory_space<vmem>>) attributes {dimension_semantics = [#tpu.dimension_semantics<parallel>], iteration_bounds = array<i64: 2>, scalar_prefetch = 0 : i64, scratch_operands = 0 : i64, tpu.core_type = #tpu.core_type<tc>, window_params = [{transform_indices = @transform_0, window_bounds = array<i64: 1, 8, 32>}, {transform_indices = @transform_1, window_bounds = array<i64: 1, 8, 32>}, {pipeline_mode = #tpu.pipeline_mode<synchronous>, transform_indices = @transform_2, window_bounds = array<i64: 32, 32>}, {pipeline_mode = #tpu.pipeline_mode<synchronous>, transform_indices = @transform_3, window_bounds = array<i64: 32, 32>}, {pipeline_mode = #tpu.pipeline_mode<synchronous>, transform_indices = @transform_4, window_bounds = array<i64: 1, 32>}, {pipeline_mode = #tpu.pipeline_mode<synchronous>, transform_indices = @transform_5, window_bounds = array<i64: 1, 32>}, {pipeline_mode = #tpu.pipeline_mode<synchronous>, transform_indices = @transform_6, window_bounds = array<i64: 1, 32>}, {pipeline_mode = #tpu.pipeline_mode<synchronous>, transform_indices = @transform_7, window_bounds = array<i64: 4, 32, 8>}, {pipeline_mode = #tpu.pipeline_mode<synchronous>, transform_indices = @transform_8, window_bounds = array<i64: 4, 32, 8>}, {pipeline_mode = #tpu.pipeline_mode<synchronous>, transform_indices = @transform_9, window_bounds = array<i64: 4, 32, 8>}, {pipeline_mode = #tpu.pipeline_mode<synchronous>, transform_indices = @transform_10, window_bounds = array<i64: 32, 32>}, {pipeline_mode = #tpu.pipeline_mode<synchronous>, transform_indices = @transform_11, window_bounds = array<i64: 1, 32>}, {pipeline_mode = #tpu.pipeline_mode<synchronous>, transform_indices = @transform_12, window_bounds = array<i64: 1, 32>}, {pipeline_mode = #tpu.pipeline_mode<synchronous>, transform_indices = @transform_13, window_bounds = array<i64: 1, 32>}, {pipeline_mode = #tpu.pipeline_mode<synchronous>, transform_indices = @transform_14, window_bounds = array<i64: 32, 128>}, {pipeline_mode = #tpu.pipeline_mode<synchronous>, transform_indices = @transform_15, window_bounds = array<i64: 1, 128>}, {pipeline_mode = #tpu.pipeline_mode<synchronous>, transform_indices = @transform_16, window_bounds = array<i64: 128, 32>}, {pipeline_mode = #tpu.pipeline_mode<synchronous>, transform_indices = @transform_17, window_bounds = array<i64: 1, 32>}, {transform_indices = @transform_18, window_bounds = array<i64: 1, 8, 32>}]} {
    %c0 = arith.constant 0 : index
    %c0_0 = arith.constant 0 : index
    %c0_1 = arith.constant 0 : index
    %0 = vector.load %arg1[%c0, %c0_0, %c0_1] : memref<1x8x32xf32, #tpu.memory_space<vmem>>, vector<1x8x32xf32>
    %1 = vector.shape_cast %0 : vector<1x8x32xf32> to vector<8x32xf32>
    %2 = arith.truncf %1 : vector<8x32xf32> to vector<8x32xbf16>
    %c0_2 = arith.constant 0 : index
    %c0_3 = arith.constant 0 : index
    %c0_4 = arith.constant 0 : index
    %3 = vector.load %arg2[%c0_2, %c0_3, %c0_4] : memref<1x8x32xf32, #tpu.memory_space<vmem>>, vector<1x8x32xf32>
    %4 = vector.shape_cast %3 : vector<1x8x32xf32> to vector<8x32xf32>
    %5 = arith.truncf %4 : vector<8x32xf32> to vector<8x32xbf16>
    %c0_5 = arith.constant 0 : index
    %c0_6 = arith.constant 0 : index
    %6 = vector.load %arg3[%c0_5, %c0_6] : memref<32x32xbf16, #tpu.memory_space<vmem>>, vector<32x32xbf16>
    %cst = arith.constant dense<0.000000e+00> : vector<8x32xf32>
    %7 = tpu.matmul %2, %6, %cst {dimension_numbers = #tpu.dot_dimension_numbers<[1], [0], [0], [1], [0, 0, 1, 1], [], []>} : vector<8x32xbf16>, vector<32x32xbf16>, vector<8x32xf32> -> vector<8x32xf32>
    %c0_7 = arith.constant 0 : index
    %c0_8 = arith.constant 0 : index
    %8 = vector.load %arg4[%c0_7, %c0_8] : memref<32x32xbf16, #tpu.memory_space<vmem>>, vector<32x32xbf16>
    %cst_9 = arith.constant dense<0.000000e+00> : vector<8x32xf32>
    %9 = tpu.matmul %5, %8, %cst_9 {dimension_numbers = #tpu.dot_dimension_numbers<[1], [0], [0], [1], [0, 0, 1, 1], [], []>} : vector<8x32xbf16>, vector<32x32xbf16>, vector<8x32xf32> -> vector<8x32xf32>
    %10 = arith.addf %7, %9 : vector<8x32xf32>
    %c0_10 = arith.constant 0 : index
    %c0_11 = arith.constant 0 : index
    %11 = vector.load %arg5[%c0_10, %c0_11] : memref<1x32xf32, #tpu.memory_space<vmem>>, vector<1x32xf32>
    %12 = vector.broadcast %11 : vector<1x32xf32> to vector<8x32xf32>
    %13 = arith.addf %10, %12 : vector<8x32xf32>
    %c0_12 = arith.constant 0 : index
    %c0_13 = arith.constant 0 : index
    %14 = vector.load %arg6[%c0_12, %c0_13] : memref<1x32xf32, #tpu.memory_space<vmem>>, vector<1x32xf32>
    %c0_14 = arith.constant 0 : index
    %c0_15 = arith.constant 0 : index
    %15 = vector.load %arg7[%c0_14, %c0_15] : memref<1x32xf32, #tpu.memory_space<vmem>>, vector<1x32xf32>
    %cst_16 = arith.constant dense<0.000000e+00> : vector<8xf32>
    %16 = vector.multi_reduction <add>, %13, %cst_16 [1] : vector<8x32xf32> to vector<8xf32>
    %17 = vector.shape_cast %16 : vector<8xf32> to vector<8x1xf32>
    %cst_17 = arith.constant 3.200000e+01 : f32
    %18 = vector.broadcast %cst_17 : f32 to vector<8x1xf32>
    %19 = arith.divf %17, %18 : vector<8x1xf32>
    %20 = vector.broadcast %19 : vector<8x1xf32> to vector<8x32xf32>
    %21 = arith.subf %13, %20 : vector<8x32xf32>
    %22 = arith.mulf %21, %21 : vector<8x32xf32>
    %cst_18 = arith.constant dense<0.000000e+00> : vector<8xf32>
    %23 = vector.multi_reduction <add>, %22, %cst_18 [1] : vector<8x32xf32> to vector<8xf32>
    %24 = vector.shape_cast %23 : vector<8xf32> to vector<8x1xf32>
    %cst_19 = arith.constant 3.200000e+01 : f32
    %25 = vector.broadcast %cst_19 : f32 to vector<8x1xf32>
    %26 = arith.divf %24, %25 : vector<8x1xf32>
    %27 = vector.broadcast %19 : vector<8x1xf32> to vector<8x32xf32>
    %28 = arith.subf %13, %27 : vector<8x32xf32>
    %cst_20 = arith.constant 9.99999974E-6 : f32
    %29 = vector.broadcast %cst_20 : f32 to vector<8x1xf32>
    %30 = arith.addf %26, %29 : vector<8x1xf32>
    %31 = math.rsqrt %30 : vector<8x1xf32>
    %32 = vector.broadcast %31 : vector<8x1xf32> to vector<8x32xf32>
    %33 = arith.mulf %28, %32 : vector<8x32xf32>
    %34 = vector.broadcast %14 : vector<1x32xf32> to vector<8x32xf32>
    %35 = arith.mulf %33, %34 : vector<8x32xf32>
    %36 = vector.broadcast %15 : vector<1x32xf32> to vector<8x32xf32>
    %37 = arith.addf %35, %36 : vector<8x32xf32>
    %38 = arith.truncf %37 : vector<8x32xf32> to vector<8x32xbf16>
    %c0_21 = arith.constant 0 : index
    %c0_22 = arith.constant 0 : index
    %c0_23 = arith.constant 0 : index
    %39 = vector.load %arg8[%c0_21, %c0_22, %c0_23] : memref<4x32x8xbf16, #tpu.memory_space<vmem>>, vector<1x32x8xbf16>
    %40 = vector.shape_cast %39 : vector<1x32x8xbf16> to vector<32x8xbf16>
    %cst_24 = arith.constant dense<0.000000e+00> : vector<8x8xf32>
    %41 = tpu.matmul %38, %40, %cst_24 {dimension_numbers = #tpu.dot_dimension_numbers<[1], [0], [0], [1], [0, 0, 1, 1], [], []>} : vector<8x32xbf16>, vector<32x8xbf16>, vector<8x8xf32> -> vector<8x8xf32>
    %cst_25 = arith.constant 0.353553385 : f32
    %42 = vector.broadcast %cst_25 : f32 to vector<8x8xf32>
    %43 = arith.mulf %41, %42 : vector<8x8xf32>
    %44 = arith.truncf %43 : vector<8x8xf32> to vector<8x8xbf16>
    %c0_26 = arith.constant 0 : index
    %c0_27 = arith.constant 0 : index
    %c0_28 = arith.constant 0 : index
    %45 = vector.load %arg9[%c0_26, %c0_27, %c0_28] : memref<4x32x8xbf16, #tpu.memory_space<vmem>>, vector<1x32x8xbf16>
    %46 = vector.shape_cast %45 : vector<1x32x8xbf16> to vector<32x8xbf16>
    %cst_29 = arith.constant dense<0.000000e+00> : vector<8x8xf32>
    %47 = tpu.matmul %38, %46, %cst_29 {dimension_numbers = #tpu.dot_dimension_numbers<[1], [0], [0], [1], [0, 0, 1, 1], [], []>} : vector<8x32xbf16>, vector<32x8xbf16>, vector<8x8xf32> -> vector<8x8xf32>
    %48 = arith.truncf %47 : vector<8x8xf32> to vector<8x8xbf16>
    %c0_30 = arith.constant 0 : index
    %c0_31 = arith.constant 0 : index
    %c0_32 = arith.constant 0 : index
    %49 = vector.load %arg10[%c0_30, %c0_31, %c0_32] : memref<4x32x8xbf16, #tpu.memory_space<vmem>>, vector<1x32x8xbf16>
    %50 = vector.shape_cast %49 : vector<1x32x8xbf16> to vector<32x8xbf16>
    %cst_33 = arith.constant dense<0.000000e+00> : vector<8x8xf32>
    %51 = tpu.matmul %38, %50, %cst_33 {dimension_numbers = #tpu.dot_dimension_numbers<[1], [0], [0], [1], [0, 0, 1, 1], [], []>} : vector<8x32xbf16>, vector<32x8xbf16>, vector<8x8xf32> -> vector<8x8xf32>
    %52 = arith.truncf %51 : vector<8x8xf32> to vector<8x8xbf16>
    %c1 = arith.constant 1 : index
    %c0_34 = arith.constant 0 : index
    %c0_35 = arith.constant 0 : index
    %53 = vector.load %arg8[%c1, %c0_34, %c0_35] : memref<4x32x8xbf16, #tpu.memory_space<vmem>>, vector<1x32x8xbf16>
    %54 = vector.shape_cast %53 : vector<1x32x8xbf16> to vector<32x8xbf16>
    %cst_36 = arith.constant dense<0.000000e+00> : vector<8x8xf32>
    %55 = tpu.matmul %38, %54, %cst_36 {dimension_numbers = #tpu.dot_dimension_numbers<[1], [0], [0], [1], [0, 0, 1, 1], [], []>} : vector<8x32xbf16>, vector<32x8xbf16>, vector<8x8xf32> -> vector<8x8xf32>
    %cst_37 = arith.constant 0.353553385 : f32
    %56 = vector.broadcast %cst_37 : f32 to vector<8x8xf32>
    %57 = arith.mulf %55, %56 : vector<8x8xf32>
    %58 = arith.truncf %57 : vector<8x8xf32> to vector<8x8xbf16>
    %c1_38 = arith.constant 1 : index
    %c0_39 = arith.constant 0 : index
    %c0_40 = arith.constant 0 : index
    %59 = vector.load %arg9[%c1_38, %c0_39, %c0_40] : memref<4x32x8xbf16, #tpu.memory_space<vmem>>, vector<1x32x8xbf16>
    %60 = vector.shape_cast %59 : vector<1x32x8xbf16> to vector<32x8xbf16>
    %cst_41 = arith.constant dense<0.000000e+00> : vector<8x8xf32>
    %61 = tpu.matmul %38, %60, %cst_41 {dimension_numbers = #tpu.dot_dimension_numbers<[1], [0], [0], [1], [0, 0, 1, 1], [], []>} : vector<8x32xbf16>, vector<32x8xbf16>, vector<8x8xf32> -> vector<8x8xf32>
    %62 = arith.truncf %61 : vector<8x8xf32> to vector<8x8xbf16>
    %c1_42 = arith.constant 1 : index
    %c0_43 = arith.constant 0 : index
    %c0_44 = arith.constant 0 : index
    %63 = vector.load %arg10[%c1_42, %c0_43, %c0_44] : memref<4x32x8xbf16, #tpu.memory_space<vmem>>, vector<1x32x8xbf16>
    %64 = vector.shape_cast %63 : vector<1x32x8xbf16> to vector<32x8xbf16>
    %cst_45 = arith.constant dense<0.000000e+00> : vector<8x8xf32>
    %65 = tpu.matmul %38, %64, %cst_45 {dimension_numbers = #tpu.dot_dimension_numbers<[1], [0], [0], [1], [0, 0, 1, 1], [], []>} : vector<8x32xbf16>, vector<32x8xbf16>, vector<8x8xf32> -> vector<8x8xf32>
    %66 = arith.truncf %65 : vector<8x8xf32> to vector<8x8xbf16>
    %c2 = arith.constant 2 : index
    %c0_46 = arith.constant 0 : index
    %c0_47 = arith.constant 0 : index
    %67 = vector.load %arg8[%c2, %c0_46, %c0_47] : memref<4x32x8xbf16, #tpu.memory_space<vmem>>, vector<1x32x8xbf16>
    %68 = vector.shape_cast %67 : vector<1x32x8xbf16> to vector<32x8xbf16>
    %cst_48 = arith.constant dense<0.000000e+00> : vector<8x8xf32>
    %69 = tpu.matmul %38, %68, %cst_48 {dimension_numbers = #tpu.dot_dimension_numbers<[1], [0], [0], [1], [0, 0, 1, 1], [], []>} : vector<8x32xbf16>, vector<32x8xbf16>, vector<8x8xf32> -> vector<8x8xf32>
    %cst_49 = arith.constant 0.353553385 : f32
    %70 = vector.broadcast %cst_49 : f32 to vector<8x8xf32>
    %71 = arith.mulf %69, %70 : vector<8x8xf32>
    %72 = arith.truncf %71 : vector<8x8xf32> to vector<8x8xbf16>
    %c2_50 = arith.constant 2 : index
    %c0_51 = arith.constant 0 : index
    %c0_52 = arith.constant 0 : index
    %73 = vector.load %arg9[%c2_50, %c0_51, %c0_52] : memref<4x32x8xbf16, #tpu.memory_space<vmem>>, vector<1x32x8xbf16>
    %74 = vector.shape_cast %73 : vector<1x32x8xbf16> to vector<32x8xbf16>
    %cst_53 = arith.constant dense<0.000000e+00> : vector<8x8xf32>
    %75 = tpu.matmul %38, %74, %cst_53 {dimension_numbers = #tpu.dot_dimension_numbers<[1], [0], [0], [1], [0, 0, 1, 1], [], []>} : vector<8x32xbf16>, vector<32x8xbf16>, vector<8x8xf32> -> vector<8x8xf32>
    %76 = arith.truncf %75 : vector<8x8xf32> to vector<8x8xbf16>
    %c2_54 = arith.constant 2 : index
    %c0_55 = arith.constant 0 : index
    %c0_56 = arith.constant 0 : index
    %77 = vector.load %arg10[%c2_54, %c0_55, %c0_56] : memref<4x32x8xbf16, #tpu.memory_space<vmem>>, vector<1x32x8xbf16>
    %78 = vector.shape_cast %77 : vector<1x32x8xbf16> to vector<32x8xbf16>
    %cst_57 = arith.constant dense<0.000000e+00> : vector<8x8xf32>
    %79 = tpu.matmul %38, %78, %cst_57 {dimension_numbers = #tpu.dot_dimension_numbers<[1], [0], [0], [1], [0, 0, 1, 1], [], []>} : vector<8x32xbf16>, vector<32x8xbf16>, vector<8x8xf32> -> vector<8x8xf32>
    %80 = arith.truncf %79 : vector<8x8xf32> to vector<8x8xbf16>
    %c3 = arith.constant 3 : index
    %c0_58 = arith.constant 0 : index
    %c0_59 = arith.constant 0 : index
    %81 = vector.load %arg8[%c3, %c0_58, %c0_59] : memref<4x32x8xbf16, #tpu.memory_space<vmem>>, vector<1x32x8xbf16>
    %82 = vector.shape_cast %81 : vector<1x32x8xbf16> to vector<32x8xbf16>
    %cst_60 = arith.constant dense<0.000000e+00> : vector<8x8xf32>
    %83 = tpu.matmul %38, %82, %cst_60 {dimension_numbers = #tpu.dot_dimension_numbers<[1], [0], [0], [1], [0, 0, 1, 1], [], []>} : vector<8x32xbf16>, vector<32x8xbf16>, vector<8x8xf32> -> vector<8x8xf32>
    %cst_61 = arith.constant 0.353553385 : f32
    %84 = vector.broadcast %cst_61 : f32 to vector<8x8xf32>
    %85 = arith.mulf %83, %84 : vector<8x8xf32>
    %86 = arith.truncf %85 : vector<8x8xf32> to vector<8x8xbf16>
    %c3_62 = arith.constant 3 : index
    %c0_63 = arith.constant 0 : index
    %c0_64 = arith.constant 0 : index
    %87 = vector.load %arg9[%c3_62, %c0_63, %c0_64] : memref<4x32x8xbf16, #tpu.memory_space<vmem>>, vector<1x32x8xbf16>
    %88 = vector.shape_cast %87 : vector<1x32x8xbf16> to vector<32x8xbf16>
    %cst_65 = arith.constant dense<0.000000e+00> : vector<8x8xf32>
    %89 = tpu.matmul %38, %88, %cst_65 {dimension_numbers = #tpu.dot_dimension_numbers<[1], [0], [0], [1], [0, 0, 1, 1], [], []>} : vector<8x32xbf16>, vector<32x8xbf16>, vector<8x8xf32> -> vector<8x8xf32>
    %90 = arith.truncf %89 : vector<8x8xf32> to vector<8x8xbf16>
    %c3_66 = arith.constant 3 : index
    %c0_67 = arith.constant 0 : index
    %c0_68 = arith.constant 0 : index
    %91 = vector.load %arg10[%c3_66, %c0_67, %c0_68] : memref<4x32x8xbf16, #tpu.memory_space<vmem>>, vector<1x32x8xbf16>
    %92 = vector.shape_cast %91 : vector<1x32x8xbf16> to vector<32x8xbf16>
    %cst_69 = arith.constant dense<0.000000e+00> : vector<8x8xf32>
    %93 = tpu.matmul %38, %92, %cst_69 {dimension_numbers = #tpu.dot_dimension_numbers<[1], [0], [0], [1], [0, 0, 1, 1], [], []>} : vector<8x32xbf16>, vector<32x8xbf16>, vector<8x8xf32> -> vector<8x8xf32>
    %94 = arith.truncf %93 : vector<8x8xf32> to vector<8x8xbf16>
    %95 = vector.shape_cast %44 : vector<8x8xbf16> to vector<1x8x8xbf16>
    %96 = vector.shape_cast %58 : vector<8x8xbf16> to vector<1x8x8xbf16>
    %97 = vector.shape_cast %72 : vector<8x8xbf16> to vector<1x8x8xbf16>
    %98 = vector.shape_cast %86 : vector<8x8xbf16> to vector<1x8x8xbf16>
    %99 = tpu.concatenate %95, %96, %97, %98 in 0 : vector<1x8x8xbf16>, vector<1x8x8xbf16>, vector<1x8x8xbf16>, vector<1x8x8xbf16> -> vector<4x8x8xbf16>
    %100 = vector.shape_cast %48 : vector<8x8xbf16> to vector<1x8x8xbf16>
    %101 = vector.shape_cast %62 : vector<8x8xbf16> to vector<1x8x8xbf16>
    %102 = vector.shape_cast %76 : vector<8x8xbf16> to vector<1x8x8xbf16>
    %103 = vector.shape_cast %90 : vector<8x8xbf16> to vector<1x8x8xbf16>
    %104 = tpu.concatenate %100, %101, %102, %103 in 0 : vector<1x8x8xbf16>, vector<1x8x8xbf16>, vector<1x8x8xbf16>, vector<1x8x8xbf16> -> vector<4x8x8xbf16>
    %105 = vector.shape_cast %52 : vector<8x8xbf16> to vector<1x8x8xbf16>
    %106 = vector.shape_cast %66 : vector<8x8xbf16> to vector<1x8x8xbf16>
    %107 = vector.shape_cast %80 : vector<8x8xbf16> to vector<1x8x8xbf16>
    %108 = vector.shape_cast %94 : vector<8x8xbf16> to vector<1x8x8xbf16>
    %109 = tpu.concatenate %105, %106, %107, %108 in 0 : vector<1x8x8xbf16>, vector<1x8x8xbf16>, vector<1x8x8xbf16>, vector<1x8x8xbf16> -> vector<4x8x8xbf16>
    "tpu.trace_start"() <{level = 10 : i32, message = "hqd,hkd->hqk"}> : () -> ()
    %cst_70 = arith.constant dense<0.000000e+00> : vector<4x8x8xf32>
    %110 = tpu.matmul %99, %104, %cst_70 {dimension_numbers = #tpu.dot_dimension_numbers<[2], [2], [1], [1], [0, 0, 0, 1, 1, 1], [0], [0]>} : vector<4x8x8xbf16>, vector<4x8x8xbf16>, vector<4x8x8xf32> -> vector<4x8x8xf32>
    "tpu.trace_stop"() : () -> ()
    %cst_71 = arith.constant dense<0xFF800000> : vector<4x8xf32>
    %111 = vector.multi_reduction <maximumf>, %110, %cst_71 [2] : vector<4x8x8xf32> to vector<4x8xf32>
    %112 = vector.shape_cast %111 : vector<4x8xf32> to vector<4x8x1xf32>
    %113 = vector.broadcast %112 : vector<4x8x1xf32> to vector<4x8x8xf32>
    %114 = arith.subf %110, %113 : vector<4x8x8xf32>
    %115 = math.exp %114 : vector<4x8x8xf32>
    %cst_72 = arith.constant dense<0.000000e+00> : vector<4x8xf32>
    %116 = vector.multi_reduction <add>, %115, %cst_72 [2] : vector<4x8x8xf32> to vector<4x8xf32>
    %117 = vector.shape_cast %116 : vector<4x8xf32> to vector<4x8x1xf32>
    %118 = tpu.reciprocal %117 {approx = true} : vector<4x8x1xf32> -> vector<4x8x1xf32>
    %119 = vector.broadcast %118 : vector<4x8x1xf32> to vector<4x8x8xf32>
    %120 = arith.mulf %115, %119 : vector<4x8x8xf32>
    %121 = arith.truncf %120 : vector<4x8x8xf32> to vector<4x8x8xbf16>
    "tpu.trace_start"() <{level = 10 : i32, message = "hqk,hkd->hqd"}> : () -> ()
    %cst_73 = arith.constant dense<0.000000e+00> : vector<4x8x8xf32>
    %122 = tpu.matmul %121, %109, %cst_73 {dimension_numbers = #tpu.dot_dimension_numbers<[2], [1], [1], [2], [0, 0, 0, 1, 1, 2], [0], [0]>} : vector<4x8x8xbf16>, vector<4x8x8xbf16>, vector<4x8x8xf32> -> vector<4x8x8xf32>
    "tpu.trace_stop"() : () -> ()
    %123 = vector.extract_strided_slice %122 {offsets = [0, 0, 0], sizes = [1, 8, 8], strides = [1, 1, 1]} : vector<4x8x8xf32> to vector<1x8x8xf32>
    %124 = vector.shape_cast %123 : vector<1x8x8xf32> to vector<8x8xf32>
    %125 = vector.extract_strided_slice %122 {offsets = [1, 0, 0], sizes = [1, 8, 8], strides = [1, 1, 1]} : vector<4x8x8xf32> to vector<1x8x8xf32>
    %126 = vector.shape_cast %125 : vector<1x8x8xf32> to vector<8x8xf32>
    %127 = vector.extract_strided_slice %122 {offsets = [2, 0, 0], sizes = [1, 8, 8], strides = [1, 1, 1]} : vector<4x8x8xf32> to vector<1x8x8xf32>
    %128 = vector.shape_cast %127 : vector<1x8x8xf32> to vector<8x8xf32>
    %129 = vector.extract_strided_slice %122 {offsets = [3, 0, 0], sizes = [1, 8, 8], strides = [1, 1, 1]} : vector<4x8x8xf32> to vector<1x8x8xf32>
    %130 = vector.shape_cast %129 : vector<1x8x8xf32> to vector<8x8xf32>
    %131 = tpu.concatenate %124, %126, %128, %130 in 1 : vector<8x8xf32>, vector<8x8xf32>, vector<8x8xf32>, vector<8x8xf32> -> vector<8x32xf32>
    %132 = arith.truncf %131 : vector<8x32xf32> to vector<8x32xbf16>
    %c0_74 = arith.constant 0 : index
    %c0_75 = arith.constant 0 : index
    %133 = vector.load %arg11[%c0_74, %c0_75] : memref<32x32xbf16, #tpu.memory_space<vmem>>, vector<32x32xbf16>
    %cst_76 = arith.constant dense<0.000000e+00> : vector<8x32xf32>
    %134 = tpu.matmul %132, %133, %cst_76 {dimension_numbers = #tpu.dot_dimension_numbers<[1], [0], [0], [1], [0, 0, 1, 1], [], []>} : vector<8x32xbf16>, vector<32x32xbf16>, vector<8x32xf32> -> vector<8x32xf32>
    %135 = arith.addf %13, %134 : vector<8x32xf32>
    %c0_77 = arith.constant 0 : index
    %c0_78 = arith.constant 0 : index
    %136 = vector.load %arg12[%c0_77, %c0_78] : memref<1x32xf32, #tpu.memory_space<vmem>>, vector<1x32xf32>
    %137 = vector.broadcast %136 : vector<1x32xf32> to vector<8x32xf32>
    %138 = arith.addf %135, %137 : vector<8x32xf32>
    %c0_79 = arith.constant 0 : index
    %c0_80 = arith.constant 0 : index
    %139 = vector.load %arg13[%c0_79, %c0_80] : memref<1x32xf32, #tpu.memory_space<vmem>>, vector<1x32xf32>
    %c0_81 = arith.constant 0 : index
    %c0_82 = arith.constant 0 : index
    %140 = vector.load %arg14[%c0_81, %c0_82] : memref<1x32xf32, #tpu.memory_space<vmem>>, vector<1x32xf32>
    %cst_83 = arith.constant dense<0.000000e+00> : vector<8xf32>
    %141 = vector.multi_reduction <add>, %138, %cst_83 [1] : vector<8x32xf32> to vector<8xf32>
    %142 = vector.shape_cast %141 : vector<8xf32> to vector<8x1xf32>
    %cst_84 = arith.constant 3.200000e+01 : f32
    %143 = vector.broadcast %cst_84 : f32 to vector<8x1xf32>
    %144 = arith.divf %142, %143 : vector<8x1xf32>
    %145 = vector.broadcast %144 : vector<8x1xf32> to vector<8x32xf32>
    %146 = arith.subf %138, %145 : vector<8x32xf32>
    %147 = arith.mulf %146, %146 : vector<8x32xf32>
    %cst_85 = arith.constant dense<0.000000e+00> : vector<8xf32>
    %148 = vector.multi_reduction <add>, %147, %cst_85 [1] : vector<8x32xf32> to vector<8xf32>
    %149 = vector.shape_cast %148 : vector<8xf32> to vector<8x1xf32>
    %cst_86 = arith.constant 3.200000e+01 : f32
    %150 = vector.broadcast %cst_86 : f32 to vector<8x1xf32>
    %151 = arith.divf %149, %150 : vector<8x1xf32>
    %152 = vector.broadcast %144 : vector<8x1xf32> to vector<8x32xf32>
    %153 = arith.subf %138, %152 : vector<8x32xf32>
    %cst_87 = arith.constant 9.99999974E-6 : f32
    %154 = vector.broadcast %cst_87 : f32 to vector<8x1xf32>
    %155 = arith.addf %151, %154 : vector<8x1xf32>
    %156 = math.rsqrt %155 : vector<8x1xf32>
    %157 = vector.broadcast %156 : vector<8x1xf32> to vector<8x32xf32>
    %158 = arith.mulf %153, %157 : vector<8x32xf32>
    %159 = vector.broadcast %139 : vector<1x32xf32> to vector<8x32xf32>
    %160 = arith.mulf %158, %159 : vector<8x32xf32>
    %161 = vector.broadcast %140 : vector<1x32xf32> to vector<8x32xf32>
    %162 = arith.addf %160, %161 : vector<8x32xf32>
    %163 = arith.truncf %162 : vector<8x32xf32> to vector<8x32xbf16>
    %cst_88 = arith.constant 0.000000e+00 : f32
    %164 = vector.broadcast %cst_88 : f32 to vector<8x32xf32>
    %c0_89 = arith.constant 0 : index
    %c0_90 = arith.constant 0 : index
    %165 = vector.load %arg15[%c0_89, %c0_90] : memref<32x128xbf16, #tpu.memory_space<vmem>>, vector<32x128xbf16>
    %cst_91 = arith.constant dense<0.000000e+00> : vector<8x128xf32>
    %166 = tpu.matmul %163, %165, %cst_91 {dimension_numbers = #tpu.dot_dimension_numbers<[1], [0], [0], [1], [0, 0, 1, 1], [], []>} : vector<8x32xbf16>, vector<32x128xbf16>, vector<8x128xf32> -> vector<8x128xf32>
    %c0_92 = arith.constant 0 : index
    %c0_93 = arith.constant 0 : index
    %167 = vector.load %arg16[%c0_92, %c0_93] : memref<1x128xf32, #tpu.memory_space<vmem>>, vector<1x128xf32>
    %168 = vector.broadcast %167 : vector<1x128xf32> to vector<8x128xf32>
    %169 = arith.addf %166, %168 : vector<8x128xf32>
    %cst_94 = arith.constant 5.000000e-01 : f32
    %170 = vector.broadcast %cst_94 : f32 to vector<8x128xf32>
    %171 = arith.mulf %170, %169 : vector<8x128xf32>
    %cst_95 = arith.constant 0.707106769 : f32
    %172 = vector.broadcast %cst_95 : f32 to vector<8x128xf32>
    %173 = arith.mulf %169, %172 : vector<8x128xf32>
    %174 = math.erf %173 : vector<8x128xf32>
    %cst_96 = arith.constant 1.000000e+00 : f32
    %175 = vector.broadcast %cst_96 : f32 to vector<8x128xf32>
    %176 = arith.addf %175, %174 : vector<8x128xf32>
    %177 = arith.mulf %171, %176 : vector<8x128xf32>
    %178 = arith.truncf %177 : vector<8x128xf32> to vector<8x128xbf16>
    %c0_97 = arith.constant 0 : index
    %c0_98 = arith.constant 0 : index
    %179 = vector.load %arg17[%c0_97, %c0_98] : memref<128x32xbf16, #tpu.memory_space<vmem>>, vector<128x32xbf16>
    %cst_99 = arith.constant dense<0.000000e+00> : vector<8x32xf32>
    %180 = tpu.matmul %178, %179, %cst_99 {dimension_numbers = #tpu.dot_dimension_numbers<[1], [0], [0], [1], [0, 0, 1, 1], [], []>} : vector<8x128xbf16>, vector<128x32xbf16>, vector<8x32xf32> -> vector<8x32xf32>
    %181 = arith.addf %164, %180 : vector<8x32xf32>
    %182 = arith.addf %138, %181 : vector<8x32xf32>
    %c0_100 = arith.constant 0 : index
    %c0_101 = arith.constant 0 : index
    %183 = vector.load %arg18[%c0_100, %c0_101] : memref<1x32xf32, #tpu.memory_space<vmem>>, vector<1x32xf32>
    %184 = vector.broadcast %183 : vector<1x32xf32> to vector<8x32xf32>
    %185 = arith.addf %182, %184 : vector<8x32xf32>
    %c0_102 = arith.constant 0 : index
    %c0_103 = arith.constant 0 : index
    %c0_104 = arith.constant 0 : index
    %186 = vector.load %arg19[%c0_102, %c0_103, %c0_104] : memref<1x8x32xf32, #tpu.memory_space<vmem>>, vector<1x8x32xf32>
    %187 = vector.shape_cast %186 : vector<1x8x32xf32> to vector<8x32xf32>
    %188 = vector.shape_cast %185 : vector<8x32xf32> to vector<1x8x32xf32>
    tpu.vector_store %arg19[%c0_102, %c0_103, %c0_104], %188 {strides = array<i32>} : memref<1x8x32xf32, #tpu.memory_space<vmem>>, vector<1x8x32xf32>,
    return
  }
  func.func @transform_0(%arg0: i32) -> (i32, i32, i32) {
    %c0_i32 = arith.constant 0 : i32
    %c0_i32_0 = arith.constant 0 : i32
    %c0_i32_1 = arith.constant 0 : i32
    return %arg0, %c0_i32, %c0_i32_0 : i32, i32, i32
  }
  func.func @transform_1(%arg0: i32) -> (i32, i32, i32) {
    %c0_i32 = arith.constant 0 : i32
    %c0_i32_0 = arith.constant 0 : i32
    %c0_i32_1 = arith.constant 0 : i32
    return %arg0, %c0_i32, %c0_i32_0 : i32, i32, i32
  }
  func.func @transform_2(%arg0: i32) -> (i32, i32) {
    %c0_i32 = arith.constant 0 : i32
    %c0_i32_0 = arith.constant 0 : i32
    %c0_i32_1 = arith.constant 0 : i32
    return %c0_i32, %c0_i32_0 : i32, i32
  }
  func.func @transform_3(%arg0: i32) -> (i32, i32) {
    %c0_i32 = arith.constant 0 : i32
    %c0_i32_0 = arith.constant 0 : i32
    %c0_i32_1 = arith.constant 0 : i32
    return %c0_i32, %c0_i32_0 : i32, i32
  }
  func.func @transform_4(%arg0: i32) -> (i32, i32) {
    %c0_i32 = arith.constant 0 : i32
    %c0_i32_0 = arith.constant 0 : i32
    %c0_i32_1 = arith.constant 0 : i32
    return %c0_i32, %c0_i32_0 : i32, i32
  }
  func.func @transform_5(%arg0: i32) -> (i32, i32) {
    %c0_i32 = arith.constant 0 : i32
    %c0_i32_0 = arith.constant 0 : i32
    %c0_i32_1 = arith.constant 0 : i32
    return %c0_i32, %c0_i32_0 : i32, i32
  }
  func.func @transform_6(%arg0: i32) -> (i32, i32) {
    %c0_i32 = arith.constant 0 : i32
    %c0_i32_0 = arith.constant 0 : i32
    %c0_i32_1 = arith.constant 0 : i32
    return %c0_i32, %c0_i32_0 : i32, i32
  }
  func.func @transform_7(%arg0: i32) -> (i32, i32, i32) {
    %c0_i32 = arith.constant 0 : i32
    %c0_i32_0 = arith.constant 0 : i32
    %c0_i32_1 = arith.constant 0 : i32
    %c0_i32_2 = arith.constant 0 : i32
    return %c0_i32, %c0_i32_0, %c0_i32_1 : i32, i32, i32
  }
  func.func @transform_8(%arg0: i32) -> (i32, i32, i32) {
    %c0_i32 = arith.constant 0 : i32
    %c0_i32_0 = arith.constant 0 : i32
    %c0_i32_1 = arith.constant 0 : i32
    %c0_i32_2 = arith.constant 0 : i32
    return %c0_i32, %c0_i32_0, %c0_i32_1 : i32, i32, i32
  }
  func.func @transform_9(%arg0: i32) -> (i32, i32, i32) {
    %c0_i32 = arith.constant 0 : i32
    %c0_i32_0 = arith.constant 0 : i32
    %c0_i32_1 = arith.constant 0 : i32
    %c0_i32_2 = arith.constant 0 : i32
    return %c0_i32, %c0_i32_0, %c0_i32_1 : i32, i32, i32
  }
  func.func @transform_10(%arg0: i32) -> (i32, i32) {
    %c0_i32 = arith.constant 0 : i32
    %c0_i32_0 = arith.constant 0 : i32
    %c0_i32_1 = arith.constant 0 : i32
    return %c0_i32, %c0_i32_0 : i32, i32
  }
  func.func @transform_11(%arg0: i32) -> (i32, i32) {
    %c0_i32 = arith.constant 0 : i32
    %c0_i32_0 = arith.constant 0 : i32
    %c0_i32_1 = arith.constant 0 : i32
    return %c0_i32, %c0_i32_0 : i32, i32
  }
  func.func @transform_12(%arg0: i32) -> (i32, i32) {
    %c0_i32 = arith.constant 0 : i32
    %c0_i32_0 = arith.constant 0 : i32
    %c0_i32_1 = arith.constant 0 : i32
    return %c0_i32, %c0_i32_0 : i32, i32
  }
  func.func @transform_13(%arg0: i32) -> (i32, i32) {
    %c0_i32 = arith.constant 0 : i32
    %c0_i32_0 = arith.constant 0 : i32
    %c0_i32_1 = arith.constant 0 : i32
    return %c0_i32, %c0_i32_0 : i32, i32
  }
  func.func @transform_14(%arg0: i32) -> (i32, i32) {
    %c0_i32 = arith.constant 0 : i32
    %c0_i32_0 = arith.constant 0 : i32
    %c0_i32_1 = arith.constant 0 : i32
    return %c0_i32, %c0_i32_0 : i32, i32
  }
  func.func @transform_15(%arg0: i32) -> (i32, i32) {
    %c0_i32 = arith.constant 0 : i32
    %c0_i32_0 = arith.constant 0 : i32
    %c0_i32_1 = arith.constant 0 : i32
    return %c0_i32, %c0_i32_0 : i32, i32
  }
  func.func @transform_16(%arg0: i32) -> (i32, i32) {
    %c0_i32 = arith.constant 0 : i32
    %c0_i32_0 = arith.constant 0 : i32
    %c0_i32_1 = arith.constant 0 : i32
    return %c0_i32, %c0_i32_0 : i32, i32
  }
  func.func @transform_17(%arg0: i32) -> (i32, i32) {
    %c0_i32 = arith.constant 0 : i32
    %c0_i32_0 = arith.constant 0 : i32
    %c0_i32_1 = arith.constant 0 : i32
    return %c0_i32, %c0_i32_0 : i32, i32
  }
  func.func @transform_18(%arg0: i32) -> (i32, i32, i32) {
    %c0_i32 = arith.constant 0 : i32
    %c0_i32_0 = arith.constant 0 : i32
    %c0_i32_1 = arith.constant 0 : i32
    return %arg0, %c0_i32, %c0_i32_0 : i32, i32, i32
  }
}

module attributes {stable_mosaic.version = 11 : i64} {
  func.func @block_kernel(%arg0: i32, %arg1: memref<1x8x32xf32, #tpu.memory_space<vmem>>, %arg2: memref<1x8x32xf32, #tpu.memory_space<vmem>>, %arg3: memref<32x32xbf16, #tpu.memory_space<vmem>>, %arg4: memref<32x32xbf16, #tpu.memory_space<vmem>>, %arg5: memref<1x32xf32, #tpu.memory_space<vmem>>, %arg6: memref<1x32xf32, #tpu.memory_space<vmem>>, %arg7: memref<1x32xf32, #tpu.memory_space<vmem>>, %arg8: memref<4x32x8xbf16, #tpu.memory_space<vmem>>, %arg9: memref<4x32x8xbf16, #tpu.memory_space<vmem>>, %arg10: memref<4x32x8xbf16, #tpu.memory_space<vmem>>, %arg11: memref<32x32xbf16, #tpu.memory_space<vmem>>, %arg12: memref<1x32xf32, #tpu.memory_space<vmem>>, %arg13: memref<1x32xf32, #tpu.memory_space<vmem>>, %arg14: memref<1x32xf32, #tpu.memory_space<vmem>>, %arg15: memref<32x128xbf16, #tpu.memory_space<vmem>>, %arg16: memref<1x128xf32, #tpu.memory_space<vmem>>, %arg17: memref<128x32xbf16, #tpu.memory_space<vmem>>, %arg18: memref<1x32xf32, #tpu.memory_space<vmem>>, %arg19: memref<1x8x32xf32, #tpu.memory_space<vmem>>) attributes {dimension_semantics = [#tpu.dimension_semantics<parallel>], iteration_bounds = array<i64: 2>, scalar_prefetch = 0 : i64, scratch_operands = 0 : i64, tpu.core_type = #tpu.core_type<tc>, window_params = [{transform_indices = @transform_0, window_bounds = array<i64: 1, 8, 32>}, {transform_indices = @transform_1, window_bounds = array<i64: 1, 8, 32>}, {pipeline_mode = #tpu.pipeline_mode<synchronous>, transform_indices = @transform_2, window_bounds = array<i64: 32, 32>}, {pipeline_mode = #tpu.pipeline_mode<synchronous>, transform_indices = @transform_3, window_bounds = array<i64: 32, 32>}, {pipeline_mode = #tpu.pipeline_mode<synchronous>, transform_indices = @transform_4, window_bounds = array<i64: 1, 32>}, {pipeline_mode = #tpu.pipeline_mode<synchronous>, transform_indices = @transform_5, window_bounds = array<i64: 1, 32>}, {pipeline_mode = #tpu.pipeline_mode<synchronous>, transform_indices = @transform_6, window_bounds = array<i64: 1, 32>}, {pipeline_mode = #tpu.pipeline_mode<synchronous>, transform_indices = @transform_7, window_bounds = array<i64: 4, 32, 8>}, {pipeline_mode = #tpu.pipeline_mode<synchronous>, transform_indices = @transform_8, window_bounds = array<i64: 4, 32, 8>}, {pipeline_mode = #tpu.pipeline_mode<synchronous>, transform_indices = @transform_9, window_bounds = array<i64: 4, 32, 8>}, {pipeline_mode = #tpu.pipeline_mode<synchronous>, transform_indices = @transform_10, window_bounds = array<i64: 32, 32>}, {pipeline_mode = #tpu.pipeline_mode<synchronous>, transform_indices = @transform_11, window_bounds = array<i64: 1, 32>}, {pipeline_mode = #tpu.pipeline_mode<synchronous>, transform_indices = @transform_12, window_bounds = array<i64: 1, 32>}, {pipeline_mode = #tpu.pipeline_mode<synchronous>, transform_indices = @transform_13, window_bounds = array<i64: 1, 32>}, {pipeline_mode = #tpu.pipeline_mode<synchronous>, transform_indices = @transform_14, window_bounds = array<i64: 32, 128>}, {pipeline_mode = #tpu.pipeline_mode<synchronous>, transform_indices = @transform_15, window_bounds = array<i64: 1, 128>}, {pipeline_mode = #tpu.pipeline_mode<synchronous>, transform_indices = @transform_16, window_bounds = array<i64: 128, 32>}, {pipeline_mode = #tpu.pipeline_mode<synchronous>, transform_indices = @transform_17, window_bounds = array<i64: 1, 32>}, {transform_indices = @transform_18, window_bounds = array<i64: 1, 8, 32>}]} {
    %c0 = arith.constant 0 : index
    %c0_0 = arith.constant 0 : index
    %c0_1 = arith.constant 0 : index
    %0 = vector.load %arg1[%c0, %c0_0, %c0_1] : memref<1x8x32xf32, #tpu.memory_space<vmem>>, vector<1x8x32xf32>
    %1 = vector.shape_cast %0 : vector<1x8x32xf32> to vector<8x32xf32>
    %2 = arith.truncf %1 : vector<8x32xf32> to vector<8x32xbf16>
    %c0_2 = arith.constant 0 : index
    %c0_3 = arith.constant 0 : index
    %c0_4 = arith.constant 0 : index
    %3 = vector.load %arg2[%c0_2, %c0_3, %c0_4] : memref<1x8x32xf32, #tpu.memory_space<vmem>>, vector<1x8x32xf32>
    %4 = vector.shape_cast %3 : vector<1x8x32xf32> to vector<8x32xf32>
    %5 = arith.truncf %4 : vector<8x32xf32> to vector<8x32xbf16>
    %c0_5 = arith.constant 0 : index
    %c0_6 = arith.constant 0 : index
    %6 = vector.load %arg3[%c0_5, %c0_6] : memref<32x32xbf16, #tpu.memory_space<vmem>>, vector<32x32xbf16>
    %cst = arith.constant dense<0.000000e+00> : vector<8x32xf32>
    %7 = tpu.matmul %2, %6, %cst {dimension_numbers = #tpu.dot_dimension_numbers<[1], [0], [0], [1], [0, 0, 1, 1], [], []>} : vector<8x32xbf16>, vector<32x32xbf16>, vector<8x32xf32> -> vector<8x32xf32>
    %c0_7 = arith.constant 0 : index
    %c0_8 = arith.constant 0 : index
    %8 = vector.load %arg4[%c0_7, %c0_8] : memref<32x32xbf16, #tpu.memory_space<vmem>>, vector<32x32xbf16>
    %cst_9 = arith.constant dense<0.000000e+00> : vector<8x32xf32>
    %9 = tpu.matmul %5, %8, %cst_9 {dimension_numbers = #tpu.dot_dimension_numbers<[1], [0], [0], [1], [0, 0, 1, 1], [], []>} : vector<8x32xbf16>, vector<32x32xbf16>, vector<8x32xf32> -> vector<8x32xf32>
    %10 = arith.addf %7, %9 : vector<8x32xf32>
    %c0_10 = arith.constant 0 : index
    %c0_11 = arith.constant 0 : index
    %11 = vector.load %arg5[%c0_10, %c0_11] : memref<1x32xf32, #tpu.memory_space<vmem>>, vector<1x32xf32>
    %12 = vector.broadcast %11 : vector<1x32xf32> to vector<8x32xf32>
    %13 = arith.addf %10, %12 : vector<8x32xf32>
    %c0_12 = arith.constant 0 : index
    %c0_13 = arith.constant 0 : index
    %14 = vector.load %arg6[%c0_12, %c0_13] : memref<1x32xf32, #tpu.memory_space<vmem>>, vector<1x32xf32>
    %c0_14 = arith.constant 0 : index
    %c0_15 = arith.constant 0 : index
    %15 = vector.load %arg7[%c0_14, %c0_15] : memref<1x32xf32, #tpu.memory_space<vmem>>, vector<1x32xf32>
    %cst_16 = arith.constant dense<0.000000e+00> : vector<8xf32>
    %16 = vector.multi_reduction <add>, %13, %cst_16 [1] : vector<8x32xf32> to vector<8xf32>
    %17 = vector.shape_cast %16 : vector<8xf32> to vector<8x1xf32>
    %cst_17 = arith.constant 3.200000e+01 : f32
    %18 = vector.broadcast %cst_17 : f32 to vector<8x1xf32>
    %19 = arith.divf %17, %18 : vector<8x1xf32>
    %20 = vector.broadcast %19 : vector<8x1xf32> to vector<8x32xf32>
    %21 = arith.subf %13, %20 : vector<8x32xf32>
    %22 = arith.mulf %21, %21 : vector<8x32xf32>
    %cst_18 = arith.constant dense<0.000000e+00> : vector<8xf32>
    %23 = vector.multi_reduction <add>, %22, %cst_18 [1] : vector<8x32xf32> to vector<8xf32>
    %24 = vector.shape_cast %23 : vector<8xf32> to vector<8x1xf32>
    %cst_19 = arith.constant 3.200000e+01 : f32
    %25 = vector.broadcast %cst_19 : f32 to vector<8x1xf32>
    %26 = arith.divf %24, %25 : vector<8x1xf32>
    %27 = vector.broadcast %19 : vector<8x1xf32> to vector<8x32xf32>
    %28 = arith.subf %13, %27 : vector<8x32xf32>
    %cst_20 = arith.constant 9.99999974E-6 : f32
    %29 = vector.broadcast %cst_20 : f32 to vector<8x1xf32>
    %30 = arith.addf %26, %29 : vector<8x1xf32>
    %31 = math.rsqrt %30 : vector<8x1xf32>
    %32 = vector.broadcast %31 : vector<8x1xf32> to vector<8x32xf32>
    %33 = arith.mulf %28, %32 : vector<8x32xf32>
    %34 = vector.broadcast %14 : vector<1x32xf32> to vector<8x32xf32>
    %35 = arith.mulf %33, %34 : vector<8x32xf32>
    %36 = vector.broadcast %15 : vector<1x32xf32> to vector<8x32xf32>
    %37 = arith.addf %35, %36 : vector<8x32xf32>
    %38 = arith.truncf %37 : vector<8x32xf32> to vector<8x32xbf16>
    %c0_21 = arith.constant 0 : index
    %c0_22 = arith.constant 0 : index
    %c0_23 = arith.constant 0 : index
    %39 = vector.load %arg8[%c0_21, %c0_22, %c0_23] : memref<4x32x8xbf16, #tpu.memory_space<vmem>>, vector<1x32x8xbf16>
    %40 = vector.shape_cast %39 : vector<1x32x8xbf16> to vector<32x8xbf16>
    %cst_24 = arith.constant dense<0.000000e+00> : vector<8x8xf32>
    %41 = tpu.matmul %38, %40, %cst_24 {dimension_numbers = #tpu.dot_dimension_numbers<[1], [0], [0], [1], [0, 0, 1, 1], [], []>} : vector<8x32xbf16>, vector<32x8xbf16>, vector<8x8xf32> -> vector<8x8xf32>
    %cst_25 = arith.constant 0.353553385 : f32
    %42 = vector.broadcast %cst_25 : f32 to vector<8x8xf32>
    %43 = arith.mulf %41, %42 : vector<8x8xf32>
    %44 = arith.truncf %43 : vector<8x8xf32> to vector<8x8xbf16>
    %c0_26 = arith.constant 0 : index
    %c0_27 = arith.constant 0 : index
    %c0_28 = arith.constant 0 : index
    %45 = vector.load %arg9[%c0_26, %c0_27, %c0_28] : memref<4x32x8xbf16, #tpu.memory_space<vmem>>, vector<1x32x8xbf16>
    %46 = vector.shape_cast %45 : vector<1x32x8xbf16> to vector<32x8xbf16>
    %cst_29 = arith.constant dense<0.000000e+00> : vector<8x8xf32>
    %47 = tpu.matmul %38, %46, %cst_29 {dimension_numbers = #tpu.dot_dimension_numbers<[1], [0], [0], [1], [0, 0, 1, 1], [], []>} : vector<8x32xbf16>, vector<32x8xbf16>, vector<8x8xf32> -> vector<8x8xf32>
    %48 = arith.truncf %47 : vector<8x8xf32> to vector<8x8xbf16>
    %c0_30 = arith.constant 0 : index
    %c0_31 = arith.constant 0 : index
    %c0_32 = arith.constant 0 : index
    %49 = vector.load %arg10[%c0_30, %c0_31, %c0_32] : memref<4x32x8xbf16, #tpu.memory_space<vmem>>, vector<1x32x8xbf16>
    %50 = vector.shape_cast %49 : vector<1x32x8xbf16> to vector<32x8xbf16>
    %cst_33 = arith.constant dense<0.000000e+00> : vector<8x8xf32>
    %51 = tpu.matmul %38, %50, %cst_33 {dimension_numbers = #tpu.dot_dimension_numbers<[1], [0], [0], [1], [0, 0, 1, 1], [], []>} : vector<8x32xbf16>, vector<32x8xbf16>, vector<8x8xf32> -> vector<8x8xf32>
    %52 = arith.truncf %51 : vector<8x8xf32> to vector<8x8xbf16>
    %c1 = arith.constant 1 : index
    %c0_34 = arith.constant 0 : index
    %c0_35 = arith.constant 0 : index
    %53 = vector.load %arg8[%c1, %c0_34, %c0_35] : memref<4x32x8xbf16, #tpu.memory_space<vmem>>, vector<1x32x8xbf16>
    %54 = vector.shape_cast %53 : vector<1x32x8xbf16> to vector<32x8xbf16>
    %cst_36 = arith.constant dense<0.000000e+00> : vector<8x8xf32>
    %55 = tpu.matmul %38, %54, %cst_36 {dimension_numbers = #tpu.dot_dimension_numbers<[1], [0], [0], [1], [0, 0, 1, 1], [], []>} : vector<8x32xbf16>, vector<32x8xbf16>, vector<8x8xf32> -> vector<8x8xf32>
    %cst_37 = arith.constant 0.353553385 : f32
    %56 = vector.broadcast %cst_37 : f32 to vector<8x8xf32>
    %57 = arith.mulf %55, %56 : vector<8x8xf32>
    %58 = arith.truncf %57 : vector<8x8xf32> to vector<8x8xbf16>
    %c1_38 = arith.constant 1 : index
    %c0_39 = arith.constant 0 : index
    %c0_40 = arith.constant 0 : index
    %59 = vector.load %arg9[%c1_38, %c0_39, %c0_40] : memref<4x32x8xbf16, #tpu.memory_space<vmem>>, vector<1x32x8xbf16>
    %60 = vector.shape_cast %59 : vector<1x32x8xbf16> to vector<32x8xbf16>
    %cst_41 = arith.constant dense<0.000000e+00> : vector<8x8xf32>
    %61 = tpu.matmul %38, %60, %cst_41 {dimension_numbers = #tpu.dot_dimension_numbers<[1], [0], [0], [1], [0, 0, 1, 1], [], []>} : vector<8x32xbf16>, vector<32x8xbf16>, vector<8x8xf32> -> vector<8x8xf32>
    %62 = arith.truncf %61 : vector<8x8xf32> to vector<8x8xbf16>
    %c1_42 = arith.constant 1 : index
    %c0_43 = arith.constant 0 : index
    %c0_44 = arith.constant 0 : index
    %63 = vector.load %arg10[%c1_42, %c0_43, %c0_44] : memref<4x32x8xbf16, #tpu.memory_space<vmem>>, vector<1x32x8xbf16>
    %64 = vector.shape_cast %63 : vector<1x32x8xbf16> to vector<32x8xbf16>
    %cst_45 = arith.constant dense<0.000000e+00> : vector<8x8xf32>
    %65 = tpu.matmul %38, %64, %cst_45 {dimension_numbers = #tpu.dot_dimension_numbers<[1], [0], [0], [1], [0, 0, 1, 1], [], []>} : vector<8x32xbf16>, vector<32x8xbf16>, vector<8x8xf32> -> vector<8x8xf32>
    %66 = arith.truncf %65 : vector<8x8xf32> to vector<8x8xbf16>
    %c2 = arith.constant 2 : index
    %c0_46 = arith.constant 0 : index
    %c0_47 = arith.constant 0 : index
    %67 = vector.load %arg8[%c2, %c0_46, %c0_47] : memref<4x32x8xbf16, #tpu.memory_space<vmem>>, vector<1x32x8xbf16>
    %68 = vector.shape_cast %67 : vector<1x32x8xbf16> to vector<32x8xbf16>
    %cst_48 = arith.constant dense<0.000000e+00> : vector<8x8xf32>
    %69 = tpu.matmul %38, %68, %cst_48 {dimension_numbers = #tpu.dot_dimension_numbers<[1], [0], [0], [1], [0, 0, 1, 1], [], []>} : vector<8x32xbf16>, vector<32x8xbf16>, vector<8x8xf32> -> vector<8x8xf32>
    %cst_49 = arith.constant 0.353553385 : f32
    %70 = vector.broadcast %cst_49 : f32 to vector<8x8xf32>
    %71 = arith.mulf %69, %70 : vector<8x8xf32>
    %72 = arith.truncf %71 : vector<8x8xf32> to vector<8x8xbf16>
    %c2_50 = arith.constant 2 : index
    %c0_51 = arith.constant 0 : index
    %c0_52 = arith.constant 0 : index
    %73 = vector.load %arg9[%c2_50, %c0_51, %c0_52] : memref<4x32x8xbf16, #tpu.memory_space<vmem>>, vector<1x32x8xbf16>
    %74 = vector.shape_cast %73 : vector<1x32x8xbf16> to vector<32x8xbf16>
    %cst_53 = arith.constant dense<0.000000e+00> : vector<8x8xf32>
    %75 = tpu.matmul %38, %74, %cst_53 {dimension_numbers = #tpu.dot_dimension_numbers<[1], [0], [0], [1], [0, 0, 1, 1], [], []>} : vector<8x32xbf16>, vector<32x8xbf16>, vector<8x8xf32> -> vector<8x8xf32>
    %76 = arith.truncf %75 : vector<8x8xf32> to vector<8x8xbf16>
    %c2_54 = arith.constant 2 : index
    %c0_55 = arith.constant 0 : index
    %c0_56 = arith.constant 0 : index
    %77 = vector.load %arg10[%c2_54, %c0_55, %c0_56] : memref<4x32x8xbf16, #tpu.memory_space<vmem>>, vector<1x32x8xbf16>
    %78 = vector.shape_cast %77 : vector<1x32x8xbf16> to vector<32x8xbf16>
    %cst_57 = arith.constant dense<0.000000e+00> : vector<8x8xf32>
    %79 = tpu.matmul %38, %78, %cst_57 {dimension_numbers = #tpu.dot_dimension_numbers<[1], [0], [0], [1], [0, 0, 1, 1], [], []>} : vector<8x32xbf16>, vector<32x8xbf16>, vector<8x8xf32> -> vector<8x8xf32>
    %80 = arith.truncf %79 : vector<8x8xf32> to vector<8x8xbf16>
    %c3 = arith.constant 3 : index
    %c0_58 = arith.constant 0 : index
    %c0_59 = arith.constant 0 : index
    %81 = vector.load %arg8[%c3, %c0_58, %c0_59] : memref<4x32x8xbf16, #tpu.memory_space<vmem>>, vector<1x32x8xbf16>
    %82 = vector.shape_cast %81 : vector<1x32x8xbf16> to vector<32x8xbf16>
    %cst_60 = arith.constant dense<0.000000e+00> : vector<8x8xf32>
    %83 = tpu.matmul %38, %82, %cst_60 {dimension_numbers = #tpu.dot_dimension_numbers<[1], [0], [0], [1], [0, 0, 1, 1], [], []>} : vector<8x32xbf16>, vector<32x8xbf16>, vector<8x8xf32> -> vector<8x8xf32>
    %cst_61 = arith.constant 0.353553385 : f32
    %84 = vector.broadcast %cst_61 : f32 to vector<8x8xf32>
    %85 = arith.mulf %83, %84 : vector<8x8xf32>
    %86 = arith.truncf %85 : vector<8x8xf32> to vector<8x8xbf16>
    %c3_62 = arith.constant 3 : index
    %c0_63 = arith.constant 0 : index
    %c0_64 = arith.constant 0 : index
    %87 = vector.load %arg9[%c3_62, %c0_63, %c0_64] : memref<4x32x8xbf16, #tpu.memory_space<vmem>>, vector<1x32x8xbf16>
    %88 = vector.shape_cast %87 : vector<1x32x8xbf16> to vector<32x8xbf16>
    %cst_65 = arith.constant dense<0.000000e+00> : vector<8x8xf32>
    %89 = tpu.matmul %38, %88, %cst_65 {dimension_numbers = #tpu.dot_dimension_numbers<[1], [0], [0], [1], [0, 0, 1, 1], [], []>} : vector<8x32xbf16>, vector<32x8xbf16>, vector<8x8xf32> -> vector<8x8xf32>
    %90 = arith.truncf %89 : vector<8x8xf32> to vector<8x8xbf16>
    %c3_66 = arith.constant 3 : index
    %c0_67 = arith.constant 0 : index
    %c0_68 = arith.constant 0 : index
    %91 = vector.load %arg10[%c3_66, %c0_67, %c0_68] : memref<4x32x8xbf16, #tpu.memory_space<vmem>>, vector<1x32x8xbf16>
    %92 = vector.shape_cast %91 : vector<1x32x8xbf16> to vector<32x8xbf16>
    %cst_69 = arith.constant dense<0.000000e+00> : vector<8x8xf32>
    %93 = tpu.matmul %38, %92, %cst_69 {dimension_numbers = #tpu.dot_dimension_numbers<[1], [0], [0], [1], [0, 0, 1, 1], [], []>} : vector<8x32xbf16>, vector<32x8xbf16>, vector<8x8xf32> -> vector<8x8xf32>
    %94 = arith.truncf %93 : vector<8x8xf32> to vector<8x8xbf16>
    %95 = vector.shape_cast %44 : vector<8x8xbf16> to vector<1x8x8xbf16>
    %96 = vector.shape_cast %58 : vector<8x8xbf16> to vector<1x8x8xbf16>
    %97 = vector.shape_cast %72 : vector<8x8xbf16> to vector<1x8x8xbf16>
    %98 = vector.shape_cast %86 : vector<8x8xbf16> to vector<1x8x8xbf16>
    %99 = tpu.concatenate %95, %96, %97, %98 in 0 : vector<1x8x8xbf16>, vector<1x8x8xbf16>, vector<1x8x8xbf16>, vector<1x8x8xbf16> -> vector<4x8x8xbf16>
    %100 = vector.shape_cast %48 : vector<8x8xbf16> to vector<1x8x8xbf16>
    %101 = vector.shape_cast %62 : vector<8x8xbf16> to vector<1x8x8xbf16>
    %102 = vector.shape_cast %76 : vector<8x8xbf16> to vector<1x8x8xbf16>
    %103 = vector.shape_cast %90 : vector<8x8xbf16> to vector<1x8x8xbf16>
    %104 = tpu.concatenate %100, %101, %102, %103 in 0 : vector<1x8x8xbf16>, vector<1x8x8xbf16>, vector<1x8x8xbf16>, vector<1x8x8xbf16> -> vector<4x8x8xbf16>
    %105 = vector.shape_cast %52 : vector<8x8xbf16> to vector<1x8x8xbf16>
    %106 = vector.shape_cast %66 : vector<8x8xbf16> to vector<1x8x8xbf16>
    %107 = vector.shape_cast %80 : vector<8x8xbf16> to vector<1x8x8xbf16>
    %108 = vector.shape_cast %94 : vector<8x8xbf16> to vector<1x8x8xbf16>
    %109 = tpu.concatenate %105, %106, %107, %108 in 0 : vector<1x8x8xbf16>, vector<1x8x8xbf16>, vector<1x8x8xbf16>, vector<1x8x8xbf16> -> vector<4x8x8xbf16>
    "tpu.trace_start"() <{level = 10 : i32, message = "hqd,hkd->hqk"}> : () -> ()
    %cst_70 = arith.constant dense<0.000000e+00> : vector<4x8x8xf32>
    %110 = tpu.matmul %99, %104, %cst_70 {dimension_numbers = #tpu.dot_dimension_numbers<[2], [2], [1], [1], [0, 0, 0, 1, 1, 1], [0], [0]>} : vector<4x8x8xbf16>, vector<4x8x8xbf16>, vector<4x8x8xf32> -> vector<4x8x8xf32>
    "tpu.trace_stop"() : () -> ()
    %cst_71 = arith.constant dense<0xFF800000> : vector<4x8xf32>
    %111 = vector.multi_reduction <maximumf>, %110, %cst_71 [2] : vector<4x8x8xf32> to vector<4x8xf32>
    %112 = vector.shape_cast %111 : vector<4x8xf32> to vector<4x8x1xf32>
    %113 = vector.broadcast %112 : vector<4x8x1xf32> to vector<4x8x8xf32>
    %114 = arith.subf %110, %113 : vector<4x8x8xf32>
    %115 = math.exp %114 : vector<4x8x8xf32>
    %cst_72 = arith.constant dense<0.000000e+00> : vector<4x8xf32>
    %116 = vector.multi_reduction <add>, %115, %cst_72 [2] : vector<4x8x8xf32> to vector<4x8xf32>
    %117 = vector.shape_cast %116 : vector<4x8xf32> to vector<4x8x1xf32>
    %118 = tpu.reciprocal %117 {approx = true} : vector<4x8x1xf32> -> vector<4x8x1xf32>
    %119 = vector.broadcast %118 : vector<4x8x1xf32> to vector<4x8x8xf32>
    %120 = arith.mulf %115, %119 : vector<4x8x8xf32>
    %121 = arith.truncf %120 : vector<4x8x8xf32> to vector<4x8x8xbf16>
    "tpu.trace_start"() <{level = 10 : i32, message = "hqk,hkd->hqd"}> : () -> ()
    %cst_73 = arith.constant dense<0.000000e+00> : vector<4x8x8xf32>
    %122 = tpu.matmul %121, %109, %cst_73 {dimension_numbers = #tpu.dot_dimension_numbers<[2], [1], [1], [2], [0, 0, 0, 1, 1, 2], [0], [0]>} : vector<4x8x8xbf16>, vector<4x8x8xbf16>, vector<4x8x8xf32> -> vector<4x8x8xf32>
    "tpu.trace_stop"() : () -> ()
    %123 = vector.extract_strided_slice %122 {offsets = [0, 0, 0], sizes = [1, 8, 8], strides = [1, 1, 1]} : vector<4x8x8xf32> to vector<1x8x8xf32>
    %124 = vector.shape_cast %123 : vector<1x8x8xf32> to vector<8x8xf32>
    %125 = vector.extract_strided_slice %122 {offsets = [1, 0, 0], sizes = [1, 8, 8], strides = [1, 1, 1]} : vector<4x8x8xf32> to vector<1x8x8xf32>
    %126 = vector.shape_cast %125 : vector<1x8x8xf32> to vector<8x8xf32>
    %127 = vector.extract_strided_slice %122 {offsets = [2, 0, 0], sizes = [1, 8, 8], strides = [1, 1, 1]} : vector<4x8x8xf32> to vector<1x8x8xf32>
    %128 = vector.shape_cast %127 : vector<1x8x8xf32> to vector<8x8xf32>
    %129 = vector.extract_strided_slice %122 {offsets = [3, 0, 0], sizes = [1, 8, 8], strides = [1, 1, 1]} : vector<4x8x8xf32> to vector<1x8x8xf32>
    %130 = vector.shape_cast %129 : vector<1x8x8xf32> to vector<8x8xf32>
    %131 = tpu.concatenate %124, %126, %128, %130 in 1 : vector<8x8xf32>, vector<8x8xf32>, vector<8x8xf32>, vector<8x8xf32> -> vector<8x32xf32>
    %132 = arith.truncf %131 : vector<8x32xf32> to vector<8x32xbf16>
    %c0_74 = arith.constant 0 : index
    %c0_75 = arith.constant 0 : index
    %133 = vector.load %arg11[%c0_74, %c0_75] : memref<32x32xbf16, #tpu.memory_space<vmem>>, vector<32x32xbf16>
    %cst_76 = arith.constant dense<0.000000e+00> : vector<8x32xf32>
    %134 = tpu.matmul %132, %133, %cst_76 {dimension_numbers = #tpu.dot_dimension_numbers<[1], [0], [0], [1], [0, 0, 1, 1], [], []>} : vector<8x32xbf16>, vector<32x32xbf16>, vector<8x32xf32> -> vector<8x32xf32>
    %135 = arith.addf %13, %134 : vector<8x32xf32>
    %c0_77 = arith.constant 0 : index
    %c0_78 = arith.constant 0 : index
    %136 = vector.load %arg12[%c0_77, %c0_78] : memref<1x32xf32, #tpu.memory_space<vmem>>, vector<1x32xf32>
    %137 = vector.broadcast %136 : vector<1x32xf32> to vector<8x32xf32>
    %138 = arith.addf %135, %137 : vector<8x32xf32>
    %c0_79 = arith.constant 0 : index
    %c0_80 = arith.constant 0 : index
    %139 = vector.load %arg13[%c0_79, %c0_80] : memref<1x32xf32, #tpu.memory_space<vmem>>, vector<1x32xf32>
    %c0_81 = arith.constant 0 : index
    %c0_82 = arith.constant 0 : index
    %140 = vector.load %arg14[%c0_81, %c0_82] : memref<1x32xf32, #tpu.memory_space<vmem>>, vector<1x32xf32>
    %cst_83 = arith.constant dense<0.000000e+00> : vector<8xf32>
    %141 = vector.multi_reduction <add>, %138, %cst_83 [1] : vector<8x32xf32> to vector<8xf32>
    %142 = vector.shape_cast %141 : vector<8xf32> to vector<8x1xf32>
    %cst_84 = arith.constant 3.200000e+01 : f32
    %143 = vector.broadcast %cst_84 : f32 to vector<8x1xf32>
    %144 = arith.divf %142, %143 : vector<8x1xf32>
    %145 = vector.broadcast %144 : vector<8x1xf32> to vector<8x32xf32>
    %146 = arith.subf %138, %145 : vector<8x32xf32>
    %147 = arith.mulf %146, %146 : vector<8x32xf32>
    %cst_85 = arith.constant dense<0.000000e+00> : vector<8xf32>
    %148 = vector.multi_reduction <add>, %147, %cst_85 [1] : vector<8x32xf32> to vector<8xf32>
    %149 = vector.shape_cast %148 : vector<8xf32> to vector<8x1xf32>
    %cst_86 = arith.constant 3.200000e+01 : f32
    %150 = vector.broadcast %cst_86 : f32 to vector<8x1xf32>
    %151 = arith.divf %149, %150 : vector<8x1xf32>
    %152 = vector.broadcast %144 : vector<8x1xf32> to vector<8x32xf32>
    %153 = arith.subf %138, %152 : vector<8x32xf32>
    %cst_87 = arith.constant 9.99999974E-6 : f32
    %154 = vector.broadcast %cst_87 : f32 to vector<8x1xf32>
    %155 = arith.addf %151, %154 : vector<8x1xf32>
    %156 = math.rsqrt %155 : vector<8x1xf32>
    %157 = vector.broadcast %156 : vector<8x1xf32> to vector<8x32xf32>
    %158 = arith.mulf %153, %157 : vector<8x32xf32>
    %159 = vector.broadcast %139 : vector<1x32xf32> to vector<8x32xf32>
    %160 = arith.mulf %158, %159 : vector<8x32xf32>
    %161 = vector.broadcast %140 : vector<1x32xf32> to vector<8x32xf32>
    %162 = arith.addf %160, %161 : vector<8x32xf32>
    %163 = arith.truncf %162 : vector<8x32xf32> to vector<8x32xbf16>
    %cst_88 = arith.constant 0.000000e+00 : f32
    %164 = vector.broadcast %cst_88 : f32 to vector<8x32xf32>
    %c0_89 = arith.constant 0 : index
    %c0_90 = arith.constant 0 : index
    %165 = vector.load %arg15[%c0_89, %c0_90] : memref<32x128xbf16, #tpu.memory_space<vmem>>, vector<32x128xbf16>
    %cst_91 = arith.constant dense<0.000000e+00> : vector<8x128xf32>
    %166 = tpu.matmul %163, %165, %cst_91 {dimension_numbers = #tpu.dot_dimension_numbers<[1], [0], [0], [1], [0, 0, 1, 1], [], []>} : vector<8x32xbf16>, vector<32x128xbf16>, vector<8x128xf32> -> vector<8x128xf32>
    %c0_92 = arith.constant 0 : index
    %c0_93 = arith.constant 0 : index
    %167 = vector.load %arg16[%c0_92, %c0_93] : memref<1x128xf32, #tpu.memory_space<vmem>>, vector<1x128xf32>
    %168 = vector.broadcast %167 : vector<1x128xf32> to vector<8x128xf32>
    %169 = arith.addf %166, %168 : vector<8x128xf32>
    %cst_94 = arith.constant 5.000000e-01 : f32
    %170 = vector.broadcast %cst_94 : f32 to vector<8x128xf32>
    %171 = arith.mulf %170, %169 : vector<8x128xf32>
    %cst_95 = arith.constant 0.707106769 : f32
    %172 = vector.broadcast %cst_95 : f32 to vector<8x128xf32>
    %173 = arith.mulf %169, %172 : vector<8x128xf32>
    %174 = math.erf %173 : vector<8x128xf32>
    %cst_96 = arith.constant 1.000000e+00 : f32
    %175 = vector.broadcast %cst_96 : f32 to vector<8x128xf32>
    %176 = arith.addf %175, %174 : vector<8x128xf32>
    %177 = arith.mulf %171, %176 : vector<8x128xf32>
    %178 = arith.truncf %177 : vector<8x128xf32> to vector<8x128xbf16>
    %c0_97 = arith.constant 0 : index
    %c0_98 = arith.constant 0 : index
    %179 = vector.load %arg17[%c0_97, %c0_98] : memref<128x32xbf16, #tpu.memory_space<vmem>>, vector<128x32xbf16>
    %cst_99 = arith.constant dense<0.000000e+00> : vector<8x32xf32>
    %180 = tpu.matmul %178, %179, %cst_99 {dimension_numbers = #tpu.dot_dimension_numbers<[1], [0], [0], [1], [0, 0, 1, 1], [], []>} : vector<8x128xbf16>, vector<128x32xbf16>, vector<8x32xf32> -> vector<8x32xf32>
    %181 = arith.addf %164, %180 : vector<8x32xf32>
    %182 = arith.addf %138, %181 : vector<8x32xf32>
    %c0_100 = arith.constant 0 : index
    %c0_101 = arith.constant 0 : index
    %183 = vector.load %arg18[%c0_100, %c0_101] : memref<1x32xf32, #tpu.memory_space<vmem>>, vector<1x32xf32>
    %184 = vector.broadcast %183 : vector<1x32xf32> to vector<8x32xf32>
    %185 = arith.addf %182, %184 : vector<8x32xf32>
    %c0_102 = arith.constant 0 : index
    %c0_103 = arith.constant 0 : index
    %c0_104 = arith.constant 0 : index
    %186 = vector.load %arg19[%c0_102, %c0_103, %c0_104] : memref<1x8x32xf32, #tpu.memory_space<vmem>>, vector<1x8x32xf32>
    %187 = vector.shape_cast %186 : vector<1x8x32xf32> to vector<8x32xf32>
    %188 = vector.shape_cast %185 : vector<8x32xf32> to vector<1x8x32xf32>
    tpu.vector_store %arg19[%c0_102, %c0_103, %c0_104], %188 {strides = array<i32>} : memref<1x8x32xf32, #tpu.memory_space<vmem>>, vector<1x8x32xf32>,
    return
  }
  func.func @transform_0(%arg0: i32) -> (i32, i32, i32) {
    %c0_i32 = arith.constant 0 : i32
    %c0_i32_0 = arith.constant 0 : i32
    %c0_i32_1 = arith.constant 0 : i32
    return %arg0, %c0_i32, %c0_i32_0 : i32, i32, i32
  }
  func.func @transform_1(%arg0: i32) -> (i32, i32, i32) {
    %c0_i32 = arith.constant 0 : i32
    %c0_i32_0 = arith.constant 0 : i32
    %c0_i32_1 = arith.constant 0 : i32
    return %arg0, %c0_i32, %c0_i32_0 : i32, i32, i32
  }
  func.func @transform_2(%arg0: i32) -> (i32, i32) {
    %c0_i32 = arith.constant 0 : i32
    %c0_i32_0 = arith.constant 0 : i32
    %c0_i32_1 = arith.constant 0 : i32
    return %c0_i32, %c0_i32_0 : i32, i32
  }
  func.func @transform_3(%arg0: i32) -> (i32, i32) {
    %c0_i32 = arith.constant 0 : i32
    %c0_i32_0 = arith.constant 0 : i32
    %c0_i32_1 = arith.constant 0 : i32
    return %c0_i32, %c0_i32_0 : i32, i32
  }
  func.func @transform_4(%arg0: i32) -> (i32, i32) {
    %c0_i32 = arith.constant 0 : i32
    %c0_i32_0 = arith.constant 0 : i32
    %c0_i32_1 = arith.constant 0 : i32
    return %c0_i32, %c0_i32_0 : i32, i32
  }
  func.func @transform_5(%arg0: i32) -> (i32, i32) {
    %c0_i32 = arith.constant 0 : i32
    %c0_i32_0 = arith.constant 0 : i32
    %c0_i32_1 = arith.constant 0 : i32
    return %c0_i32, %c0_i32_0 : i32, i32
  }
  func.func @transform_6(%arg0: i32) -> (i32, i32) {
    %c0_i32 = arith.constant 0 : i32
    %c0_i32_0 = arith.constant 0 : i32
    %c0_i32_1 = arith.constant 0 : i32
    return %c0_i32, %c0_i32_0 : i32, i32
  }
  func.func @transform_7(%arg0: i32) -> (i32, i32, i32) {
    %c0_i32 = arith.constant 0 : i32
    %c0_i32_0 = arith.constant 0 : i32
    %c0_i32_1 = arith.constant 0 : i32
    %c0_i32_2 = arith.constant 0 : i32
    return %c0_i32, %c0_i32_0, %c0_i32_1 : i32, i32, i32
  }
  func.func @transform_8(%arg0: i32) -> (i32, i32, i32) {
    %c0_i32 = arith.constant 0 : i32
    %c0_i32_0 = arith.constant 0 : i32
    %c0_i32_1 = arith.constant 0 : i32
    %c0_i32_2 = arith.constant 0 : i32
    return %c0_i32, %c0_i32_0, %c0_i32_1 : i32, i32, i32
  }
  func.func @transform_9(%arg0: i32) -> (i32, i32, i32) {
    %c0_i32 = arith.constant 0 : i32
    %c0_i32_0 = arith.constant 0 : i32
    %c0_i32_1 = arith.constant 0 : i32
    %c0_i32_2 = arith.constant 0 : i32
    return %c0_i32, %c0_i32_0, %c0_i32_1 : i32, i32, i32
  }
  func.func @transform_10(%arg0: i32) -> (i32, i32) {
    %c0_i32 = arith.constant 0 : i32
    %c0_i32_0 = arith.constant 0 : i32
    %c0_i32_1 = arith.constant 0 : i32
    return %c0_i32, %c0_i32_0 : i32, i32
  }
  func.func @transform_11(%arg0: i32) -> (i32, i32) {
    %c0_i32 = arith.constant 0 : i32
    %c0_i32_0 = arith.constant 0 : i32
    %c0_i32_1 = arith.constant 0 : i32
    return %c0_i32, %c0_i32_0 : i32, i32
  }
  func.func @transform_12(%arg0: i32) -> (i32, i32) {
    %c0_i32 = arith.constant 0 : i32
    %c0_i32_0 = arith.constant 0 : i32
    %c0_i32_1 = arith.constant 0 : i32
    return %c0_i32, %c0_i32_0 : i32, i32
  }
  func.func @transform_13(%arg0: i32) -> (i32, i32) {
    %c0_i32 = arith.constant 0 : i32
    %c0_i32_0 = arith.constant 0 : i32
    %c0_i32_1 = arith.constant 0 : i32
    return %c0_i32, %c0_i32_0 : i32, i32
  }
  func.func @transform_14(%arg0: i32) -> (i32, i32) {
    %c0_i32 = arith.constant 0 : i32
    %c0_i32_0 = arith.constant 0 : i32
    %c0_i32_1 = arith.constant 0 : i32
    return %c0_i32, %c0_i32_0 : i32, i32
  }
  func.func @transform_15(%arg0: i32) -> (i32, i32) {
    %c0_i32 = arith.constant 0 : i32
    %c0_i32_0 = arith.constant 0 : i32
    %c0_i32_1 = arith.constant 0 : i32
    return %c0_i32, %c0_i32_0 : i32, i32
  }
  func.func @transform_16(%arg0: i32) -> (i32, i32) {
    %c0_i32 = arith.constant 0 : i32
    %c0_i32_0 = arith.constant 0 : i32
    %c0_i32_1 = arith.constant 0 : i32
    return %c0_i32, %c0_i32_0 : i32, i32
  }
  func.func @transform_17(%arg0: i32) -> (i32, i32) {
    %c0_i32 = arith.constant 0 : i32
    %c0_i32_0 = arith.constant 0 : i32
    %c0_i32_1 = arith.constant 0 : i32
    return %c0_i32, %c0_i32_0 : i32, i32
  }
  func.func @transform_18(%arg0: i32) -> (i32, i32, i32) {
    %c0_i32 = arith.constant 0 : i32
    %c0_i32_0 = arith.constant 0 : i32
    %c0_i32_1 = arith.constant 0 : i32
    return %arg0, %c0_i32, %c0_i32_0 : i32, i32, i32
  }
}

</mosaic_0001>

<bundles_post_ra>
// kernel: tpu_custom_call.1
= control target key start
LH: loop header
LB: loop body
LE: loop exit
PB: predicated region body
PF: predicated region fallthrough
CT: control target
= control target key end

     0   :  { %s3340_s0 = inlined_call_operand.vmem [shape: f32[2,8,32], index: 0, kind: input, shape index: {}]   ;;  %s3341_s1 = inlined_call_operand.vmem [shape: f32[2,8,32], index: 1, kind: input, shape index: {}]   ;;  %s3342_s2 = inlined_call_operand.vmem [shape: bf16[32,32], index: 2, kind: input, shape index: {}]   ;;  %s3343_s3 = inlined_call_operand.vmem [shape: bf16[32,32], index: 3, kind: input, shape index: {}]   ;;  %s3344_s4 = inlined_call_operand.vmem [shape: f32[1,32], index: 4, kind: input, shape index: {}]   ;;  %s3345_s5 = inlined_call_operand.vmem [shape: f32[1,32], index: 5, kind: input, shape index: {}]   ;;  %s3346_s6 = inlined_call_operand.vmem [shape: f32[1,32], index: 6, kind: input, shape index: {}]   ;;  %s3347_s7 = inlined_call_operand.vmem [shape: bf16[4,32,8], index: 7, kind: input, shape index: {}]   ;;  %s3348_s8 = inlined_call_operand.vmem [shape: bf16[4,32,8], index: 8, kind: input, shape index: {}]   ;;  %s3349_s9 = inlined_call_operand.vmem [shape: bf16[4,32,8], index: 9, kind: input, shape index: {}]   ;;  %s3350_s10 = inlined_call_operand.vmem [shape: bf16[32,32], index: 10, kind: input, shape index: {}]   ;;  %s3351_s11 = inlined_call_operand.vmem [shape: f32[1,32], index: 11, kind: input, shape index: {}]   ;;  %s3352_s12 = inlined_call_operand.vmem [shape: f32[1,32], index: 12, kind: input, shape index: {}]   ;;  %s3353_s13 = inlined_call_operand.vmem [shape: f32[1,32], index: 13, kind: input, shape index: {}]   ;;  %s3354_s14 = inlined_call_operand.vmem [shape: bf16[32,128], index: 14, kind: input, shape index: {}]   ;;  %s3355_s15 = inlined_call_operand.vmem [shape: f32[1,128], index: 15, kind: input, shape index: {}]   ;;  %s3356_s16 = inlined_call_operand.vmem [shape: bf16[128,32], index: 16, kind: input, shape index: {}]   ;;  %s3357_s17 = inlined_call_operand.vmem [shape: f32[1,32], index: 17, kind: input, shape index: {}]   ;;  %s3358_s18 = inlined_call_operand.hbm [shape: f32[2,8,32], index: 18, kind: output, shape index: {}]  }
   0x1   :  { %3369 = sst [smem:[#allocation12_spill]] %s3340_s0 }
   0x2   :  { %3370 = sst [smem:[#allocation13_spill]] %s3341_s1 }
   0x3   :  { %3371 = sst [smem:[#allocation14_spill]] %s3342_s2 }
   0x4   :  { %3372 = sst [smem:[#allocation15_spill]] %s3343_s3 }
   0x5   :  { %3373 = sst [smem:[#allocation16_spill]] %s3358_s18 }
   0x6   :  { %23 = vsyncpa [#allocation3], 0 }
   0x7   :  { %25 = vsyncpa [#allocation3 + $0x1], 0  ;;  %s2915_s27 = smov 0   ;;  %s2917_s28 = smov 0  }
   0x8   :  { %s2919_s29 = smov 0   ;;  %s2921_s30 = smov 0  }
   0x9 LB: > { %3374 = sst [smem:[#allocation5_spill]] %s2800_s27  ;;  %s2936_s0 = sadd.s32 4294967295, %s2812_s30   ;;  %s2812_s30 = sphi %s2921_s30, %s3394_s30   ;;  %s2808_s29 = sphi %s2919_s29, %s3396_s29   ;;  %s2804_s28 = sphi %s2917_s28, %s3398_s28   ;;  %s2800_s27 = sphi %s2915_s27, %s3397_s27  }
   0xa   : > { %3375 = sst [smem:[#allocation6_spill]] %s2808_s29  ;;  %s2256_s19 = sadd.s32 4294967294, %s2812_s30  }
   0xb   : > { %3376 = sst [smem:[#allocation7_spill]] %s2812_s30  ;;  %s2940_s1 = sadd.s32 1, %s2812_s30  }
   0xc   : > { %3377 = sst [smem:[#allocation8_spill]] %s2940_s1  ;;  %s426_s20 = sadd.s32 1, %s2808_s29 }
   0xd   : > { %s423_s21 = ssub.s32 %s2812_s30, %s2940_s1  ;;  %p436_p0 = scmp.ne.s32.totalorder %s2808_s29, %s2804_s28 }
   0xe   : > { %p424_p1 = scmp.eq.s32.totalorder %s423_s21, 0  ;;  %p437_p2 = scmp.eq.s32.totalorder %s2936_s0, 1 }
   0xf   : > { %p442_p3 = scmp.ne.s32.totalorder %s2804_s28, %s2800_s27  ;;  %p443_p4 = scmp.eq.s32.totalorder %s2256_s19, 1 }
  0x10   : > { %s2951_s22 = scalar_select %p424_p1, %s2808_s29, %s426_s20  }
  0x11   : > { %p2953_p5 = por %p437_p2, %p436_p0  ;;  %p2957_p6 = por %p443_p4, %p442_p3 }
  0x12   : > { %3378 = sst [smem:[#allocation9_spill]] %s2951_s22  ;;  %p2259_p7 = scmp.ge.s32.totalorder %s2812_s30, 1 }
  0x13   : > { %s3379_s2 = scalar_select %p2953_p5, 1, 0 }
  0x14   : > { %s3381_s23 = scalar_select %p2957_p6, 1, 0 }
  0x15   : > { %3380 = sst [smem:[#allocation10_spill]] %s3379_s2  ;;  %p523_p8 = scmp.lt.s32.totalorder %s2812_s30, 3 }
  0x16   : > { %3382 = sst [smem:[#allocation11_spill]] %s3381_s23 }
  0x17   : > { %p524_p9 = pnand %p2259_p7, %p523_p8 }
  0x18   : > { %s3383_s3 = sld [smem:[#allocation15_spill]] (!%p524_p9)  ;;  %v2814_v1 = vmov (!%p524_p9), 0.0   ;;  %vm2815_vm0 = vmmov (!%p524_p9), 0   ;;  %p580_p10 = scmp.lt.s32.totalorder (!%p524_p9), %s2936_s0, 1  ;;  %vm613_vm1 = vcmask (!%p524_p9), 261120   ;;  %v2692_v26 = vld [vmem:[%s3347_s7] sm:$0xff] (!%p524_p9)  }
  0x19   : > { %527 = sbr.rel (%p524_p9) target bundleno = 2688 (0xa80), region = 92  ;;  %2448 = vmatprep.subr.bf16.mxu1 (!%p524_p9), %v2814_v1  ;;  %2480 = vmatprep.subr.bf16.mxu0 (!%p524_p9), %v2814_v1  ;;  %s3384_s22 = sld [smem:[#allocation12_spill]] (!%p524_p9)  ;;  %v2269_v14 = vld [vmem:[%s3344_s4] ss:$0 sm:$0xff] (!%p524_p9)  ;;  %v2694_v28 = vld [vmem:[%s3347_s7 + $0x8] sm:$0xff] (!%p524_p9)   ;;  %v2697_v40 = vld [vmem:[%s3348_s8 + $0x10] sm:$0xff] (!%p524_p9)  }
  0x1a   : > { %2452 = vmatprep.mubr.msk.bf16.mxu1 (!%p524_p9), %vm2815_vm0, %v2814_v1  ;;  %2484 = vmatprep.mubr.msk.bf16.mxu0 (!%p524_p9), %vm2815_vm0, %v2814_v1  ;;  %s3385_s19 = sld [smem:[#allocation13_spill]] (!%p524_p9)  ;;  %s3386_s30 = sld [smem:[#allocation14_spill]] (!%p524_p9)  ;;  %v2693_v27 = vld [vmem:[%s3349_s9] sm:$0xff] (!%p524_p9)   ;;  %v2695_v29 = vld [vmem:[%s3349_s9 + $0x8] sm:$0xff] (!%p524_p9)   ;;  %v2699_v43 = vld [vmem:[%s3348_s8 + $0x18] sm:$0xff] (!%p524_p9)   ;;  %vm1451_vm2 = vcmask (!%p524_p9), 64512  }
  0x1b   : > { %2481 = vmatpush3.bf16.msra.mxu0 (!%p524_p9), %v2693_v27  ;;  %v2270_v34 = vld [vmem:[%s3345_s5] ss:$0 sm:$0xff] (!%p524_p9)  ;;  %v2698_v42 = vld [vmem:[%s3348_s8 + $0x8] sm:$0xff] (!%p524_p9)   ;;  %v2700_v44 = vld [vmem:[%s3347_s7 + $0x10] sm:$0xff] (!%p524_p9)   ;;  %vm1687_vm3 = vcmask (!%p524_p9), 1043456   ;;  %s2818_s1 = smov (!%p524_p9), 24  }
  0x1c   : > { %2482 = vmatprep.subr.bf16.mxu0 (!%p524_p9), %v2814_v1  ;;  %v2271_v36 = vld [vmem:[%s3346_s6] ss:$0 sm:$0xff] (!%p524_p9)  ;;  %v2702_v46 = vld [vmem:[%s3347_s7 + $0x18] sm:$0xff] (!%p524_p9)   ;;  %v2703_v47 = vld [vmem:[%s3347_s7 + $0x28] sm:$0xff] (!%p524_p9)   ;;  %vm1882_vm4 = vcmask (!%p524_p9), 130048   ;;  %vm1884_vm5 = vcmask (!%p524_p9), 195584  }
  0x1d   : > { %v2696_v39 = vld [vmem:[%s3348_s8] sm:$0xff] (!%p524_p9)   ;;  %v2704_v48 = vld [vmem:[%s3349_s9 + $0x10] sm:$0xff] (!%p524_p9)   ;;  %v2706_v50 = vld [vmem:[%s3349_s9 + $0x18] sm:$0xff] (!%p524_p9)   ;;  %s2372_s25 = sshll.u32 (!%p524_p9), %s2936_s0, 7  ;;  %s3389_s27 = sld [smem:[#allocation16_spill]] (!%p524_p9) }
  0x1e   : > { %v2688_v0 = vld [vmem:[%s3383_s3] sm:$0xff] (!%p524_p9)   ;;  %v2689_v2 = vld [vmem:[%s3383_s3 + $0x8] sm:$0xff] (!%p524_p9)   ;;  %v2709_v53 = vld [vmem:[%s3348_s8 + $0x30] sm:$0xff] (!%p524_p9)  }
  0x1f   : > { %2449 = vmatpush3.bf16.msra.mxu1 (!%p524_p9), %v2688_v0  ;;  %2483 = vmatpush3.bf16.msra.mxu0 (!%p524_p9), %v2695_v29  ;;  %v2701_v45 = vld [vmem:[%s3347_s7 + $0x20] sm:$0xff] (!%p524_p9)   ;;  %v2707_v51 = vld [vmem:[%s3349_s9 + $0x28] sm:$0xff] (!%p524_p9)   ;;  %v2711_v55 = vld [vmem:[%s3348_s8 + $0x38] sm:$0xff] (!%p524_p9)  }
  0x20   : > { %2450 = vmatprep.subr.bf16.mxu1 %v2814_v1  ;;  %s581_s20 = scalar_select %p580_p10, %s2936_s0, 1  ;;  %v2690_v4 = vld [vmem:[%s3386_s30] sm:$0xff]   ;;  %2496 = vmatprep.subr.bf16.mxu0 %v2814_v1  ;;  %v2710_v54 = vld [vmem:[%s3348_s8 + $0x28] sm:$0xff]   ;;  %v2712_v56 = vld [vmem:[%s3347_s7 + $0x30] sm:$0xff]  }
  0x21   : > { %s3387_s18 = smov %s3386_s30  ;;  %v2705_v49 = vld [vmem:[%s3349_s9 + $0x20] sm:$0xff]   ;;  %v2713_v57 = vld [vmem:[%s3347_s7 + $0x38] sm:$0xff]   ;;  %v2714_v58 = vld [vmem:[%s3349_s9 + $0x30] sm:$0xff]   ;;  %s2817_s30 = smov 16  }
  0x22   : > { %s2261_s21 = sshll.u32 %s581_s20, 3  ;;  %v2691_v7 = vld [vmem:[%s3387_s18 + $0x8] sm:$0xff]   ;;  %v2708_v52 = vld [vmem:[%s3348_s8 + $0x20] sm:$0xff]   ;;  %v2715_v59 = vld [vmem:[%s3349_s9 + $0x38] sm:$0xff]  }
  0x23   : > { %2451 = vmatpush3.bf16.msra.mxu1 %v2689_v2  ;;  %s583_s29 = scalar_lea.vmem %s3384_s22, %s2261_s21  ;;  %s587_s3 = scalar_lea.vmem %s3385_s19, %s2261_s21 }
  0x24   : > { %2456 = vmatprep.subr.bf16.mxu1 %v2814_v1  ;;  %v591_v3 = vld [vmem:[%s587_s3] sm:$0xff]  ;;  %s2816_s19 = smov 8   ;;  %s577_s22 = sand.u32 1, %s2804_s28  }
  0x25   : > { %v592_v5 = vpack.c.bf16 %v591_v3, %v591_v3  ;;  %v589_v6 = vld [vmem:[%s583_s29] sm:$0xff]  ;;  %s2260_s2 = sshll.u32 %s577_s22, 3  ;;  %s3297_s29 = scalar_lea.hbm %s3389_s27, %s2372_s25 }
  0x26   : > { %v590_v8 = vpack.c.bf16 %v589_v6, %v589_v6  ;;  %s579_s26 = scalar_lea.vmem [#allocation2], %s2260_s2  ;;  %s2172_s0 = scalar_lea.sflag [#allocation3], %s577_s22 }
  0x27   : > { %2453 = vmatmul.mubr.msk.bf16.vlgmr.msra.gmra.mrb[0].mxu1 %vm613_vm1, %v592_v5  ;;  %s2819_s2 = smov [#allocation2]  }
  0x28   : > { %2457 = vmatpush3.bf16.msra.mxu1 %v2690_v4  ;;  %2460 = vmatprep.mubr.msk.bf16.mxu1 %vm2815_vm0, %v2814_v1  ;;  %s2754_s23 = sshll.u32 %s2819_s2, 4  ;;  %s2755_s23 = int_to_ptr.vmem [resolvable:$false] %s2754_s23 }
  0x29   : > { %2458 = vmatprep.subr.bf16.mxu1 %v2814_v1  ;;  %s2756_s21 = scalar_lea.vmem %s2755_s23, 256 }
  0x2c   : > { %2459 = vmatpush3.bf16.msra.mxu1 %v2691_v7 }
  0x2d   : > { %2464 = vmatprep.subr.bf16.mxu1 %v2814_v1 }
  0x2f   : > { %2461 = vmatmul.mubr.msk.bf16.vlgmr.msra.gmra.mrb[4].mxu1 %vm613_vm1, %v590_v8 }
  0x30   : > { %2468 = vmatprep.mubr.msk.bf16.mxu1 %vm2815_vm0, %v2814_v1  ;;  %2465 = vmatpush3.bf16.msra.mxu1 %v2692_v26 }
  0x31   : > { %2466 = vmatprep.subr.bf16.mxu1 %v2814_v1 }
  0x34   : > { %2467 = vmatpush3.bf16.msra.mxu1 %v2694_v28 }
  0x35   : > { %2472 = vmatprep.subr.bf16.mxu1 %v2814_v1 }
  0xfa   : > { %v651_v9 = vpop.f32.mrb[0].mxu1 }
  0xfb   : > { %v2454_v10 = vpop.f32.mrb[1].mxu1 }
  0xfc   : > { %v654_v11 = vpop.f32.mrb[2].mxu1 }
  0xfd   : > { %v2455_v12 = vpop.f32.mrb[3].mxu1 }
 0x102   : > { %v706_v13 = vpop.f32.mrb[4].mxu1 }
 0x103   : > { %v707_v15 = vadd.f32 %v706_v13, %v651_v9  ;;  %v2462_v16 = vpop.f32.mrb[5].mxu1 }
 0x104   : > { %v709_v17 = vpop.f32.mrb[6].mxu1 }
 0x105   : > { %v3002_v18 = vadd.f32 %v2269_v14, %v707_v15  ;;  %v2463_v19 = vpop.f32.mrb[7].mxu1 }
 0x107   : > { %v722_v20 = vsel %vm613_vm1, %v3002_v18, 0.0 }
 0x108   : > { %723 = vadd.xlane.f32.xlu0 %v722_v20 }
 0x195   : > { %v724_v21 = vpop.xlane.xlu0 %723 }
 0x196   : > { %v726_v22 = vmul.f32 0.03125, %v724_v21 }
 0x198   : > { %v727_v23 = vsub.f32 %v3002_v18, %v726_v22 }
 0x19a   : > { %v728_v24 = vmul.f32 %v727_v23, %v727_v23 }
 0x19c   : > { %v729_v25 = vsel %vm613_vm1, %v728_v24, 0.0 }
 0x19d   : > { %730 = vadd.xlane.f32.xlu0 %v729_v25 }
 0x22a   : > { %v731_v30 = vpop.xlane.xlu0 %730 }
 0x22b   : > { %v732_v31 = vmul.f32 0.03125, %v731_v30 }
 0x22d   : > { %v733_v32 = vadd.f32 1e-05, %v732_v31 }
 0x22f   : > { %2728 = vrsqrt.f32 %v733_v32 }
 0x239   : > { %v2729_v33 = vpop.eup %2728 }
 0x23a   : > { %v735_v35 = vmul.f32 %v2729_v33, %v727_v23 }
 0x23c   : > { %v742_v37 = vmul.f32 %v2270_v34, %v735_v35 }
 0x23e   : > { %v749_v38 = vadd.f32 %v2271_v36, %v742_v37 }
 0x240   : > { %v3036_v41 = vpack.c.bf16 %v749_v38, %v749_v38 }
 0x242   : > { %2469 = vmatmul.mubr.msk.bf16.vlgmr.msra.gmra.mrb[8].mxu1 %vm613_vm1, %v3036_v41  ;;  %2485 = vmatmul.mubr.msk.bf16.vlgmr.msra.gmra.mrb[0].mxu0 %vm613_vm1, %v3036_v41 }
 0x243   : > { %2473 = vmatpush3.bf16.msra.mxu1 %v2696_v39  ;;  %2497 = vmatpush3.bf16.msra.mxu0 %v2697_v40 }
 0x244   : > { %2474 = vmatprep.subr.bf16.mxu1 %v2814_v1  ;;  %2498 = vmatprep.subr.bf16.mxu0 %v2814_v1 }
 0x245   : > { %2476 = vmatprep.mubr.msk.bf16.mxu1 %vm2815_vm0, %v2814_v1  ;;  %2500 = vmatprep.mubr.msk.bf16.mxu0 %vm2815_vm0, %v2814_v1 }
 0x247   : > { %2475 = vmatpush3.bf16.msra.mxu1 %v2698_v42  ;;  %2499 = vmatpush3.bf16.msra.mxu0 %v2699_v43 }
 0x248   : > { %2488 = vmatprep.subr.bf16.mxu1 %v2814_v1  ;;  %2512 = vmatprep.subr.bf16.mxu0 %v2814_v1 }
 0x24a   : > { %2477 = vmatmul.mubr.msk.bf16.vlgmr.msra.gmra.mrb[12].mxu1 %vm613_vm1, %v3036_v41  ;;  %2501 = vmatmul.mubr.msk.bf16.vlgmr.msra.gmra.mrb[4].mxu0 %vm613_vm1, %v3036_v41 }
 0x24b   : > { %2489 = vmatpush3.bf16.msra.mxu1 %v2700_v44  ;;  %2513 = vmatpush3.bf16.msra.mxu0 %v2701_v45 }
 0x24c   : > { %2490 = vmatprep.subr.bf16.mxu1 %v2814_v1  ;;  %2514 = vmatprep.subr.bf16.mxu0 %v2814_v1 }
 0x24d   : > { %2492 = vmatprep.mubr.msk.bf16.mxu1 %vm2815_vm0, %v2814_v1  ;;  %2516 = vmatprep.mubr.msk.bf16.mxu0 %vm2815_vm0, %v2814_v1 }
 0x24f   : > { %2491 = vmatpush3.bf16.msra.mxu1 %v2702_v46  ;;  %2515 = vmatpush3.bf16.msra.mxu0 %v2703_v47 }
 0x250   : > { %2504 = vmatprep.subr.bf16.mxu1 %v2814_v1  ;;  %2528 = vmatprep.subr.bf16.mxu0 %v2814_v1 }
 0x252   : > { %2493 = vmatmul.mubr.msk.bf16.vlgmr.msra.gmra.mrb[16].mxu1 %vm613_vm1, %v3036_v41  ;;  %2517 = vmatmul.mubr.msk.bf16.vlgmr.msra.gmra.mrb[8].mxu0 %vm613_vm1, %v3036_v41 }
 0x253   : > { %2505 = vmatpush3.bf16.msra.mxu1 %v2704_v48  ;;  %2529 = vmatpush3.bf16.msra.mxu0 %v2705_v49 }
 0x254   : > { %2506 = vmatprep.subr.bf16.mxu1 %v2814_v1  ;;  %2530 = vmatprep.subr.bf16.mxu0 %v2814_v1 }
 0x255   : > { %2508 = vmatprep.mubr.msk.bf16.mxu1 %vm2815_vm0, %v2814_v1  ;;  %2532 = vmatprep.mubr.msk.bf16.mxu0 %vm2815_vm0, %v2814_v1 }
 0x257   : > { %2507 = vmatpush3.bf16.msra.mxu1 %v2706_v50  ;;  %2531 = vmatpush3.bf16.msra.mxu0 %v2707_v51 }
 0x258   : > { %2520 = vmatprep.subr.bf16.mxu1 %v2814_v1  ;;  %2544 = vmatprep.subr.bf16.mxu0 %v2814_v1 }
 0x25a   : > { %2509 = vmatmul.mubr.msk.bf16.vlgmr.msra.gmra.mrb[20].mxu1 %vm613_vm1, %v3036_v41  ;;  %2533 = vmatmul.mubr.msk.bf16.vlgmr.msra.gmra.mrb[12].mxu0 %vm613_vm1, %v3036_v41 }
 0x25b   : > { %2521 = vmatpush3.bf16.msra.mxu1 %v2708_v52  ;;  %2545 = vmatpush3.bf16.msra.mxu0 %v2709_v53 }
 0x25c   : > { %2522 = vmatprep.subr.bf16.mxu1 %v2814_v1  ;;  %2546 = vmatprep.subr.bf16.mxu0 %v2814_v1 }
 0x25d   : > { %2524 = vmatprep.mubr.msk.bf16.mxu1 %vm2815_vm0, %v2814_v1  ;;  %2548 = vmatprep.mubr.msk.bf16.mxu0 %vm2815_vm0, %v2814_v1 }
 0x25f   : > { %2523 = vmatpush3.bf16.msra.mxu1 %v2710_v54  ;;  %2547 = vmatpush3.bf16.msra.mxu0 %v2711_v55 }
 0x260   : > { %2536 = vmatprep.subr.bf16.mxu1 %v2814_v1  ;;  %2560 = vmatprep.subr.bf16.mxu0 %v2814_v1 }
 0x262   : > { %2525 = vmatmul.mubr.msk.bf16.vlgmr.msra.gmra.mrb[24].mxu1 %vm613_vm1, %v3036_v41  ;;  %2549 = vmatmul.mubr.msk.bf16.vlgmr.msra.gmra.mrb[16].mxu0 %vm613_vm1, %v3036_v41 }
 0x263   : > { %2537 = vmatpush3.bf16.msra.mxu1 %v2712_v56  ;;  %2540 = vmatprep.mubr.msk.bf16.mxu1 %vm2815_vm0, %v2814_v1 }
 0x264   : > { %2538 = vmatprep.subr.bf16.mxu1 %v2814_v1  ;;  %2562 = vmatprep.mubr.msk.bf16.mxu0 %vm2815_vm0, %v2814_v1 }
 0x267   : > { %2539 = vmatpush3.bf16.msra.mxu1 %v2713_v57 }
 0x268   : > { %2552 = vmatprep.subr.bf16.mxu1 %v2814_v1 }
 0x26a   : > { %2541 = vmatmul.mubr.msk.bf16.vlgmr.msra.gmra.mrb[28].mxu1 %vm613_vm1, %v3036_v41 }
 0x26b   : > { %2553 = vmatpush3.bf16.msra.mxu1 %v2714_v58  ;;  %2556 = vmatprep.mubr.msk.bf16.mxu1 %vm2815_vm0, %v2814_v1 }
 0x26c   : > { %2554 = vmatprep.subr.bf16.mxu1 %v2814_v1 }
 0x26f   : > { %2555 = vmatpush3.bf16.msra.mxu1 %v2715_v59 }
 0x270   : > { %2566 = vmatprep.subr.bf16.mxu1 %v2814_v1 }
 0x272   : > { %2557 = vmatmul.mubr.msk.bf16.vlgmr.msra.gmra.mrb[32].mxu1 %vm613_vm1, %v3036_v41 }
 0x273   : > { %2568 = vmatprep.mubr.msk.bf16.mxu1 %vm2815_vm0, %v2814_v1 }
 0x315   : > { %v804_v60 = vpop.f32.mrb[8].mxu1  ;;  %v3160_v61 = vpop.f32.mrb[0].mxu0 }
 0x316   : > { %v2470_v62 = vpop.f32.mrb[9].mxu1  ;;  %v2486_v63 = vpop.f32.mrb[1].mxu0  ;;  %v810_v17 = vmul.f32 0.35355338, %v804_v60  ;;  %v925_v53 = vpack.c.bf16 %v3160_v61, %v3160_v61 }
 0x317   : > { %v807_v0 = vpop.f32.mrb[10].mxu1  ;;  %v922_v2 = vpop.f32.mrb[2].mxu0 }
 0x318   : > { %v2471_v3 = vpop.f32.mrb[11].mxu1  ;;  %v2487_v4 = vpop.f32.mrb[3].mxu0  ;;  %v811_v21 = vpack.c.bf16 %v810_v17, %v810_v17  ;;  %v1689_v60 = vsel %vm1687_vm3, %v925_v53, 0 }
 0x31d   : > { %v862_v5 = vpop.f32.mrb[12].mxu1  ;;  %v1036_v6 = vpop.f32.mrb[4].mxu0 }
 0x31e   : > { %v868_v7 = vpack.c.bf16 %v862_v5, %v862_v5  ;;  %v1042_v8 = vpack.c.bf16 %v1036_v6, %v1036_v6  ;;  %v2478_v9 = vpop.f32.mrb[13].mxu1  ;;  %v2502_v10 = vpop.f32.mrb[5].mxu0 }
 0x31f   : > { %v865_v11 = vpop.f32.mrb[14].mxu1  ;;  %v1039_v12 = vpop.f32.mrb[6].mxu0 }
 0x320   : > { %v1456_v13 = vsel %vm1451_vm2, %v868_v7, 0  ;;  %v1502_v14 = vsel %vm1451_vm2, %v1042_v8, 0  ;;  %v2479_v15 = vpop.f32.mrb[15].mxu1  ;;  %v2503_v16 = vpop.f32.mrb[7].mxu0 }
 0x321   : > { %2561 = vmatpush3.bf16.xpose.msra.mxu0 %v1456_v13  ;;  %2567 = vmatpush3.bf16.xpose.msra.mxu1 %v1502_v14 }
 0x322   : > { %2572 = vmatprep.subr.bf16.mxu0 %v2814_v1  ;;  %2578 = vmatprep.subr.bf16.mxu1 %v2814_v1 }
 0x325   : > { %v977_v19 = vpop.f32.mrb[16].mxu1  ;;  %v1152_v20 = vpop.f32.mrb[8].mxu0 }
 0x326   : > { %v983_v22 = vmul.f32 0.35355338, %v977_v19  ;;  %v2494_v23 = vpop.f32.mrb[17].mxu1  ;;  %v2518_v24 = vpop.f32.mrb[9].mxu0  ;;  %v1158_v52 = vmul.f32 0.35355338, %v1152_v20 }
 0x327   : > { %v980_v25 = vpop.f32.mrb[18].mxu1  ;;  %v1155_v26 = vpop.f32.mrb[10].mxu0 }
 0x328   : > { %v984_v27 = vpack.c.bf16 %v983_v22, %v983_v22  ;;  %v2495_v28 = vpop.f32.mrb[19].mxu1  ;;  %v2519_v29 = vpop.f32.mrb[11].mxu0  ;;  %2563 = vmatmul.mubr.msk.bf16.vlgmr.msra.gmra.mrb[20].mxu0 %vm1451_vm2, %v811_v21  ;;  %v1159_v55 = vpack.c.bf16 %v1158_v52, %v1158_v52 }
 0x329   : > { %2574 = vmatprep.mubr.msk.bf16.mxu0 %vm2815_vm0, %v2814_v1 }
 0x32a   : > { %2569 = vmatmul.mubr.msk.bf16.vlgmr.msra.gmra.mrb[36].mxu1 %vm1451_vm2, %v984_v27 }
 0x32b   : > { %2580 = vmatprep.mubr.msk.bf16.mxu1 %vm2815_vm0, %v2814_v1 }
 0x32d   : > { %v1094_v30 = vpop.f32.mrb[20].mxu1  ;;  %v1269_v31 = vpop.f32.mrb[12].mxu0 }
 0x32e   : > { %v1275_v32 = vpack.c.bf16 %v1269_v31, %v1269_v31  ;;  %v2510_v33 = vpop.f32.mrb[21].mxu1  ;;  %v2534_v34 = vpop.f32.mrb[13].mxu0  ;;  %v1100_v56 = vpack.c.bf16 %v1094_v30, %v1094_v30 }
 0x32f   : > { %v1097_v35 = vpop.f32.mrb[22].mxu1  ;;  %v1272_v36 = vpop.f32.mrb[14].mxu0 }
 0x330   : > { %v3173_v37 = vsel %vm1687_vm3, %v1275_v32, 0  ;;  %v2511_v38 = vpop.f32.mrb[23].mxu1  ;;  %v2535_v39 = vpop.f32.mrb[15].mxu0  ;;  %v1735_v0 = vsel %vm1687_vm3, %v1100_v56, 0 }
 0x335   : > { %v1211_v40 = vpop.f32.mrb[24].mxu1  ;;  %v1386_v41 = vpop.f32.mrb[16].mxu0 }
 0x336   : > { %v1217_v42 = vpack.c.bf16 %v1211_v40, %v1211_v40  ;;  %v1392_v43 = vpack.c.bf16 %v1386_v41, %v1386_v41  ;;  %v2526_v44 = vpop.f32.mrb[25].mxu1  ;;  %v2550_v45 = vpop.f32.mrb[17].mxu0 }
 0x337   : > { %v1214_v46 = vpop.f32.mrb[26].mxu1  ;;  %v1389_v47 = vpop.f32.mrb[18].mxu0 }
 0x338   : > { %v1548_v48 = vsel %vm1451_vm2, %v1217_v42, 0  ;;  %v1594_v49 = vsel %vm1451_vm2, %v1392_v43, 0  ;;  %v2527_v50 = vpop.f32.mrb[27].mxu1  ;;  %v2551_v51 = vpop.f32.mrb[19].mxu0 }
 0x339   : > { %2573 = vmatpush3.bf16.xpose.msra.mxu0 %v1548_v48  ;;  %2579 = vmatpush3.bf16.xpose.msra.mxu1 %v1594_v49 }
 0x33a   : > { %2584 = vmatprep.subr.bf16.mxu0 %v2814_v1  ;;  %2590 = vmatprep.subr.bf16.mxu1 %v2814_v1 }
 0x33d   : > { %v1327_v54 = vpop.f32.mrb[28].mxu1 }
 0x33e   : > { %v1333_v57 = vmul.f32 0.35355338, %v1327_v54  ;;  %v2542_v58 = vpop.f32.mrb[29].mxu1 }
 0x33f   : > { %v1330_v59 = vpop.f32.mrb[30].mxu1 }
 0x340   : > { %v1334_v62 = vpack.c.bf16 %v1333_v57, %v1333_v57  ;;  %v2543_v63 = vpop.f32.mrb[31].mxu1  ;;  %2575 = vmatmul.mubr.msk.bf16.vlgmr.msra.gmra.mrb[24].mxu0 %vm1451_vm2, %v1159_v55 }
 0x341   : > { %2585 = vmatpush3.bf16.msra.mxu0 %v1689_v60  ;;  %2586 = vmatprep.mubr.msk.bf16.mxu0 %vm2815_vm0, %v2814_v1 }
 0x342   : > { %2581 = vmatmul.mubr.msk.bf16.vlgmr.msra.gmra.mrb[40].mxu1 %vm1451_vm2, %v1334_v62  ;;  %2596 = vmatprep.subr.bf16.mxu0 %v2814_v1 }
 0x343   : > { %2591 = vmatpush3.bf16.msra.mxu1 %v1735_v0  ;;  %2592 = vmatprep.mubr.msk.bf16.mxu1 %vm2815_vm0, %v2814_v1 }
 0x344   : > { %2602 = vmatprep.subr.bf16.mxu1 %v2814_v1 }
 0x345   : > { %v1444_v61 = vpop.f32.mrb[32].mxu1 }
 0x346   : > { %v1450_v2 = vpack.c.bf16 %v1444_v61, %v1444_v61  ;;  %v2558_v3 = vpop.f32.mrb[33].mxu1 }
 0x347   : > { %v1447_v4 = vpop.f32.mrb[34].mxu1 }
 0x348   : > { %v3192_v5 = vsel %vm1687_vm3, %v1450_v2, 0  ;;  %v2559_v6 = vpop.f32.mrb[35].mxu1 }
 0x3fb   : > { %v1492_v7 = vpop.f32.mrb[20].mxu0 }
 0x3fc   : > { %v2564_v8 = vpop.f32.mrb[21].mxu0  ;;  %v1636_v9 = vsel %vm1451_vm2, %v1492_v7, -inf }
 0x3fd   : > { %1637 = vmax.xlane.f32.xlu1 %v1636_v9  ;;  %v1495_v10 = vpop.f32.mrb[22].mxu0  ;;  %v1538_v11 = vpop.f32.mrb[36].mxu1  ;;  %v2716_v9 = vld [vmem:[%s3350_s10] sm:$0xff]  }
 0x3fe   : > { %v2565_v12 = vpop.f32.mrb[23].mxu0  ;;  %v2570_v13 = vpop.f32.mrb[37].mxu1  ;;  %v1639_v16 = vsel %vm1451_vm2, %v1538_v11, -inf  ;;  %v2717_v10 = vld [vmem:[%s3350_s10 + $0x8] sm:$0xff]  }
 0x3ff   : > { %v1541_v14 = vpop.f32.mrb[38].mxu1 }
 0x400   : > { %v2571_v15 = vpop.f32.mrb[39].mxu1 }
 0x401   : > { %1640 = vmax.xlane.f32.xlu1 %v1639_v16 }
 0x413   : > { %v1584_v17 = vpop.f32.mrb[24].mxu0 }
 0x414   : > { %v2576_v19 = vpop.f32.mrb[25].mxu0  ;;  %v1642_v20 = vsel %vm1451_vm2, %v1584_v17, -inf }
 0x415   : > { %1643 = vmax.xlane.f32.xlu0 %v1642_v20  ;;  %v1587_v21 = vpop.f32.mrb[26].mxu0  ;;  %v1630_v22 = vpop.f32.mrb[40].mxu1 }
 0x416   : > { %v2577_v23 = vpop.f32.mrb[27].mxu0  ;;  %v2582_v24 = vpop.f32.mrb[41].mxu1  ;;  %v1645_v25 = vsel %vm1451_vm2, %v1630_v22, -inf }
 0x417   : > { %1646 = vmax.xlane.f32.xlu1 %v1645_v25  ;;  %v1633_v26 = vpop.f32.mrb[42].mxu1 }
 0x418   : > { %v2583_v27 = vpop.f32.mrb[43].mxu1 }
 0x48a   : > { %v1638_v28 = vpop.xlane.xlu1 %1637 }
 0x48b   : > { %v1648_v29 = vsub.f32 %v1492_v7, %v1638_v28  ;;  %v2355_v28 = vld [vmem:[%s3351_s11] ss:$0 sm:$0xff] }
 0x48d   : > { %v1652_v30 = vmul.f32 1.442695, %v1648_v29 }
 0x48e   : > { %v1641_v31 = vpop.xlane.xlu1 %1640 }
 0x48f   : > { %2730 = vpow2.f32 %v1652_v30  ;;  %v1649_v32 = vsub.f32 %v1538_v11, %v1641_v31 }
 0x491   : > { %v1654_v33 = vmul.f32 1.442695, %v1649_v32 }
 0x493   : > { %2732 = vpow2.f32 %v1654_v33 }
 0x499   : > { %v2731_v34 = vpop.eup %2730 }
 0x49a   : > { %v1660_v35 = vsel %vm1451_vm2, %v2731_v34, 0.0 }
 0x49b   : > { %1661 = vadd.xlane.f32.xlu0 %v1660_v35 }
 0x49d   : > { %v2733_v36 = vpop.eup %2732 }
 0x49e   : > { %v1663_v38 = vsel %vm1451_vm2, %v2733_v36, 0.0 }
 0x49f   : > { %1664 = vadd.xlane.f32.xlu1 %v1663_v38 }
 0x4a2   : > { %v1644_v39 = vpop.xlane.xlu0 %1643 }
 0x4a3   : > { %v1650_v40 = vsub.f32 %v1584_v17, %v1644_v39 }
 0x4a4   : > { %v1647_v41 = vpop.xlane.xlu1 %1646 }
 0x4a5   : > { %v1656_v42 = vmul.f32 1.442695, %v1650_v40  ;;  %v1651_v43 = vsub.f32 %v1630_v22, %v1647_v41  ;;  %v2719_v41 = vld [vmem:[%s3354_s14 + $0x8] sm:$0xff]  }
 0x4a7   : > { %2734 = vpow2.f32 %v1656_v42  ;;  %v1658_v44 = vmul.f32 1.442695, %v1651_v43  ;;  %v2720_v42 = vld [vmem:[%s3356_s16] sm:$0xff]   ;;  %v2721_v43 = vld [vmem:[%s3356_s16 + $0x8] sm:$0xff]  }
 0x4a9   : > { %2736 = vpow2.f32 %v1658_v44  ;;  %v2722_v44 = vld [vmem:[%s3356_s16 + $0x10] sm:$0xff]  }
 0x4b1   : > { %v2735_v45 = vpop.eup %2734 }
 0x4b2   : > { %v1666_v46 = vsel %vm1451_vm2, %v2735_v45, 0.0 }
 0x4b3   : > { %v2737_v47 = vpop.eup %2736  ;;  %1667 = vadd.xlane.f32.xlu0 %v1666_v46 }
 0x4b4   : > { %v1669_v48 = vsel %vm1451_vm2, %v2737_v47, 0.0 }
 0x4b5   : > { %1670 = vadd.xlane.f32.xlu1 %v1669_v48 }
 0x528   : > { %v1662_v49 = vpop.xlane.xlu0 %1661 }
 0x529   : > { %2738 = vrcp.f32 %v1662_v49  ;;  %v2356_v49 = vld [vmem:[%s3352_s12] ss:$0 sm:$0xff] }
 0x52c   : > { %v1665_v50 = vpop.xlane.xlu1 %1664 }
 0x52d   : > { %2740 = vrcp.f32 %v1665_v50 }
 0x533   : > { %v2739_v51 = vpop.eup %2738 }
 0x534   : > { %v1676_v52 = vmul.f32 %v2739_v51, %v2731_v34  ;;  %v2357_v51 = vld [vmem:[%s3353_s13] ss:$0 sm:$0xff] }
 0x536   : > { %v1680_v53 = vpack.c.bf16 %v1676_v52, %v1676_v52 }
 0x537   : > { %v2741_v54 = vpop.eup %2740 }
 0x538   : > { %v1677_v55 = vmul.f32 %v2741_v54, %v2733_v36  ;;  %2587 = vmatmul.mubr.msk.bf16.vlgmr.msra.gmra.mrb[28].mxu0 %vm1451_vm2, %v1680_v53 }
 0x539   : > { %2597 = vmatpush3.bf16.msra.mxu0 %v3173_v37  ;;  %2598 = vmatprep.mubr.msk.bf16.mxu0 %vm2815_vm0, %v2814_v1 }
 0x53a   : > { %v1681_v56 = vpack.c.bf16 %v1677_v55, %v1677_v55  ;;  %2608 = vmatprep.subr.bf16.mxu0 %v2814_v1  ;;  %v2723_v55 = vld [vmem:[%s3356_s16 + $0x18] sm:$0xff]  }
 0x53c   : > { %2593 = vmatmul.mubr.msk.bf16.vlgmr.msra.gmra.mrb[44].mxu1 %vm1451_vm2, %v1681_v56  ;;  %v2724_v56 = vld [vmem:[%s3356_s16 + $0x20] sm:$0xff]  }
 0x53d   : > { %2603 = vmatpush3.bf16.msra.mxu1 %v3192_v5  ;;  %2604 = vmatprep.mubr.msk.bf16.mxu1 %vm2815_vm0, %v2814_v1 }
 0x53e   : > { %2616 = vmatprep.subr.bf16.mxu1 %v2814_v1 }
 0x540   : > { %v1668_v57 = vpop.xlane.xlu0 %1667 }
 0x541   : > { %2742 = vrcp.f32 %v1668_v57  ;;  %v2725_v57 = vld [vmem:[%s3356_s16 + $0x28] sm:$0xff]  }
 0x542   : > { %v1671_v58 = vpop.xlane.xlu1 %1670 }
 0x543   : > { %2744 = vrcp.f32 %v1671_v58  ;;  %v2726_v58 = vld [vmem:[%s3356_s16 + $0x30] sm:$0xff]  }
 0x54b   : > { %v2743_v37 = vpop.eup %2742 }
 0x54c   : > { %v1678_v59 = vmul.f32 %v2743_v37, %v2735_v45  ;;  %v2727_v37 = vld [vmem:[%s3356_s16 + $0x38] sm:$0xff]  }
 0x54d   : > { %v2745_v60 = vpop.eup %2744 }
 0x54e   : > { %v1679_v62 = vmul.f32 %v2745_v60, %v2737_v47  ;;  %v1682_v63 = vpack.c.bf16 %v1678_v59, %v1678_v59  ;;  %v2358_v59 = vld [vmem:[%s3355_s15] ss:$0 sm:$0xff] }
 0x550   : > { %2599 = vmatmul.mubr.msk.bf16.vlgmr.msra.gmra.mrb[32].mxu0 %vm1451_vm2, %v1682_v63  ;;  %v1683_v0 = vpack.c.bf16 %v1679_v62, %v1679_v62 }
 0x551   : > { %2612 = vmatprep.mubr.msk.bf16.mxu0 %vm2815_vm0, %v2814_v1  ;;  %2609 = vmatpush3.bf16.msra.mxu0 %v2716_v9 }
 0x552   : > { %2605 = vmatmul.mubr.msk.bf16.vlgmr.msra.gmra.mrb[48].mxu1 %vm1451_vm2, %v1683_v0  ;;  %2610 = vmatprep.subr.bf16.mxu0 %v2814_v1 }
 0x553   : > { %2620 = vmatprep.mubr.msk.bf16.mxu1 %vm2815_vm0, %v2814_v1 }
 0x555   : > { %2611 = vmatpush3.bf16.msra.mxu0 %v2717_v10 }
 0x556   : > { %2624 = vmatprep.subr.bf16.mxu0 %v2814_v1 }
 0x60b   : > { %v1725_v61 = vpop.f32.mrb[28].mxu0 }
 0x60c   : > { %v2588_v2 = vpop.f32.mrb[29].mxu0 }
 0x60d   : > { %v1728_v3 = vpop.f32.mrb[30].mxu0 }
 0x60e   : > { %v2589_v4 = vpop.f32.mrb[31].mxu0 }
 0x60f   : > { %v1771_v5 = vpop.f32.mrb[44].mxu1 }
 0x610   : > { %1870 = vrot.lane.b32.xlu0 %v1771_v5, %s2816_s19  ;;  %v2594_v6 = vpop.f32.mrb[45].mxu1  ;;  %s2185_s19 = sshll.u32 %s579_s26, 4  ;;  %s3299_s19 = int_to_ptr.vmem [resolvable:$true] %s2185_s19 }
 0x611   : > { %v1774_v7 = vpop.f32.mrb[46].mxu1  ;;  %p2757_p0 = scmp.lt.s32.totalorder %s3299_s19, %s2755_s23 }
 0x612   : > { %v2595_v8 = vpop.f32.mrb[47].mxu1 }
 0x613   : > { %v2370_v8 = vld [vmem:[%s3357_s17] ss:$0 sm:$0xff] }
 0x623   : > { %v1817_v11 = vpop.f32.mrb[32].mxu0 }
 0x624   : > { %v2600_v12 = vpop.f32.mrb[33].mxu0  ;;  %1874 = vrot.lane.b32.xlu1 %v1817_v11, %s2817_s30  ;;  %s2750_s30 = scalar_lea.vmem %s3299_s19, 128 }
 0x625   : > { %v1820_v13 = vpop.f32.mrb[34].mxu0  ;;  %v1863_v14 = vpop.f32.mrb[48].mxu1  ;;  %p2751_p11 = scmp.ne.s32.totalorder %s3299_s19, %s2750_s30  ;;  %p2758_p1 = scmp.lt.s32.totalorder %s2756_s21, %s2750_s30 }
 0x626   : > { %v2601_v15 = vpop.f32.mrb[35].mxu0  ;;  %v2606_v16 = vpop.f32.mrb[49].mxu1 }
 0x627   : > { %v1866_v17 = vpop.f32.mrb[50].mxu1  ;;  %p2752_p12 = pnand %p2751_p11, %p2953_p5  ;;  %p2759_p2 = por %p2758_p1, %p2757_p0 }
 0x628   : > { %1878 = vrot.lane.b32.xlu1 %v1863_v14, %s2818_s1  ;;  %v2607_v19 = vpop.f32.mrb[51].mxu1  ;;  %s3390_s1 = smov %s3389_s27 }
 0x629   : > { %p2753_p13 = pneg %p2752_p12 }
 0x62b   : > { %p2760_p3 = pnand %p2759_p2, %p2753_p13 }
 0x682   : > { %v1871_v20 = vpop.permute.xlu0 %1870 }
 0x683   : > { %v1881_v22 = vsel %vm1451_vm2, %v1725_v61, %v1871_v20 }
 0x696   : > { %v1875_v21 = vpop.permute.xlu1 %1874 }
 0x697   : > { %v1883_v23 = vsel %vm1882_vm4, %v1881_v22, %v1875_v21 }
 0x69a   : > { %v1879_v24 = vpop.permute.xlu1 %1878 }
 0x69b   : > { %v1885_v25 = vsel %vm1884_vm5, %v1883_v23, %v1879_v24 }
 0x69c   : > { %v1886_v26 = vpack.c.bf16 %v1885_v25, %v1885_v25 }
 0x69e   : > { %2613 = vmatmul.mubr.msk.bf16.vlgmr.msra.gmra.mrb[36].mxu0 %vm613_vm1, %v1886_v26 }
 0x69f   : > { %2640 = vmatprep.mubr.msk.bf16.mxu0 %vm2815_vm0, %v2814_v1  ;;  %2625 = vmatpush3.bf16.msra.mxu0 %v2720_v42 }
 0x6a0   : > { %2626 = vmatprep.subr.bf16.mxu0 %v2814_v1 }
 0x6a3   : > { %2627 = vmatpush3.bf16.msra.mxu0 %v2721_v43 }
 0x6a4   : > { %2628 = vmatprep.subr.bf16.mxu0 %v2814_v1 }
 0x6a7   : > { %2629 = vmatpush3.bf16.msra.mxu0 %v2722_v44 }
 0x6a8   : > { %2630 = vmatprep.subr.bf16.mxu0 %v2814_v1 }
 0x6ab   : > { %2631 = vmatpush3.bf16.msra.mxu0 %v2723_v55 }
 0x6ac   : > { %2632 = vmatprep.subr.bf16.mxu0 %v2814_v1 }
 0x6af   : > { %2633 = vmatpush3.bf16.msra.mxu0 %v2724_v56 }
 0x6b0   : > { %2634 = vmatprep.subr.bf16.mxu0 %v2814_v1 }
 0x6b3   : > { %2635 = vmatpush3.bf16.msra.mxu0 %v2725_v57 }
 0x6b4   : > { %2636 = vmatprep.subr.bf16.mxu0 %v2814_v1 }
 0x6b7   : > { %2637 = vmatpush3.bf16.msra.mxu0 %v2726_v58 }
 0x6b8   : > { %2638 = vmatprep.subr.bf16.mxu0 %v2814_v1 }
 0x6bb   : > { %2639 = vmatpush3.bf16.msra.mxu0 %v2727_v37 }
 0x771   : > { %v1940_v27 = vpop.f32.mrb[36].mxu0 }
 0x772   : > { %v1946_v29 = vadd.f32 %v1940_v27, %v3002_v18  ;;  %v2614_v30 = vpop.f32.mrb[37].mxu0  ;;  %v2718_v18 = vld [vmem:[%s3354_s14] sm:$0xff]  }
 0x773   : > { %v1943_v31 = vpop.f32.mrb[38].mxu0  ;;  %2617 = vmatpush3.bf16.msra.mxu1 %v2718_v18 }
 0x774   : > { %v3234_v32 = vadd.f32 %v2355_v28, %v1946_v29  ;;  %v2615_v33 = vpop.f32.mrb[39].mxu0  ;;  %2618 = vmatprep.subr.bf16.mxu1 %v2814_v1 }
 0x776   : > { %v1957_v34 = vsel %vm613_vm1, %v3234_v32, 0.0 }
 0x777   : > { %1958 = vadd.xlane.f32.xlu1 %v1957_v34  ;;  %2619 = vmatpush3.bf16.msra.mxu1 %v2719_v41 }
 0x804   : > { %v1959_v35 = vpop.xlane.xlu1 %1958 }
 0x805   : > { %v1960_v36 = vmul.f32 0.03125, %v1959_v35 }
 0x807   : > { %v1961_v38 = vsub.f32 %v3234_v32, %v1960_v36 }
 0x809   : > { %v1962_v39 = vmul.f32 %v1961_v38, %v1961_v38 }
 0x80b   : > { %v1963_v40 = vsel %vm613_vm1, %v1962_v39, 0.0 }
 0x80c   : > { %1964 = vadd.xlane.f32.xlu0 %v1963_v40 }
 0x899   : > { %v1965_v45 = vpop.xlane.xlu0 %1964 }
 0x89a   : > { %v1966_v46 = vmul.f32 0.03125, %v1965_v45 }
 0x89c   : > { %v1967_v47 = vadd.f32 1e-05, %v1966_v46 }
 0x89e   : > { %2746 = vrsqrt.f32 %v1967_v47 }
 0x8a8   : > { %v2747_v48 = vpop.eup %2746 }
 0x8a9   : > { %v1969_v50 = vmul.f32 %v2747_v48, %v1961_v38 }
 0x8ab   : > { %v1976_v52 = vmul.f32 %v2356_v49, %v1969_v50 }
 0x8ad   : > { %v1983_v53 = vadd.f32 %v2357_v51, %v1976_v52 }
 0x8af   : > { %v1984_v54 = vpack.c.bf16 %v1983_v53, %v1983_v53 }
 0x8b1   : > { %2621 = vmatmul.mubr.msk.bf16.vlgmr.msra.gmra.mrb[52].mxu1 %vm613_vm1, %v1984_v54 }
 0x984   : > { %v2045_v60 = vpop.f32.mrb[52].mxu1 }
 0x985   : > { %v2046_v62 = vadd.f32 %v2358_v59, %v2045_v60  ;;  %v2622_v63 = vpop.f32.mrb[53].mxu1 }
 0x986   : > { %v2048_v0 = vpop.f32.mrb[54].mxu1 }
 0x987   : > { %v2052_v61 = vmul.f32 0.70710677, %v2046_v62  ;;  %v2623_v2 = vpop.f32.mrb[55].mxu1  ;;  %v2051_v1 = vmul.f32 0.5, %v2046_v62 }
 0x989   : > { %2748 = verf.f32 %v2052_v61 }
 0x993   : > { %v2749_v3 = vpop.eup %2748 }
 0x994   : > { %v2054_v4 = vadd.f32 1.0, %v2749_v3 }
 0x996   : > { %v2055_v5 = vmul.f32 %v2054_v4, %v2051_v1 }
 0x998   : > { %v2056_v6 = vpack.c.bf16 %v2055_v5, %v2055_v5 }
 0x99a   : > { %2641 = vmatmul.mubr.bf16.vlgmr.msra.gmra.mrb[40].mxu0 %v2056_v6 }
 0xa6d   : > { %v2155_v7 = vpop.f32.mrb[40].mxu0 }
 0xa6e   : > { %v2161_v9 = vadd.f32 %v2155_v7, %v3234_v32  ;;  %v2642_v10 = vpop.f32.mrb[41].mxu0 }
 0xa6f   : > { %v2158_v11 = vpop.f32.mrb[42].mxu0 }
 0xa70   : > { %v2169_v12 = vadd.f32 %v2370_v8, %v2161_v9  ;;  %v2643_v13 = vpop.f32.mrb[43].mxu0 }
 0xa72   : > { %2170 = vst.msk [vmem:[%s579_s26] sm:$0xff] %vm613_vm1, %v2169_v12 }
 0xa73   : > { %2763 = shalt.err (!%p2760_p3)
}
 0xa74   : > { %s2764_s22 = scalar_lea.hbm %s3297_s29, 128  ;;  %s2768_s20 = scalar_lea.hbm %s3390_s1, 256 }
 0xa75   : > { %p2765_p4 = scmp.ne.s32.totalorder %s3297_s29, %s2764_s22  ;;  %p2769_p9 = scmp.lt.u32.totalorder %s3297_s29, %s3390_s1 }
 0xa76   : > { %p2770_p10 = scmp.lt.u32.totalorder %s2768_s20, %s2764_s22  ;;  %p2772_p12 = scmp.lt.u32.totalorder %s2764_s22, %s3297_s29 }
 0xa77   : > { %p2766_p7 = pnand %p2765_p4, %p2953_p5 }
 0xa78   : > { %p2771_p11 = por %p2770_p10, %p2769_p9 }
 0xa79   : > { %p2767_p8 = pneg %p2766_p7 }
 0xa7a   : > { %p2773_p13 = por %p2772_p12, %p2771_p11 }
 0xa7c   : > { %p2774_p0 = pnand %p2773_p13, %p2767_p8 }
 0xa7e   : > { %2777 = shalt.err (!%p2774_p0)
}
 0xa7f   : > { %2644 = dma.vmem_to_hbm [thread:$0]  (%p2953_p5), %s3299_s19, 128, %s3297_s29, %s2172_s0  }
 0xa80 PF: > { %s3391_s30 = sld [smem:[#allocation7_spill]]  ;;  %s3392_s2 = sld [smem:[#allocation5_spill]] }
 0xa86   : > { %p2650_p1 = scmp.ge.s32.totalorder %s3391_s30, 2  ;;  %s2197_s21 = sand.u32 1, %s3392_s2  }
 0xa87   : > { %s2198_s25 = scalar_lea.sflag [#allocation3], %s2197_s21 }
 0xa88   : > { %p2647_p2 = pnand %p2650_p1, %p2957_p6 }
 0xa8a   : > { %2795 = dma.done.wait (!%p2647_p2), %s2198_s25, 128  }
 0xa8b   : > { %2797 = vsyncadd (!%p2647_p2), %s2198_s25, 4294967168  ;;  %s3394_s30 = sld [smem:[#allocation8_spill]]  ;;  %s3395_s22 = sld [smem:[#allocation6_spill]] }
 0xa8c   : > { %s3396_s29 = sld [smem:[#allocation9_spill]]  ;;  %s3397_s27 = smov %s2804_s28 }
 0xa91   : > { %p28_p3 = scmp.ge.s32.totalorder %s3394_s30, 4   ;;  %s3398_s28 = smov %s3395_s22 }
 0xa93   :  { %30 = sbr.rel (!%p28_p3) target bundleno = 9 (0x9), region = 139 }
 0xa9a   :  { %2203 = vsyncpa [#allocation3], 1 }
 0xa9b   :  { %2205 = vsyncpa [#allocation3 + $0x1], 1 }

// kernel: tpu_custom_call.1
= control target key start
LH: loop header
LB: loop body
LE: loop exit
PB: predicated region body
PF: predicated region fallthrough
CT: control target
= control target key end

     0   :  { %s3340_s0 = inlined_call_operand.vmem [shape: f32[2,8,32], index: 0, kind: input, shape index: {}]   ;;  %s3341_s1 = inlined_call_operand.vmem [shape: f32[2,8,32], index: 1, kind: input, shape index: {}]   ;;  %s3342_s2 = inlined_call_operand.vmem [shape: bf16[32,32], index: 2, kind: input, shape index: {}]   ;;  %s3343_s3 = inlined_call_operand.vmem [shape: bf16[32,32], index: 3, kind: input, shape index: {}]   ;;  %s3344_s4 = inlined_call_operand.vmem [shape: f32[1,32], index: 4, kind: input, shape index: {}]   ;;  %s3345_s5 = inlined_call_operand.vmem [shape: f32[1,32], index: 5, kind: input, shape index: {}]   ;;  %s3346_s6 = inlined_call_operand.vmem [shape: f32[1,32], index: 6, kind: input, shape index: {}]   ;;  %s3347_s7 = inlined_call_operand.vmem [shape: bf16[4,32,8], index: 7, kind: input, shape index: {}]   ;;  %s3348_s8 = inlined_call_operand.vmem [shape: bf16[4,32,8], index: 8, kind: input, shape index: {}]   ;;  %s3349_s9 = inlined_call_operand.vmem [shape: bf16[4,32,8], index: 9, kind: input, shape index: {}]   ;;  %s3350_s10 = inlined_call_operand.vmem [shape: bf16[32,32], index: 10, kind: input, shape index: {}]   ;;  %s3351_s11 = inlined_call_operand.vmem [shape: f32[1,32], index: 11, kind: input, shape index: {}]   ;;  %s3352_s12 = inlined_call_operand.vmem [shape: f32[1,32], index: 12, kind: input, shape index: {}]   ;;  %s3353_s13 = inlined_call_operand.vmem [shape: f32[1,32], index: 13, kind: input, shape index: {}]   ;;  %s3354_s14 = inlined_call_operand.vmem [shape: bf16[32,128], index: 14, kind: input, shape index: {}]   ;;  %s3355_s15 = inlined_call_operand.vmem [shape: f32[1,128], index: 15, kind: input, shape index: {}]   ;;  %s3356_s16 = inlined_call_operand.vmem [shape: bf16[128,32], index: 16, kind: input, shape index: {}]   ;;  %s3357_s17 = inlined_call_operand.vmem [shape: f32[1,32], index: 17, kind: input, shape index: {}]   ;;  %s3358_s18 = inlined_call_operand.hbm [shape: f32[2,8,32], index: 18, kind: output, shape index: {}]  }
   0x1   :  { %3369 = sst [smem:[#allocation12_spill]] %s3340_s0 }
   0x2   :  { %3370 = sst [smem:[#allocation13_spill]] %s3341_s1 }
   0x3   :  { %3371 = sst [smem:[#allocation14_spill]] %s3342_s2 }
   0x4   :  { %3372 = sst [smem:[#allocation15_spill]] %s3343_s3 }
   0x5   :  { %3373 = sst [smem:[#allocation16_spill]] %s3358_s18 }
   0x6   :  { %23 = vsyncpa [#allocation3], 0 }
   0x7   :  { %25 = vsyncpa [#allocation3 + $0x1], 0  ;;  %s2915_s27 = smov 0   ;;  %s2917_s28 = smov 0  }
   0x8   :  { %s2919_s29 = smov 0   ;;  %s2921_s30 = smov 0  }
   0x9 LB: > { %3374 = sst [smem:[#allocation5_spill]] %s2800_s27  ;;  %s2936_s0 = sadd.s32 4294967295, %s2812_s30   ;;  %s2812_s30 = sphi %s2921_s30, %s3394_s30   ;;  %s2808_s29 = sphi %s2919_s29, %s3396_s29   ;;  %s2804_s28 = sphi %s2917_s28, %s3398_s28   ;;  %s2800_s27 = sphi %s2915_s27, %s3397_s27  }
   0xa   : > { %3375 = sst [smem:[#allocation6_spill]] %s2808_s29  ;;  %s2256_s19 = sadd.s32 4294967294, %s2812_s30  }
   0xb   : > { %3376 = sst [smem:[#allocation7_spill]] %s2812_s30  ;;  %s2940_s1 = sadd.s32 1, %s2812_s30  }
   0xc   : > { %3377 = sst [smem:[#allocation8_spill]] %s2940_s1  ;;  %s426_s20 = sadd.s32 1, %s2808_s29 }
   0xd   : > { %s423_s21 = ssub.s32 %s2812_s30, %s2940_s1  ;;  %p436_p0 = scmp.ne.s32.totalorder %s2808_s29, %s2804_s28 }
   0xe   : > { %p424_p1 = scmp.eq.s32.totalorder %s423_s21, 0  ;;  %p437_p2 = scmp.eq.s32.totalorder %s2936_s0, 1 }
   0xf   : > { %p442_p3 = scmp.ne.s32.totalorder %s2804_s28, %s2800_s27  ;;  %p443_p4 = scmp.eq.s32.totalorder %s2256_s19, 1 }
  0x10   : > { %s2951_s22 = scalar_select %p424_p1, %s2808_s29, %s426_s20  }
  0x11   : > { %p2953_p5 = por %p437_p2, %p436_p0  ;;  %p2957_p6 = por %p443_p4, %p442_p3 }
  0x12   : > { %3378 = sst [smem:[#allocation9_spill]] %s2951_s22  ;;  %p2259_p7 = scmp.ge.s32.totalorder %s2812_s30, 1 }
  0x13   : > { %s3379_s2 = scalar_select %p2953_p5, 1, 0 }
  0x14   : > { %s3381_s23 = scalar_select %p2957_p6, 1, 0 }
  0x15   : > { %3380 = sst [smem:[#allocation10_spill]] %s3379_s2  ;;  %p523_p8 = scmp.lt.s32.totalorder %s2812_s30, 3 }
  0x16   : > { %3382 = sst [smem:[#allocation11_spill]] %s3381_s23 }
  0x17   : > { %p524_p9 = pnand %p2259_p7, %p523_p8 }
  0x18   : > { %s3383_s3 = sld [smem:[#allocation15_spill]] (!%p524_p9)  ;;  %v2814_v1 = vmov (!%p524_p9), 0.0   ;;  %vm2815_vm0 = vmmov (!%p524_p9), 0   ;;  %p580_p10 = scmp.lt.s32.totalorder (!%p524_p9), %s2936_s0, 1  ;;  %vm613_vm1 = vcmask (!%p524_p9), 261120   ;;  %v2692_v26 = vld [vmem:[%s3347_s7] sm:$0xff] (!%p524_p9)  }
  0x19   : > { %527 = sbr.rel (%p524_p9) target bundleno = 2688 (0xa80), region = 92  ;;  %2448 = vmatprep.subr.bf16.mxu1 (!%p524_p9), %v2814_v1  ;;  %2480 = vmatprep.subr.bf16.mxu0 (!%p524_p9), %v2814_v1  ;;  %s3384_s22 = sld [smem:[#allocation12_spill]] (!%p524_p9)  ;;  %v2269_v14 = vld [vmem:[%s3344_s4] ss:$0 sm:$0xff] (!%p524_p9)  ;;  %v2694_v28 = vld [vmem:[%s3347_s7 + $0x8] sm:$0xff] (!%p524_p9)   ;;  %v2697_v40 = vld [vmem:[%s3348_s8 + $0x10] sm:$0xff] (!%p524_p9)  }
  0x1a   : > { %2452 = vmatprep.mubr.msk.bf16.mxu1 (!%p524_p9), %vm2815_vm0, %v2814_v1  ;;  %2484 = vmatprep.mubr.msk.bf16.mxu0 (!%p524_p9), %vm2815_vm0, %v2814_v1  ;;  %s3385_s19 = sld [smem:[#allocation13_spill]] (!%p524_p9)  ;;  %s3386_s30 = sld [smem:[#allocation14_spill]] (!%p524_p9)  ;;  %v2693_v27 = vld [vmem:[%s3349_s9] sm:$0xff] (!%p524_p9)   ;;  %v2695_v29 = vld [vmem:[%s3349_s9 + $0x8] sm:$0xff] (!%p524_p9)   ;;  %v2699_v43 = vld [vmem:[%s3348_s8 + $0x18] sm:$0xff] (!%p524_p9)   ;;  %vm1451_vm2 = vcmask (!%p524_p9), 64512  }
  0x1b   : > { %2481 = vmatpush3.bf16.msra.mxu0 (!%p524_p9), %v2693_v27  ;;  %v2270_v34 = vld [vmem:[%s3345_s5] ss:$0 sm:$0xff] (!%p524_p9)  ;;  %v2698_v42 = vld [vmem:[%s3348_s8 + $0x8] sm:$0xff] (!%p524_p9)   ;;  %v2700_v44 = vld [vmem:[%s3347_s7 + $0x10] sm:$0xff] (!%p524_p9)   ;;  %vm1687_vm3 = vcmask (!%p524_p9), 1043456   ;;  %s2818_s1 = smov (!%p524_p9), 24  }
  0x1c   : > { %2482 = vmatprep.subr.bf16.mxu0 (!%p524_p9), %v2814_v1  ;;  %v2271_v36 = vld [vmem:[%s3346_s6] ss:$0 sm:$0xff] (!%p524_p9)  ;;  %v2702_v46 = vld [vmem:[%s3347_s7 + $0x18] sm:$0xff] (!%p524_p9)   ;;  %v2703_v47 = vld [vmem:[%s3347_s7 + $0x28] sm:$0xff] (!%p524_p9)   ;;  %vm1882_vm4 = vcmask (!%p524_p9), 130048   ;;  %vm1884_vm5 = vcmask (!%p524_p9), 195584  }
  0x1d   : > { %v2696_v39 = vld [vmem:[%s3348_s8] sm:$0xff] (!%p524_p9)   ;;  %v2704_v48 = vld [vmem:[%s3349_s9 + $0x10] sm:$0xff] (!%p524_p9)   ;;  %v2706_v50 = vld [vmem:[%s3349_s9 + $0x18] sm:$0xff] (!%p524_p9)   ;;  %s2372_s25 = sshll.u32 (!%p524_p9), %s2936_s0, 7  ;;  %s3389_s27 = sld [smem:[#allocation16_spill]] (!%p524_p9) }
  0x1e   : > { %v2688_v0 = vld [vmem:[%s3383_s3] sm:$0xff] (!%p524_p9)   ;;  %v2689_v2 = vld [vmem:[%s3383_s3 + $0x8] sm:$0xff] (!%p524_p9)   ;;  %v2709_v53 = vld [vmem:[%s3348_s8 + $0x30] sm:$0xff] (!%p524_p9)  }
  0x1f   : > { %2449 = vmatpush3.bf16.msra.mxu1 (!%p524_p9), %v2688_v0  ;;  %2483 = vmatpush3.bf16.msra.mxu0 (!%p524_p9), %v2695_v29  ;;  %v2701_v45 = vld [vmem:[%s3347_s7 + $0x20] sm:$0xff] (!%p524_p9)   ;;  %v2707_v51 = vld [vmem:[%s3349_s9 + $0x28] sm:$0xff] (!%p524_p9)   ;;  %v2711_v55 = vld [vmem:[%s3348_s8 + $0x38] sm:$0xff] (!%p524_p9)  }
  0x20   : > { %2450 = vmatprep.subr.bf16.mxu1 %v2814_v1  ;;  %s581_s20 = scalar_select %p580_p10, %s2936_s0, 1  ;;  %v2690_v4 = vld [vmem:[%s3386_s30] sm:$0xff]   ;;  %2496 = vmatprep.subr.bf16.mxu0 %v2814_v1  ;;  %v2710_v54 = vld [vmem:[%s3348_s8 + $0x28] sm:$0xff]   ;;  %v2712_v56 = vld [vmem:[%s3347_s7 + $0x30] sm:$0xff]  }
  0x21   : > { %s3387_s18 = smov %s3386_s30  ;;  %v2705_v49 = vld [vmem:[%s3349_s9 + $0x20] sm:$0xff]   ;;  %v2713_v57 = vld [vmem:[%s3347_s7 + $0x38] sm:$0xff]   ;;  %v2714_v58 = vld [vmem:[%s3349_s9 + $0x30] sm:$0xff]   ;;  %s2817_s30 = smov 16  }
  0x22   : > { %s2261_s21 = sshll.u32 %s581_s20, 3  ;;  %v2691_v7 = vld [vmem:[%s3387_s18 + $0x8] sm:$0xff]   ;;  %v2708_v52 = vld [vmem:[%s3348_s8 + $0x20] sm:$0xff]   ;;  %v2715_v59 = vld [vmem:[%s3349_s9 + $0x38] sm:$0xff]  }
  0x23   : > { %2451 = vmatpush3.bf16.msra.mxu1 %v2689_v2  ;;  %s583_s29 = scalar_lea.vmem %s3384_s22, %s2261_s21  ;;  %s587_s3 = scalar_lea.vmem %s3385_s19, %s2261_s21 }
  0x24   : > { %2456 = vmatprep.subr.bf16.mxu1 %v2814_v1  ;;  %v591_v3 = vld [vmem:[%s587_s3] sm:$0xff]  ;;  %s2816_s19 = smov 8   ;;  %s577_s22 = sand.u32 1, %s2804_s28  }
  0x25   : > { %v592_v5 = vpack.c.bf16 %v591_v3, %v591_v3  ;;  %v589_v6 = vld [vmem:[%s583_s29] sm:$0xff]  ;;  %s2260_s2 = sshll.u32 %s577_s22, 3  ;;  %s3297_s29 = scalar_lea.hbm %s3389_s27, %s2372_s25 }
  0x26   : > { %v590_v8 = vpack.c.bf16 %v589_v6, %v589_v6  ;;  %s579_s26 = scalar_lea.vmem [#allocation2], %s2260_s2  ;;  %s2172_s0 = scalar_lea.sflag [#allocation3], %s577_s22 }
  0x27   : > { %2453 = vmatmul.mubr.msk.bf16.vlgmr.msra.gmra.mrb[0].mxu1 %vm613_vm1, %v592_v5  ;;  %s2819_s2 = smov [#allocation2]  }
  0x28   : > { %2457 = vmatpush3.bf16.msra.mxu1 %v2690_v4  ;;  %2460 = vmatprep.mubr.msk.bf16.mxu1 %vm2815_vm0, %v2814_v1  ;;  %s2754_s23 = sshll.u32 %s2819_s2, 4  ;;  %s2755_s23 = int_to_ptr.vmem [resolvable:$false] %s2754_s23 }
  0x29   : > { %2458 = vmatprep.subr.bf16.mxu1 %v2814_v1  ;;  %s2756_s21 = scalar_lea.vmem %s2755_s23, 256 }
  0x2c   : > { %2459 = vmatpush3.bf16.msra.mxu1 %v2691_v7 }
  0x2d   : > { %2464 = vmatprep.subr.bf16.mxu1 %v2814_v1 }
  0x2f   : > { %2461 = vmatmul.mubr.msk.bf16.vlgmr.msra.gmra.mrb[4].mxu1 %vm613_vm1, %v590_v8 }
  0x30   : > { %2468 = vmatprep.mubr.msk.bf16.mxu1 %vm2815_vm0, %v2814_v1  ;;  %2465 = vmatpush3.bf16.msra.mxu1 %v2692_v26 }
  0x31   : > { %2466 = vmatprep.subr.bf16.mxu1 %v2814_v1 }
  0x34   : > { %2467 = vmatpush3.bf16.msra.mxu1 %v2694_v28 }
  0x35   : > { %2472 = vmatprep.subr.bf16.mxu1 %v2814_v1 }
  0xfa   : > { %v651_v9 = vpop.f32.mrb[0].mxu1 }
  0xfb   : > { %v2454_v10 = vpop.f32.mrb[1].mxu1 }
  0xfc   : > { %v654_v11 = vpop.f32.mrb[2].mxu1 }
  0xfd   : > { %v2455_v12 = vpop.f32.mrb[3].mxu1 }
 0x102   : > { %v706_v13 = vpop.f32.mrb[4].mxu1 }
 0x103   : > { %v707_v15 = vadd.f32 %v706_v13, %v651_v9  ;;  %v2462_v16 = vpop.f32.mrb[5].mxu1 }
 0x104   : > { %v709_v17 = vpop.f32.mrb[6].mxu1 }
 0x105   : > { %v3002_v18 = vadd.f32 %v2269_v14, %v707_v15  ;;  %v2463_v19 = vpop.f32.mrb[7].mxu1 }
 0x107   : > { %v722_v20 = vsel %vm613_vm1, %v3002_v18, 0.0 }
 0x108   : > { %723 = vadd.xlane.f32.xlu0 %v722_v20 }
 0x195   : > { %v724_v21 = vpop.xlane.xlu0 %723 }
 0x196   : > { %v726_v22 = vmul.f32 0.03125, %v724_v21 }
 0x198   : > { %v727_v23 = vsub.f32 %v3002_v18, %v726_v22 }
 0x19a   : > { %v728_v24 = vmul.f32 %v727_v23, %v727_v23 }
 0x19c   : > { %v729_v25 = vsel %vm613_vm1, %v728_v24, 0.0 }
 0x19d   : > { %730 = vadd.xlane.f32.xlu0 %v729_v25 }
 0x22a   : > { %v731_v30 = vpop.xlane.xlu0 %730 }
 0x22b   : > { %v732_v31 = vmul.f32 0.03125, %v731_v30 }
 0x22d   : > { %v733_v32 = vadd.f32 1e-05, %v732_v31 }
 0x22f   : > { %2728 = vrsqrt.f32 %v733_v32 }
 0x239   : > { %v2729_v33 = vpop.eup %2728 }
 0x23a   : > { %v735_v35 = vmul.f32 %v2729_v33, %v727_v23 }
 0x23c   : > { %v742_v37 = vmul.f32 %v2270_v34, %v735_v35 }
 0x23e   : > { %v749_v38 = vadd.f32 %v2271_v36, %v742_v37 }
 0x240   : > { %v3036_v41 = vpack.c.bf16 %v749_v38, %v749_v38 }
 0x242   : > { %2469 = vmatmul.mubr.msk.bf16.vlgmr.msra.gmra.mrb[8].mxu1 %vm613_vm1, %v3036_v41  ;;  %2485 = vmatmul.mubr.msk.bf16.vlgmr.msra.gmra.mrb[0].mxu0 %vm613_vm1, %v3036_v41 }
 0x243   : > { %2473 = vmatpush3.bf16.msra.mxu1 %v2696_v39  ;;  %2497 = vmatpush3.bf16.msra.mxu0 %v2697_v40 }
 0x244   : > { %2474 = vmatprep.subr.bf16.mxu1 %v2814_v1  ;;  %2498 = vmatprep.subr.bf16.mxu0 %v2814_v1 }
 0x245   : > { %2476 = vmatprep.mubr.msk.bf16.mxu1 %vm2815_vm0, %v2814_v1  ;;  %2500 = vmatprep.mubr.msk.bf16.mxu0 %vm2815_vm0, %v2814_v1 }
 0x247   : > { %2475 = vmatpush3.bf16.msra.mxu1 %v2698_v42  ;;  %2499 = vmatpush3.bf16.msra.mxu0 %v2699_v43 }
 0x248   : > { %2488 = vmatprep.subr.bf16.mxu1 %v2814_v1  ;;  %2512 = vmatprep.subr.bf16.mxu0 %v2814_v1 }
 0x24a   : > { %2477 = vmatmul.mubr.msk.bf16.vlgmr.msra.gmra.mrb[12].mxu1 %vm613_vm1, %v3036_v41  ;;  %2501 = vmatmul.mubr.msk.bf16.vlgmr.msra.gmra.mrb[4].mxu0 %vm613_vm1, %v3036_v41 }
 0x24b   : > { %2489 = vmatpush3.bf16.msra.mxu1 %v2700_v44  ;;  %2513 = vmatpush3.bf16.msra.mxu0 %v2701_v45 }
 0x24c   : > { %2490 = vmatprep.subr.bf16.mxu1 %v2814_v1  ;;  %2514 = vmatprep.subr.bf16.mxu0 %v2814_v1 }
 0x24d   : > { %2492 = vmatprep.mubr.msk.bf16.mxu1 %vm2815_vm0, %v2814_v1  ;;  %2516 = vmatprep.mubr.msk.bf16.mxu0 %vm2815_vm0, %v2814_v1 }
 0x24f   : > { %2491 = vmatpush3.bf16.msra.mxu1 %v2702_v46  ;;  %2515 = vmatpush3.bf16.msra.mxu0 %v2703_v47 }
 0x250   : > { %2504 = vmatprep.subr.bf16.mxu1 %v2814_v1  ;;  %2528 = vmatprep.subr.bf16.mxu0 %v2814_v1 }
 0x252   : > { %2493 = vmatmul.mubr.msk.bf16.vlgmr.msra.gmra.mrb[16].mxu1 %vm613_vm1, %v3036_v41  ;;  %2517 = vmatmul.mubr.msk.bf16.vlgmr.msra.gmra.mrb[8].mxu0 %vm613_vm1, %v3036_v41 }
 0x253   : > { %2505 = vmatpush3.bf16.msra.mxu1 %v2704_v48  ;;  %2529 = vmatpush3.bf16.msra.mxu0 %v2705_v49 }
 0x254   : > { %2506 = vmatprep.subr.bf16.mxu1 %v2814_v1  ;;  %2530 = vmatprep.subr.bf16.mxu0 %v2814_v1 }
 0x255   : > { %2508 = vmatprep.mubr.msk.bf16.mxu1 %vm2815_vm0, %v2814_v1  ;;  %2532 = vmatprep.mubr.msk.bf16.mxu0 %vm2815_vm0, %v2814_v1 }
 0x257   : > { %2507 = vmatpush3.bf16.msra.mxu1 %v2706_v50  ;;  %2531 = vmatpush3.bf16.msra.mxu0 %v2707_v51 }
 0x258   : > { %2520 = vmatprep.subr.bf16.mxu1 %v2814_v1  ;;  %2544 = vmatprep.subr.bf16.mxu0 %v2814_v1 }
 0x25a   : > { %2509 = vmatmul.mubr.msk.bf16.vlgmr.msra.gmra.mrb[20].mxu1 %vm613_vm1, %v3036_v41  ;;  %2533 = vmatmul.mubr.msk.bf16.vlgmr.msra.gmra.mrb[12].mxu0 %vm613_vm1, %v3036_v41 }
 0x25b   : > { %2521 = vmatpush3.bf16.msra.mxu1 %v2708_v52  ;;  %2545 = vmatpush3.bf16.msra.mxu0 %v2709_v53 }
 0x25c   : > { %2522 = vmatprep.subr.bf16.mxu1 %v2814_v1  ;;  %2546 = vmatprep.subr.bf16.mxu0 %v2814_v1 }
 0x25d   : > { %2524 = vmatprep.mubr.msk.bf16.mxu1 %vm2815_vm0, %v2814_v1  ;;  %2548 = vmatprep.mubr.msk.bf16.mxu0 %vm2815_vm0, %v2814_v1 }
 0x25f   : > { %2523 = vmatpush3.bf16.msra.mxu1 %v2710_v54  ;;  %2547 = vmatpush3.bf16.msra.mxu0 %v2711_v55 }
 0x260   : > { %2536 = vmatprep.subr.bf16.mxu1 %v2814_v1  ;;  %2560 = vmatprep.subr.bf16.mxu0 %v2814_v1 }
 0x262   : > { %2525 = vmatmul.mubr.msk.bf16.vlgmr.msra.gmra.mrb[24].mxu1 %vm613_vm1, %v3036_v41  ;;  %2549 = vmatmul.mubr.msk.bf16.vlgmr.msra.gmra.mrb[16].mxu0 %vm613_vm1, %v3036_v41 }
 0x263   : > { %2537 = vmatpush3.bf16.msra.mxu1 %v2712_v56  ;;  %2540 = vmatprep.mubr.msk.bf16.mxu1 %vm2815_vm0, %v2814_v1 }
 0x264   : > { %2538 = vmatprep.subr.bf16.mxu1 %v2814_v1  ;;  %2562 = vmatprep.mubr.msk.bf16.mxu0 %vm2815_vm0, %v2814_v1 }
 0x267   : > { %2539 = vmatpush3.bf16.msra.mxu1 %v2713_v57 }
 0x268   : > { %2552 = vmatprep.subr.bf16.mxu1 %v2814_v1 }
 0x26a   : > { %2541 = vmatmul.mubr.msk.bf16.vlgmr.msra.gmra.mrb[28].mxu1 %vm613_vm1, %v3036_v41 }
 0x26b   : > { %2553 = vmatpush3.bf16.msra.mxu1 %v2714_v58  ;;  %2556 = vmatprep.mubr.msk.bf16.mxu1 %vm2815_vm0, %v2814_v1 }
 0x26c   : > { %2554 = vmatprep.subr.bf16.mxu1 %v2814_v1 }
 0x26f   : > { %2555 = vmatpush3.bf16.msra.mxu1 %v2715_v59 }
 0x270   : > { %2566 = vmatprep.subr.bf16.mxu1 %v2814_v1 }
 0x272   : > { %2557 = vmatmul.mubr.msk.bf16.vlgmr.msra.gmra.mrb[32].mxu1 %vm613_vm1, %v3036_v41 }
 0x273   : > { %2568 = vmatprep.mubr.msk.bf16.mxu1 %vm2815_vm0, %v2814_v1 }
 0x315   : > { %v804_v60 = vpop.f32.mrb[8].mxu1  ;;  %v3160_v61 = vpop.f32.mrb[0].mxu0 }
 0x316   : > { %v2470_v62 = vpop.f32.mrb[9].mxu1  ;;  %v2486_v63 = vpop.f32.mrb[1].mxu0  ;;  %v810_v17 = vmul.f32 0.35355338, %v804_v60  ;;  %v925_v53 = vpack.c.bf16 %v3160_v61, %v3160_v61 }
 0x317   : > { %v807_v0 = vpop.f32.mrb[10].mxu1  ;;  %v922_v2 = vpop.f32.mrb[2].mxu0 }
 0x318   : > { %v2471_v3 = vpop.f32.mrb[11].mxu1  ;;  %v2487_v4 = vpop.f32.mrb[3].mxu0  ;;  %v811_v21 = vpack.c.bf16 %v810_v17, %v810_v17  ;;  %v1689_v60 = vsel %vm1687_vm3, %v925_v53, 0 }
 0x31d   : > { %v862_v5 = vpop.f32.mrb[12].mxu1  ;;  %v1036_v6 = vpop.f32.mrb[4].mxu0 }
 0x31e   : > { %v868_v7 = vpack.c.bf16 %v862_v5, %v862_v5  ;;  %v1042_v8 = vpack.c.bf16 %v1036_v6, %v1036_v6  ;;  %v2478_v9 = vpop.f32.mrb[13].mxu1  ;;  %v2502_v10 = vpop.f32.mrb[5].mxu0 }
 0x31f   : > { %v865_v11 = vpop.f32.mrb[14].mxu1  ;;  %v1039_v12 = vpop.f32.mrb[6].mxu0 }
 0x320   : > { %v1456_v13 = vsel %vm1451_vm2, %v868_v7, 0  ;;  %v1502_v14 = vsel %vm1451_vm2, %v1042_v8, 0  ;;  %v2479_v15 = vpop.f32.mrb[15].mxu1  ;;  %v2503_v16 = vpop.f32.mrb[7].mxu0 }
 0x321   : > { %2561 = vmatpush3.bf16.xpose.msra.mxu0 %v1456_v13  ;;  %2567 = vmatpush3.bf16.xpose.msra.mxu1 %v1502_v14 }
 0x322   : > { %2572 = vmatprep.subr.bf16.mxu0 %v2814_v1  ;;  %2578 = vmatprep.subr.bf16.mxu1 %v2814_v1 }
 0x325   : > { %v977_v19 = vpop.f32.mrb[16].mxu1  ;;  %v1152_v20 = vpop.f32.mrb[8].mxu0 }
 0x326   : > { %v983_v22 = vmul.f32 0.35355338, %v977_v19  ;;  %v2494_v23 = vpop.f32.mrb[17].mxu1  ;;  %v2518_v24 = vpop.f32.mrb[9].mxu0  ;;  %v1158_v52 = vmul.f32 0.35355338, %v1152_v20 }
 0x327   : > { %v980_v25 = vpop.f32.mrb[18].mxu1  ;;  %v1155_v26 = vpop.f32.mrb[10].mxu0 }
 0x328   : > { %v984_v27 = vpack.c.bf16 %v983_v22, %v983_v22  ;;  %v2495_v28 = vpop.f32.mrb[19].mxu1  ;;  %v2519_v29 = vpop.f32.mrb[11].mxu0  ;;  %2563 = vmatmul.mubr.msk.bf16.vlgmr.msra.gmra.mrb[20].mxu0 %vm1451_vm2, %v811_v21  ;;  %v1159_v55 = vpack.c.bf16 %v1158_v52, %v1158_v52 }
 0x329   : > { %2574 = vmatprep.mubr.msk.bf16.mxu0 %vm2815_vm0, %v2814_v1 }
 0x32a   : > { %2569 = vmatmul.mubr.msk.bf16.vlgmr.msra.gmra.mrb[36].mxu1 %vm1451_vm2, %v984_v27 }
 0x32b   : > { %2580 = vmatprep.mubr.msk.bf16.mxu1 %vm2815_vm0, %v2814_v1 }
 0x32d   : > { %v1094_v30 = vpop.f32.mrb[20].mxu1  ;;  %v1269_v31 = vpop.f32.mrb[12].mxu0 }
 0x32e   : > { %v1275_v32 = vpack.c.bf16 %v1269_v31, %v1269_v31  ;;  %v2510_v33 = vpop.f32.mrb[21].mxu1  ;;  %v2534_v34 = vpop.f32.mrb[13].mxu0  ;;  %v1100_v56 = vpack.c.bf16 %v1094_v30, %v1094_v30 }
 0x32f   : > { %v1097_v35 = vpop.f32.mrb[22].mxu1  ;;  %v1272_v36 = vpop.f32.mrb[14].mxu0 }
 0x330   : > { %v3173_v37 = vsel %vm1687_vm3, %v1275_v32, 0  ;;  %v2511_v38 = vpop.f32.mrb[23].mxu1  ;;  %v2535_v39 = vpop.f32.mrb[15].mxu0  ;;  %v1735_v0 = vsel %vm1687_vm3, %v1100_v56, 0 }
 0x335   : > { %v1211_v40 = vpop.f32.mrb[24].mxu1  ;;  %v1386_v41 = vpop.f32.mrb[16].mxu0 }
 0x336   : > { %v1217_v42 = vpack.c.bf16 %v1211_v40, %v1211_v40  ;;  %v1392_v43 = vpack.c.bf16 %v1386_v41, %v1386_v41  ;;  %v2526_v44 = vpop.f32.mrb[25].mxu1  ;;  %v2550_v45 = vpop.f32.mrb[17].mxu0 }
 0x337   : > { %v1214_v46 = vpop.f32.mrb[26].mxu1  ;;  %v1389_v47 = vpop.f32.mrb[18].mxu0 }
 0x338   : > { %v1548_v48 = vsel %vm1451_vm2, %v1217_v42, 0  ;;  %v1594_v49 = vsel %vm1451_vm2, %v1392_v43, 0  ;;  %v2527_v50 = vpop.f32.mrb[27].mxu1  ;;  %v2551_v51 = vpop.f32.mrb[19].mxu0 }
 0x339   : > { %2573 = vmatpush3.bf16.xpose.msra.mxu0 %v1548_v48  ;;  %2579 = vmatpush3.bf16.xpose.msra.mxu1 %v1594_v49 }
 0x33a   : > { %2584 = vmatprep.subr.bf16.mxu0 %v2814_v1  ;;  %2590 = vmatprep.subr.bf16.mxu1 %v2814_v1 }
 0x33d   : > { %v1327_v54 = vpop.f32.mrb[28].mxu1 }
 0x33e   : > { %v1333_v57 = vmul.f32 0.35355338, %v1327_v54  ;;  %v2542_v58 = vpop.f32.mrb[29].mxu1 }
 0x33f   : > { %v1330_v59 = vpop.f32.mrb[30].mxu1 }
 0x340   : > { %v1334_v62 = vpack.c.bf16 %v1333_v57, %v1333_v57  ;;  %v2543_v63 = vpop.f32.mrb[31].mxu1  ;;  %2575 = vmatmul.mubr.msk.bf16.vlgmr.msra.gmra.mrb[24].mxu0 %vm1451_vm2, %v1159_v55 }
 0x341   : > { %2585 = vmatpush3.bf16.msra.mxu0 %v1689_v60  ;;  %2586 = vmatprep.mubr.msk.bf16.mxu0 %vm2815_vm0, %v2814_v1 }
 0x342   : > { %2581 = vmatmul.mubr.msk.bf16.vlgmr.msra.gmra.mrb[40].mxu1 %vm1451_vm2, %v1334_v62  ;;  %2596 = vmatprep.subr.bf16.mxu0 %v2814_v1 }
 0x343   : > { %2591 = vmatpush3.bf16.msra.mxu1 %v1735_v0  ;;  %2592 = vmatprep.mubr.msk.bf16.mxu1 %vm2815_vm0, %v2814_v1 }
 0x344   : > { %2602 = vmatprep.subr.bf16.mxu1 %v2814_v1 }
 0x345   : > { %v1444_v61 = vpop.f32.mrb[32].mxu1 }
 0x346   : > { %v1450_v2 = vpack.c.bf16 %v1444_v61, %v1444_v61  ;;  %v2558_v3 = vpop.f32.mrb[33].mxu1 }
 0x347   : > { %v1447_v4 = vpop.f32.mrb[34].mxu1 }
 0x348   : > { %v3192_v5 = vsel %vm1687_vm3, %v1450_v2, 0  ;;  %v2559_v6 = vpop.f32.mrb[35].mxu1 }
 0x3fb   : > { %v1492_v7 = vpop.f32.mrb[20].mxu0 }
 0x3fc   : > { %v2564_v8 = vpop.f32.mrb[21].mxu0  ;;  %v1636_v9 = vsel %vm1451_vm2, %v1492_v7, -inf }
 0x3fd   : > { %1637 = vmax.xlane.f32.xlu1 %v1636_v9  ;;  %v1495_v10 = vpop.f32.mrb[22].mxu0  ;;  %v1538_v11 = vpop.f32.mrb[36].mxu1  ;;  %v2716_v9 = vld [vmem:[%s3350_s10] sm:$0xff]  }
 0x3fe   : > { %v2565_v12 = vpop.f32.mrb[23].mxu0  ;;  %v2570_v13 = vpop.f32.mrb[37].mxu1  ;;  %v1639_v16 = vsel %vm1451_vm2, %v1538_v11, -inf  ;;  %v2717_v10 = vld [vmem:[%s3350_s10 + $0x8] sm:$0xff]  }
 0x3ff   : > { %v1541_v14 = vpop.f32.mrb[38].mxu1 }
 0x400   : > { %v2571_v15 = vpop.f32.mrb[39].mxu1 }
 0x401   : > { %1640 = vmax.xlane.f32.xlu1 %v1639_v16 }
 0x413   : > { %v1584_v17 = vpop.f32.mrb[24].mxu0 }
 0x414   : > { %v2576_v19 = vpop.f32.mrb[25].mxu0  ;;  %v1642_v20 = vsel %vm1451_vm2, %v1584_v17, -inf }
 0x415   : > { %1643 = vmax.xlane.f32.xlu0 %v1642_v20  ;;  %v1587_v21 = vpop.f32.mrb[26].mxu0  ;;  %v1630_v22 = vpop.f32.mrb[40].mxu1 }
 0x416   : > { %v2577_v23 = vpop.f32.mrb[27].mxu0  ;;  %v2582_v24 = vpop.f32.mrb[41].mxu1  ;;  %v1645_v25 = vsel %vm1451_vm2, %v1630_v22, -inf }
 0x417   : > { %1646 = vmax.xlane.f32.xlu1 %v1645_v25  ;;  %v1633_v26 = vpop.f32.mrb[42].mxu1 }
 0x418   : > { %v2583_v27 = vpop.f32.mrb[43].mxu1 }
 0x48a   : > { %v1638_v28 = vpop.xlane.xlu1 %1637 }
 0x48b   : > { %v1648_v29 = vsub.f32 %v1492_v7, %v1638_v28  ;;  %v2355_v28 = vld [vmem:[%s3351_s11] ss:$0 sm:$0xff] }
 0x48d   : > { %v1652_v30 = vmul.f32 1.442695, %v1648_v29 }
 0x48e   : > { %v1641_v31 = vpop.xlane.xlu1 %1640 }
 0x48f   : > { %2730 = vpow2.f32 %v1652_v30  ;;  %v1649_v32 = vsub.f32 %v1538_v11, %v1641_v31 }
 0x491   : > { %v1654_v33 = vmul.f32 1.442695, %v1649_v32 }
 0x493   : > { %2732 = vpow2.f32 %v1654_v33 }
 0x499   : > { %v2731_v34 = vpop.eup %2730 }
 0x49a   : > { %v1660_v35 = vsel %vm1451_vm2, %v2731_v34, 0.0 }
 0x49b   : > { %1661 = vadd.xlane.f32.xlu0 %v1660_v35 }
 0x49d   : > { %v2733_v36 = vpop.eup %2732 }
 0x49e   : > { %v1663_v38 = vsel %vm1451_vm2, %v2733_v36, 0.0 }
 0x49f   : > { %1664 = vadd.xlane.f32.xlu1 %v1663_v38 }
 0x4a2   : > { %v1644_v39 = vpop.xlane.xlu0 %1643 }
 0x4a3   : > { %v1650_v40 = vsub.f32 %v1584_v17, %v1644_v39 }
 0x4a4   : > { %v1647_v41 = vpop.xlane.xlu1 %1646 }
 0x4a5   : > { %v1656_v42 = vmul.f32 1.442695, %v1650_v40  ;;  %v1651_v43 = vsub.f32 %v1630_v22, %v1647_v41  ;;  %v2719_v41 = vld [vmem:[%s3354_s14 + $0x8] sm:$0xff]  }
 0x4a7   : > { %2734 = vpow2.f32 %v1656_v42  ;;  %v1658_v44 = vmul.f32 1.442695, %v1651_v43  ;;  %v2720_v42 = vld [vmem:[%s3356_s16] sm:$0xff]   ;;  %v2721_v43 = vld [vmem:[%s3356_s16 + $0x8] sm:$0xff]  }
 0x4a9   : > { %2736 = vpow2.f32 %v1658_v44  ;;  %v2722_v44 = vld [vmem:[%s3356_s16 + $0x10] sm:$0xff]  }
 0x4b1   : > { %v2735_v45 = vpop.eup %2734 }
 0x4b2   : > { %v1666_v46 = vsel %vm1451_vm2, %v2735_v45, 0.0 }
 0x4b3   : > { %v2737_v47 = vpop.eup %2736  ;;  %1667 = vadd.xlane.f32.xlu0 %v1666_v46 }
 0x4b4   : > { %v1669_v48 = vsel %vm1451_vm2, %v2737_v47, 0.0 }
 0x4b5   : > { %1670 = vadd.xlane.f32.xlu1 %v1669_v48 }
 0x528   : > { %v1662_v49 = vpop.xlane.xlu0 %1661 }
 0x529   : > { %2738 = vrcp.f32 %v1662_v49  ;;  %v2356_v49 = vld [vmem:[%s3352_s12] ss:$0 sm:$0xff] }
 0x52c   : > { %v1665_v50 = vpop.xlane.xlu1 %1664 }
 0x52d   : > { %2740 = vrcp.f32 %v1665_v50 }
 0x533   : > { %v2739_v51 = vpop.eup %2738 }
 0x534   : > { %v1676_v52 = vmul.f32 %v2739_v51, %v2731_v34  ;;  %v2357_v51 = vld [vmem:[%s3353_s13] ss:$0 sm:$0xff] }
 0x536   : > { %v1680_v53 = vpack.c.bf16 %v1676_v52, %v1676_v52 }
 0x537   : > { %v2741_v54 = vpop.eup %2740 }
 0x538   : > { %v1677_v55 = vmul.f32 %v2741_v54, %v2733_v36  ;;  %2587 = vmatmul.mubr.msk.bf16.vlgmr.msra.gmra.mrb[28].mxu0 %vm1451_vm2, %v1680_v53 }
 0x539   : > { %2597 = vmatpush3.bf16.msra.mxu0 %v3173_v37  ;;  %2598 = vmatprep.mubr.msk.bf16.mxu0 %vm2815_vm0, %v2814_v1 }
 0x53a   : > { %v1681_v56 = vpack.c.bf16 %v1677_v55, %v1677_v55  ;;  %2608 = vmatprep.subr.bf16.mxu0 %v2814_v1  ;;  %v2723_v55 = vld [vmem:[%s3356_s16 + $0x18] sm:$0xff]  }
 0x53c   : > { %2593 = vmatmul.mubr.msk.bf16.vlgmr.msra.gmra.mrb[44].mxu1 %vm1451_vm2, %v1681_v56  ;;  %v2724_v56 = vld [vmem:[%s3356_s16 + $0x20] sm:$0xff]  }
 0x53d   : > { %2603 = vmatpush3.bf16.msra.mxu1 %v3192_v5  ;;  %2604 = vmatprep.mubr.msk.bf16.mxu1 %vm2815_vm0, %v2814_v1 }
 0x53e   : > { %2616 = vmatprep.subr.bf16.mxu1 %v2814_v1 }
 0x540   : > { %v1668_v57 = vpop.xlane.xlu0 %1667 }
 0x541   : > { %2742 = vrcp.f32 %v1668_v57  ;;  %v2725_v57 = vld [vmem:[%s3356_s16 + $0x28] sm:$0xff]  }
 0x542   : > { %v1671_v58 = vpop.xlane.xlu1 %1670 }
 0x543   : > { %2744 = vrcp.f32 %v1671_v58  ;;  %v2726_v58 = vld [vmem:[%s3356_s16 + $0x30] sm:$0xff]  }
 0x54b   : > { %v2743_v37 = vpop.eup %2742 }
 0x54c   : > { %v1678_v59 = vmul.f32 %v2743_v37, %v2735_v45  ;;  %v2727_v37 = vld [vmem:[%s3356_s16 + $0x38] sm:$0xff]  }
 0x54d   : > { %v2745_v60 = vpop.eup %2744 }
 0x54e   : > { %v1679_v62 = vmul.f32 %v2745_v60, %v2737_v47  ;;  %v1682_v63 = vpack.c.bf16 %v1678_v59, %v1678_v59  ;;  %v2358_v59 = vld [vmem:[%s3355_s15] ss:$0 sm:$0xff] }
 0x550   : > { %2599 = vmatmul.mubr.msk.bf16.vlgmr.msra.gmra.mrb[32].mxu0 %vm1451_vm2, %v1682_v63  ;;  %v1683_v0 = vpack.c.bf16 %v1679_v62, %v1679_v62 }
 0x551   : > { %2612 = vmatprep.mubr.msk.bf16.mxu0 %vm2815_vm0, %v2814_v1  ;;  %2609 = vmatpush3.bf16.msra.mxu0 %v2716_v9 }
 0x552   : > { %2605 = vmatmul.mubr.msk.bf16.vlgmr.msra.gmra.mrb[48].mxu1 %vm1451_vm2, %v1683_v0  ;;  %2610 = vmatprep.subr.bf16.mxu0 %v2814_v1 }
 0x553   : > { %2620 = vmatprep.mubr.msk.bf16.mxu1 %vm2815_vm0, %v2814_v1 }
 0x555   : > { %2611 = vmatpush3.bf16.msra.mxu0 %v2717_v10 }
 0x556   : > { %2624 = vmatprep.subr.bf16.mxu0 %v2814_v1 }
 0x60b   : > { %v1725_v61 = vpop.f32.mrb[28].mxu0 }
 0x60c   : > { %v2588_v2 = vpop.f32.mrb[29].mxu0 }
 0x60d   : > { %v1728_v3 = vpop.f32.mrb[30].mxu0 }
 0x60e   : > { %v2589_v4 = vpop.f32.mrb[31].mxu0 }
 0x60f   : > { %v1771_v5 = vpop.f32.mrb[44].mxu1 }
 0x610   : > { %1870 = vrot.lane.b32.xlu0 %v1771_v5, %s2816_s19  ;;  %v2594_v6 = vpop.f32.mrb[45].mxu1  ;;  %s2185_s19 = sshll.u32 %s579_s26, 4  ;;  %s3299_s19 = int_to_ptr.vmem [resolvable:$true] %s2185_s19 }
 0x611   : > { %v1774_v7 = vpop.f32.mrb[46].mxu1  ;;  %p2757_p0 = scmp.lt.s32.totalorder %s3299_s19, %s2755_s23 }
 0x612   : > { %v2595_v8 = vpop.f32.mrb[47].mxu1 }
 0x613   : > { %v2370_v8 = vld [vmem:[%s3357_s17] ss:$0 sm:$0xff] }
 0x623   : > { %v1817_v11 = vpop.f32.mrb[32].mxu0 }
 0x624   : > { %v2600_v12 = vpop.f32.mrb[33].mxu0  ;;  %1874 = vrot.lane.b32.xlu1 %v1817_v11, %s2817_s30  ;;  %s2750_s30 = scalar_lea.vmem %s3299_s19, 128 }
 0x625   : > { %v1820_v13 = vpop.f32.mrb[34].mxu0  ;;  %v1863_v14 = vpop.f32.mrb[48].mxu1  ;;  %p2751_p11 = scmp.ne.s32.totalorder %s3299_s19, %s2750_s30  ;;  %p2758_p1 = scmp.lt.s32.totalorder %s2756_s21, %s2750_s30 }
 0x626   : > { %v2601_v15 = vpop.f32.mrb[35].mxu0  ;;  %v2606_v16 = vpop.f32.mrb[49].mxu1 }
 0x627   : > { %v1866_v17 = vpop.f32.mrb[50].mxu1  ;;  %p2752_p12 = pnand %p2751_p11, %p2953_p5  ;;  %p2759_p2 = por %p2758_p1, %p2757_p0 }
 0x628   : > { %1878 = vrot.lane.b32.xlu1 %v1863_v14, %s2818_s1  ;;  %v2607_v19 = vpop.f32.mrb[51].mxu1  ;;  %s3390_s1 = smov %s3389_s27 }
 0x629   : > { %p2753_p13 = pneg %p2752_p12 }
 0x62b   : > { %p2760_p3 = pnand %p2759_p2, %p2753_p13 }
 0x682   : > { %v1871_v20 = vpop.permute.xlu0 %1870 }
 0x683   : > { %v1881_v22 = vsel %vm1451_vm2, %v1725_v61, %v1871_v20 }
 0x696   : > { %v1875_v21 = vpop.permute.xlu1 %1874 }
 0x697   : > { %v1883_v23 = vsel %vm1882_vm4, %v1881_v22, %v1875_v21 }
 0x69a   : > { %v1879_v24 = vpop.permute.xlu1 %1878 }
 0x69b   : > { %v1885_v25 = vsel %vm1884_vm5, %v1883_v23, %v1879_v24 }
 0x69c   : > { %v1886_v26 = vpack.c.bf16 %v1885_v25, %v1885_v25 }
 0x69e   : > { %2613 = vmatmul.mubr.msk.bf16.vlgmr.msra.gmra.mrb[36].mxu0 %vm613_vm1, %v1886_v26 }
 0x69f   : > { %2640 = vmatprep.mubr.msk.bf16.mxu0 %vm2815_vm0, %v2814_v1  ;;  %2625 = vmatpush3.bf16.msra.mxu0 %v2720_v42 }
 0x6a0   : > { %2626 = vmatprep.subr.bf16.mxu0 %v2814_v1 }
 0x6a3   : > { %2627 = vmatpush3.bf16.msra.mxu0 %v2721_v43 }
 0x6a4   : > { %2628 = vmatprep.subr.bf16.mxu0 %v2814_v1 }
 0x6a7   : > { %2629 = vmatpush3.bf16.msra.mxu0 %v2722_v44 }
 0x6a8   : > { %2630 = vmatprep.subr.bf16.mxu0 %v2814_v1 }
 0x6ab   : > { %2631 = vmatpush3.bf16.msra.mxu0 %v2723_v55 }
 0x6ac   : > { %2632 = vmatprep.subr.bf16.mxu0 %v2814_v1 }
 0x6af   : > { %2633 = vmatpush3.bf16.msra.mxu0 %v2724_v56 }
 0x6b0   : > { %2634 = vmatprep.subr.bf16.mxu0 %v2814_v1 }
 0x6b3   : > { %2635 = vmatpush3.bf16.msra.mxu0 %v2725_v57 }
 0x6b4   : > { %2636 = vmatprep.subr.bf16.mxu0 %v2814_v1 }
 0x6b7   : > { %2637 = vmatpush3.bf16.msra.mxu0 %v2726_v58 }
 0x6b8   : > { %2638 = vmatprep.subr.bf16.mxu0 %v2814_v1 }
 0x6bb   : > { %2639 = vmatpush3.bf16.msra.mxu0 %v2727_v37 }
 0x771   : > { %v1940_v27 = vpop.f32.mrb[36].mxu0 }
 0x772   : > { %v1946_v29 = vadd.f32 %v1940_v27, %v3002_v18  ;;  %v2614_v30 = vpop.f32.mrb[37].mxu0  ;;  %v2718_v18 = vld [vmem:[%s3354_s14] sm:$0xff]  }
 0x773   : > { %v1943_v31 = vpop.f32.mrb[38].mxu0  ;;  %2617 = vmatpush3.bf16.msra.mxu1 %v2718_v18 }
 0x774   : > { %v3234_v32 = vadd.f32 %v2355_v28, %v1946_v29  ;;  %v2615_v33 = vpop.f32.mrb[39].mxu0  ;;  %2618 = vmatprep.subr.bf16.mxu1 %v2814_v1 }
 0x776   : > { %v1957_v34 = vsel %vm613_vm1, %v3234_v32, 0.0 }
 0x777   : > { %1958 = vadd.xlane.f32.xlu1 %v1957_v34  ;;  %2619 = vmatpush3.bf16.msra.mxu1 %v2719_v41 }
 0x804   : > { %v1959_v35 = vpop.xlane.xlu1 %1958 }
 0x805   : > { %v1960_v36 = vmul.f32 0.03125, %v1959_v35 }
 0x807   : > { %v1961_v38 = vsub.f32 %v3234_v32, %v1960_v36 }
 0x809   : > { %v1962_v39 = vmul.f32 %v1961_v38, %v1961_v38 }
 0x80b   : > { %v1963_v40 = vsel %vm613_vm1, %v1962_v39, 0.0 }
 0x80c   : > { %1964 = vadd.xlane.f32.xlu0 %v1963_v40 }
 0x899   : > { %v1965_v45 = vpop.xlane.xlu0 %1964 }
 0x89a   : > { %v1966_v46 = vmul.f32 0.03125, %v1965_v45 }
 0x89c   : > { %v1967_v47 = vadd.f32 1e-05, %v1966_v46 }
 0x89e   : > { %2746 = vrsqrt.f32 %v1967_v47 }
 0x8a8   : > { %v2747_v48 = vpop.eup %2746 }
 0x8a9   : > { %v1969_v50 = vmul.f32 %v2747_v48, %v1961_v38 }
 0x8ab   : > { %v1976_v52 = vmul.f32 %v2356_v49, %v1969_v50 }
 0x8ad   : > { %v1983_v53 = vadd.f32 %v2357_v51, %v1976_v52 }
 0x8af   : > { %v1984_v54 = vpack.c.bf16 %v1983_v53, %v1983_v53 }
 0x8b1   : > { %2621 = vmatmul.mubr.msk.bf16.vlgmr.msra.gmra.mrb[52].mxu1 %vm613_vm1, %v1984_v54 }
 0x984   : > { %v2045_v60 = vpop.f32.mrb[52].mxu1 }
 0x985   : > { %v2046_v62 = vadd.f32 %v2358_v59, %v2045_v60  ;;  %v2622_v63 = vpop.f32.mrb[53].mxu1 }
 0x986   : > { %v2048_v0 = vpop.f32.mrb[54].mxu1 }
 0x987   : > { %v2052_v61 = vmul.f32 0.70710677, %v2046_v62  ;;  %v2623_v2 = vpop.f32.mrb[55].mxu1  ;;  %v2051_v1 = vmul.f32 0.5, %v2046_v62 }
 0x989   : > { %2748 = verf.f32 %v2052_v61 }
 0x993   : > { %v2749_v3 = vpop.eup %2748 }
 0x994   : > { %v2054_v4 = vadd.f32 1.0, %v2749_v3 }
 0x996   : > { %v2055_v5 = vmul.f32 %v2054_v4, %v2051_v1 }
 0x998   : > { %v2056_v6 = vpack.c.bf16 %v2055_v5, %v2055_v5 }
 0x99a   : > { %2641 = vmatmul.mubr.bf16.vlgmr.msra.gmra.mrb[40].mxu0 %v2056_v6 }
 0xa6d   : > { %v2155_v7 = vpop.f32.mrb[40].mxu0 }
 0xa6e   : > { %v2161_v9 = vadd.f32 %v2155_v7, %v3234_v32  ;;  %v2642_v10 = vpop.f32.mrb[41].mxu0 }
 0xa6f   : > { %v2158_v11 = vpop.f32.mrb[42].mxu0 }
 0xa70   : > { %v2169_v12 = vadd.f32 %v2370_v8, %v2161_v9  ;;  %v2643_v13 = vpop.f32.mrb[43].mxu0 }
 0xa72   : > { %2170 = vst.msk [vmem:[%s579_s26] sm:$0xff] %vm613_vm1, %v2169_v12 }
 0xa73   : > { %2763 = shalt.err (!%p2760_p3)
}
 0xa74   : > { %s2764_s22 = scalar_lea.hbm %s3297_s29, 128  ;;  %s2768_s20 = scalar_lea.hbm %s3390_s1, 256 }
 0xa75   : > { %p2765_p4 = scmp.ne.s32.totalorder %s3297_s29, %s2764_s22  ;;  %p2769_p9 = scmp.lt.u32.totalorder %s3297_s29, %s3390_s1 }
 0xa76   : > { %p2770_p10 = scmp.lt.u32.totalorder %s2768_s20, %s2764_s22  ;;  %p2772_p12 = scmp.lt.u32.totalorder %s2764_s22, %s3297_s29 }
 0xa77   : > { %p2766_p7 = pnand %p2765_p4, %p2953_p5 }
 0xa78   : > { %p2771_p11 = por %p2770_p10, %p2769_p9 }
 0xa79   : > { %p2767_p8 = pneg %p2766_p7 }
 0xa7a   : > { %p2773_p13 = por %p2772_p12, %p2771_p11 }
 0xa7c   : > { %p2774_p0 = pnand %p2773_p13, %p2767_p8 }
 0xa7e   : > { %2777 = shalt.err (!%p2774_p0)
}
 0xa7f   : > { %2644 = dma.vmem_to_hbm [thread:$0]  (%p2953_p5), %s3299_s19, 128, %s3297_s29, %s2172_s0  }
 0xa80 PF: > { %s3391_s30 = sld [smem:[#allocation7_spill]]  ;;  %s3392_s2 = sld [smem:[#allocation5_spill]] }
 0xa86   : > { %p2650_p1 = scmp.ge.s32.totalorder %s3391_s30, 2  ;;  %s2197_s21 = sand.u32 1, %s3392_s2  }
 0xa87   : > { %s2198_s25 = scalar_lea.sflag [#allocation3], %s2197_s21 }
 0xa88   : > { %p2647_p2 = pnand %p2650_p1, %p2957_p6 }
 0xa8a   : > { %2795 = dma.done.wait (!%p2647_p2), %s2198_s25, 128  }
 0xa8b   : > { %2797 = vsyncadd (!%p2647_p2), %s2198_s25, 4294967168  ;;  %s3394_s30 = sld [smem:[#allocation8_spill]]  ;;  %s3395_s22 = sld [smem:[#allocation6_spill]] }
 0xa8c   : > { %s3396_s29 = sld [smem:[#allocation9_spill]]  ;;  %s3397_s27 = smov %s2804_s28 }
 0xa91   : > { %p28_p3 = scmp.ge.s32.totalorder %s3394_s30, 4   ;;  %s3398_s28 = smov %s3395_s22 }
 0xa93   :  { %30 = sbr.rel (!%p28_p3) target bundleno = 9 (0x9), region = 139 }
 0xa9a   :  { %2203 = vsyncpa [#allocation3], 1 }
 0xa9b   :  { %2205 = vsyncpa [#allocation3 + $0x1], 1 }

</bundles_post_ra>
